<compile_context>
chip_gen: v7x
topology: tpu7x:2x2x1
jax: 0.10.0
libtpu: 0.0.40
codegen_flags: <defaults>
</compile_context>

<pallas_src>
import jax
import jax.numpy as jnp
from jax.experimental import pallas as pl
from jax.experimental.pallas import tpu as pltpu

# ----------------------------- model config (scaled-down roberta) ------------
VOCAB = 100
MAX_POS = 40
HIDDEN = 128
NUM_HEADS = 4
HEAD_DIM = HIDDEN // NUM_HEADS
FFN = 256
NUM_LAYERS = 2
N_CLASSES = 5
PAD_ID = 1
SEQ = 16
BATCH = 2
LN_EPS = 1e-5


# ----------------------------- in-kernel helpers ------------------------------
def _layernorm(x, g, b, eps=LN_EPS):
    mean = jnp.mean(x, axis=-1, keepdims=True)
    var = jnp.mean((x - mean) ** 2, axis=-1, keepdims=True)
    return (x - mean) * jax.lax.rsqrt(var + eps) * g + b


def _mxu_dot(a_f32, w_bf16):
    # bf16 operands for the MXU, f32 accumulation; elementwise math stays f32.
    return jnp.dot(a_f32.astype(jnp.bfloat16), w_bf16,
                   preferred_element_type=jnp.float32)


# ----------------------------- fused encoder kernel ---------------------------
def _encoder_kernel(x_ref, bias_ref, emb_g_ref, emb_b_ref,
                    qkv_w_ref, qkv_b_ref, o_w_ref, o_b_ref,
                    ln1_g_ref, ln1_b_ref, fi_w_ref, fi_b_ref,
                    fo_w_ref, fo_b_ref, ln2_g_ref, ln2_b_ref,
                    out_ref):
    B, S, D, H, hd = BATCH, SEQ, HIDDEN, NUM_HEADS, HEAD_DIM
    scale = 1.0 / (hd ** 0.5)

    bias_all = bias_ref[...]                               # (B, S) additive key bias (f32)

    # Embedding LayerNorm fused in (no separate kernel launch).
    x = _layernorm(x_ref[...], emb_g_ref[...], emb_b_ref[...])

    for l in range(NUM_LAYERS):                            # static unroll: whole stack resident
        # ---- fused QKV projection: one (B*S, D) @ (D, 3D) matmul ----
        qkv = _mxu_dot(x, qkv_w_ref[l]) + qkv_b_ref[l]     # (B*S, 3D), f32

        o_w_l = o_w_ref[l]                                 # (D, D) bf16

        # ---- attention with the output projection folded into the head loop ----
        o_slabs = []
        for b in range(B):
            r0, r1 = b * S, (b + 1) * S
            bias_b = bias_all[b:b + 1, :]                  # (1, S)
            acc = jnp.zeros((S, D), jnp.float32)
            for h in range(H):
                c0, c1 = h * hd, (h + 1) * hd
                q = qkv[r0:r1, c0:c1]                      # (S, hd) f32
                k = qkv[r0:r1, D + c0:D + c1]
                v = qkv[r0:r1, 2 * D + c0:2 * D + c1]
                s = jnp.dot(q, k.T, preferred_element_type=jnp.float32) * scale
                s = s + bias_b                             # f32 softmax (mask-safe)
                s = s - jnp.max(s, axis=-1, keepdims=True)
                p = jnp.exp(s)
                p = p * pl.reciprocal(jnp.sum(p, axis=-1, keepdims=True), approx=True)
                head_out = jnp.dot(p, v, preferred_element_type=jnp.float32)   # (S, hd)
                # per-head slice of the output projection; keeps everything lane-dense
                acc = acc + jnp.dot(head_out.astype(jnp.bfloat16),
                                    o_w_l[c0:c1, :],
                                    preferred_element_type=jnp.float32)
            o_slabs.append(acc)
        o = jnp.concatenate(o_slabs, axis=0) + o_b_ref[l]  # (B*S, D)

        # ---- residual + LayerNorm fused epilogue ----
        x = _layernorm(x + o, ln1_g_ref[l], ln1_b_ref[l])

        # ---- FFN (GELU) + residual + LayerNorm fused epilogue ----
        # TODO(synk): HF RoBERTa uses exact erf GELU; tanh approximation used here.
        hidden = _mxu_dot(x, fi_w_ref[l]) + fi_b_ref[l]
        hidden = jax.nn.gelu(hidden, approximate=True)
        ff = _mxu_dot(hidden, fo_w_ref[l]) + fo_b_ref[l]
        x = _layernorm(x + ff, ln2_g_ref[l], ln2_b_ref[l])

    out_ref[...] = x.astype(out_ref.dtype)


def pallas_encoder(x, mask_bias, p):
    M, D = x.shape
    return pl.pallas_call(
        _encoder_kernel,
        out_shape=jax.ShapeDtypeStruct((M, D), jnp.float32),
        compiler_params=pltpu.CompilerParams(vmem_limit_bytes=32 * 1024 * 1024),
    )(x, mask_bias,
      p["emb_ln_g"], p["emb_ln_b"],
      p["qkv_w"], p["qkv_b"], p["o_w"], p["o_b"],
      p["ln1_g"], p["ln1_b"], p["fi_w"], p["fi_b"],
      p["fo_w"], p["fo_b"], p["ln2_g"], p["ln2_b"])


# ----------------------------- parameter init (deterministic) ----------------
def init_params(key):
    def dense(k, din, dout):
        kw, _ = jax.random.split(k)
        return (0.02 * jax.random.normal(kw, (din, dout), jnp.float32),
                jnp.zeros((dout,), jnp.float32))

    keys = jax.random.split(key, 4 + NUM_LAYERS)
    params = {
        "word_emb": 0.02 * jax.random.normal(keys[0], (VOCAB, HIDDEN), jnp.float32),
        "pos_emb": 0.02 * jax.random.normal(keys[1], (MAX_POS, HIDDEN), jnp.float32),
        "type_emb": 0.02 * jax.random.normal(keys[2], (1, HIDDEN), jnp.float32),
        "emb_ln_g": jnp.ones((1, HIDDEN), jnp.float32),
        "emb_ln_b": jnp.zeros((1, HIDDEN), jnp.float32),
    }

    qkv_w, qkv_b, o_w, o_b = [], [], [], []
    fi_w, fi_b, fo_w, fo_b = [], [], [], []
    ln1_g, ln1_b, ln2_g, ln2_b = [], [], [], []
    for i in range(NUM_LAYERS):
        lk = jax.random.split(keys[3 + i], 6)
        qw, qb = dense(lk[0], HIDDEN, HIDDEN)
        kw, kb = dense(lk[1], HIDDEN, HIDDEN)
        vw, vb = dense(lk[2], HIDDEN, HIDDEN)
        ow, ob = dense(lk[3], HIDDEN, HIDDEN)
        fiw, fib = dense(lk[4], HIDDEN, FFN)
        fow, fob = dense(lk[5], FFN, HIDDEN)
        # fused QKV weight [D, 3D] (bf16 for the MXU), biases/LN params stay f32
        qkv_w.append(jnp.concatenate([qw, kw, vw], axis=1).astype(jnp.bfloat16))
        qkv_b.append(jnp.concatenate([qb, kb, vb])[None, :])
        o_w.append(ow.astype(jnp.bfloat16));  o_b.append(ob[None, :])
        fi_w.append(fiw.astype(jnp.bfloat16)); fi_b.append(fib[None, :])
        fo_w.append(fow.astype(jnp.bfloat16)); fo_b.append(fob[None, :])
        ln1_g.append(jnp.ones((1, HIDDEN), jnp.float32))
        ln1_b.append(jnp.zeros((1, HIDDEN), jnp.float32))
        ln2_g.append(jnp.ones((1, HIDDEN), jnp.float32))
        ln2_b.append(jnp.zeros((1, HIDDEN), jnp.float32))

    params.update(
        qkv_w=jnp.stack(qkv_w), qkv_b=jnp.stack(qkv_b),
        o_w=jnp.stack(o_w), o_b=jnp.stack(o_b),
        ln1_g=jnp.stack(ln1_g), ln1_b=jnp.stack(ln1_b),
        fi_w=jnp.stack(fi_w), fi_b=jnp.stack(fi_b),
        fo_w=jnp.stack(fo_w), fo_b=jnp.stack(fo_b),
        ln2_g=jnp.stack(ln2_g), ln2_b=jnp.stack(ln2_b),
    )

    dk = jax.random.split(keys[3 + NUM_LAYERS], 2)
    params["cls_dense_w"], params["cls_dense_b"] = dense(dk[0], HIDDEN, HIDDEN)
    params["cls_out_w"], params["cls_out_b"] = dense(dk[1], HIDDEN, N_CLASSES)
    return params


# ----------------------------- forward pass -----------------------------------
def forward(params, input_ids, attention_mask):
    B, S = input_ids.shape
    D = HIDDEN

    # RoBERTa position ids (create_position_ids_from_input_ids):
    # mask = (ids != pad); pos = cumsum(mask)*mask + pad
    pos_mask = (input_ids != PAD_ID).astype(jnp.int32)
    pos_ids = jnp.cumsum(pos_mask, axis=1) * pos_mask + PAD_ID

    # --- embeddings (gathers are glue / plain JAX) ---
    x = (params["word_emb"][input_ids]
         + params["pos_emb"][pos_ids]
         + params["type_emb"][0][None, None, :])
    x = x.reshape(B * S, D)

    # additive attention-mask bias: 0 for real tokens, -1e9 for padding keys
    mask_bias = (1.0 - attention_mask.astype(jnp.float32)) * -1e9   # (B, S)

    # --- whole encoder stack in ONE Pallas kernel ---
    h = pallas_encoder(x, mask_bias, params)                        # (B*S, D)

    # --- RobertaClassificationHead: <s> token, dense+tanh, out_proj ---
    # (2x128 @ 128x128 and 2x128 @ 128x5 are launch-overhead-only; plain JAX)
    cls = h.reshape(B, S, D)[:, 0, :]
    pooled = jnp.tanh(cls @ params["cls_dense_w"] + params["cls_dense_b"])
    logits = pooled @ params["cls_out_w"] + params["cls_out_b"]
    return logits


# ----------------------------- main -------------------------------------------
if __name__ == "__main__":
    key = jax.random.PRNGKey(0)
    kp, ki = jax.random.split(key)
    params = init_params(kp)

    input_ids = jax.random.randint(ki, (BATCH, SEQ), 2, VOCAB, dtype=jnp.int32)
    # second sequence has 4 padding tokens at the end
    attention_mask = jnp.array(
        [[1] * SEQ, [1] * (SEQ - 4) + [0] * 4], dtype=jnp.int32)
    input_ids = jnp.where(attention_mask > 0, input_ids, PAD_ID)

    logits = jax.jit(forward)(params, input_ids, attention_mask)
    jax.block_until_ready(logits)
    assert logits.shape == (BATCH, N_CLASSES)
    print("KERNEL_OK")
</pallas_src>

<mosaic_0001>
module attributes {stable_mosaic.version = 11 : i64} {
  func.func @_encoder_kernel(%arg0: memref<32x128xf32, #tpu.memory_space<vmem>>, %arg1: memref<2x16xf32, #tpu.memory_space<vmem>>, %arg2: memref<1x128xf32, #tpu.memory_space<vmem>>, %arg3: memref<1x128xf32, #tpu.memory_space<vmem>>, %arg4: memref<2x128x384xbf16, #tpu.memory_space<vmem>>, %arg5: memref<2x1x384xf32, #tpu.memory_space<vmem>>, %arg6: memref<2x128x128xbf16, #tpu.memory_space<vmem>>, %arg7: memref<2x1x128xf32, #tpu.memory_space<vmem>>, %arg8: memref<2x1x128xf32, #tpu.memory_space<vmem>>, %arg9: memref<2x1x128xf32, #tpu.memory_space<vmem>>, %arg10: memref<2x128x256xbf16, #tpu.memory_space<vmem>>, %arg11: memref<2x1x256xf32, #tpu.memory_space<vmem>>, %arg12: memref<2x256x128xbf16, #tpu.memory_space<vmem>>, %arg13: memref<2x1x128xf32, #tpu.memory_space<vmem>>, %arg14: memref<2x1x128xf32, #tpu.memory_space<vmem>>, %arg15: memref<2x1x128xf32, #tpu.memory_space<vmem>>, %arg16: memref<32x128xf32, #tpu.memory_space<vmem>>) attributes {dimension_semantics = [], scalar_prefetch = 0 : i64, scratch_operands = 0 : i64, tpu.core_type = #tpu.core_type<tc>} {
    %c0 = arith.constant 0 : index
    %c0_0 = arith.constant 0 : index
    %0 = vector.load %arg1[%c0, %c0_0] : memref<2x16xf32, #tpu.memory_space<vmem>>, vector<2x16xf32>
    %c0_1 = arith.constant 0 : index
    %c0_2 = arith.constant 0 : index
    %1 = vector.load %arg0[%c0_1, %c0_2] : memref<32x128xf32, #tpu.memory_space<vmem>>, vector<32x128xf32>
    %c0_3 = arith.constant 0 : index
    %c0_4 = arith.constant 0 : index
    %2 = vector.load %arg2[%c0_3, %c0_4] : memref<1x128xf32, #tpu.memory_space<vmem>>, vector<1x128xf32>
    %c0_5 = arith.constant 0 : index
    %c0_6 = arith.constant 0 : index
    %3 = vector.load %arg3[%c0_5, %c0_6] : memref<1x128xf32, #tpu.memory_space<vmem>>, vector<1x128xf32>
    %cst = arith.constant dense<0.000000e+00> : vector<32xf32>
    %4 = vector.multi_reduction <add>, %1, %cst [1] : vector<32x128xf32> to vector<32xf32>
    %5 = vector.shape_cast %4 : vector<32xf32> to vector<32x1xf32>
    %cst_7 = arith.constant 1.280000e+02 : f32
    %6 = vector.broadcast %cst_7 : f32 to vector<32x1xf32>
    %7 = arith.divf %5, %6 : vector<32x1xf32>
    %8 = vector.broadcast %7 : vector<32x1xf32> to vector<32x128xf32>
    %9 = arith.subf %1, %8 : vector<32x128xf32>
    %10 = arith.mulf %9, %9 : vector<32x128xf32>
    %cst_8 = arith.constant dense<0.000000e+00> : vector<32xf32>
    %11 = vector.multi_reduction <add>, %10, %cst_8 [1] : vector<32x128xf32> to vector<32xf32>
    %12 = vector.shape_cast %11 : vector<32xf32> to vector<32x1xf32>
    %cst_9 = arith.constant 1.280000e+02 : f32
    %13 = vector.broadcast %cst_9 : f32 to vector<32x1xf32>
    %14 = arith.divf %12, %13 : vector<32x1xf32>
    %15 = vector.broadcast %7 : vector<32x1xf32> to vector<32x128xf32>
    %16 = arith.subf %1, %15 : vector<32x128xf32>
    %cst_10 = arith.constant 9.99999974E-6 : f32
    %17 = vector.broadcast %cst_10 : f32 to vector<32x1xf32>
    %18 = arith.addf %14, %17 : vector<32x1xf32>
    %19 = math.rsqrt %18 : vector<32x1xf32>
    %20 = vector.broadcast %19 : vector<32x1xf32> to vector<32x128xf32>
    %21 = arith.mulf %16, %20 : vector<32x128xf32>
    %22 = vector.broadcast %2 : vector<1x128xf32> to vector<32x128xf32>
    %23 = arith.mulf %21, %22 : vector<32x128xf32>
    %24 = vector.broadcast %3 : vector<1x128xf32> to vector<32x128xf32>
    %25 = arith.addf %23, %24 : vector<32x128xf32>
    %c0_11 = arith.constant 0 : index
    %c0_12 = arith.constant 0 : index
    %c0_13 = arith.constant 0 : index
    %26 = vector.load %arg4[%c0_11, %c0_12, %c0_13] : memref<2x128x384xbf16, #tpu.memory_space<vmem>>, vector<1x128x384xbf16>
    %27 = vector.shape_cast %26 : vector<1x128x384xbf16> to vector<128x384xbf16>
    %28 = arith.truncf %25 : vector<32x128xf32> to vector<32x128xbf16>
    %cst_14 = arith.constant dense<0.000000e+00> : vector<32x384xf32>
    %29 = tpu.matmul %28, %27, %cst_14 {dimension_numbers = #tpu.dot_dimension_numbers<[1], [0], [0], [1], [0, 0, 1, 1], [], []>} : vector<32x128xbf16>, vector<128x384xbf16>, vector<32x384xf32> -> vector<32x384xf32>
    %c0_15 = arith.constant 0 : index
    %c0_16 = arith.constant 0 : index
    %c0_17 = arith.constant 0 : index
    %30 = vector.load %arg5[%c0_15, %c0_16, %c0_17] : memref<2x1x384xf32, #tpu.memory_space<vmem>>, vector<1x1x384xf32>
    %31 = vector.shape_cast %30 : vector<1x1x384xf32> to vector<1x384xf32>
    %32 = vector.broadcast %31 : vector<1x384xf32> to vector<32x384xf32>
    %33 = arith.addf %29, %32 : vector<32x384xf32>
    %c0_18 = arith.constant 0 : index
    %c0_19 = arith.constant 0 : index
    %c0_20 = arith.constant 0 : index
    %34 = vector.load %arg6[%c0_18, %c0_19, %c0_20] : memref<2x128x128xbf16, #tpu.memory_space<vmem>>, vector<1x128x128xbf16>
    %35 = vector.shape_cast %34 : vector<1x128x128xbf16> to vector<128x128xbf16>
    %36 = vector.extract_strided_slice %0 {offsets = [0, 0], sizes = [1, 16], strides = [1, 1]} : vector<2x16xf32> to vector<1x16xf32>
    %cst_21 = arith.constant 0.000000e+00 : f32
    %37 = vector.broadcast %cst_21 : f32 to vector<16x128xf32>
    %38 = vector.extract_strided_slice %33 {offsets = [0, 0], sizes = [16, 32], strides = [1, 1]} : vector<32x384xf32> to vector<16x32xf32>
    %39 = vector.extract_strided_slice %33 {offsets = [0, 128], sizes = [16, 32], strides = [1, 1]} : vector<32x384xf32> to vector<16x32xf32>
    %40 = vector.extract_strided_slice %33 {offsets = [0, 256], sizes = [16, 32], strides = [1, 1]} : vector<32x384xf32> to vector<16x32xf32>
    %41 = tpu.transpose %39, [1, 0] : vector<16x32xf32> -> vector<32x16xf32>
    %cst_22 = arith.constant dense<0.000000e+00> : vector<16x16xf32>
    %42 = tpu.matmul %38, %41, %cst_22 {dimension_numbers = #tpu.dot_dimension_numbers<[1], [0], [0], [1], [0, 0, 1, 1], [], []>} : vector<16x32xf32>, vector<32x16xf32>, vector<16x16xf32> -> vector<16x16xf32>
    %cst_23 = arith.constant 0.176776692 : f32
    %43 = vector.broadcast %cst_23 : f32 to vector<16x16xf32>
    %44 = arith.mulf %42, %43 : vector<16x16xf32>
    %45 = vector.broadcast %36 : vector<1x16xf32> to vector<16x16xf32>
    %46 = arith.addf %44, %45 : vector<16x16xf32>
    %cst_24 = arith.constant dense<0xFF800000> : vector<16xf32>
    %47 = vector.multi_reduction <maximumf>, %46, %cst_24 [1] : vector<16x16xf32> to vector<16xf32>
    %48 = vector.shape_cast %47 : vector<16xf32> to vector<16x1xf32>
    %49 = vector.broadcast %48 : vector<16x1xf32> to vector<16x16xf32>
    %50 = arith.subf %46, %49 : vector<16x16xf32>
    %51 = math.exp %50 : vector<16x16xf32>
    %cst_25 = arith.constant dense<0.000000e+00> : vector<16xf32>
    %52 = vector.multi_reduction <add>, %51, %cst_25 [1] : vector<16x16xf32> to vector<16xf32>
    %53 = vector.shape_cast %52 : vector<16xf32> to vector<16x1xf32>
    %54 = tpu.reciprocal %53 {approx = true} : vector<16x1xf32> -> vector<16x1xf32>
    %55 = vector.broadcast %54 : vector<16x1xf32> to vector<16x16xf32>
    %56 = arith.mulf %51, %55 : vector<16x16xf32>
    %cst_26 = arith.constant dense<0.000000e+00> : vector<16x32xf32>
    %57 = tpu.matmul %56, %40, %cst_26 {dimension_numbers = #tpu.dot_dimension_numbers<[1], [0], [0], [1], [0, 0, 1, 1], [], []>} : vector<16x16xf32>, vector<16x32xf32>, vector<16x32xf32> -> vector<16x32xf32>
    %58 = arith.truncf %57 : vector<16x32xf32> to vector<16x32xbf16>
    %59 = vector.extract_strided_slice %35 {offsets = [0, 0], sizes = [32, 128], strides = [1, 1]} : vector<128x128xbf16> to vector<32x128xbf16>
    %cst_27 = arith.constant dense<0.000000e+00> : vector<16x128xf32>
    %60 = tpu.matmul %58, %59, %cst_27 {dimension_numbers = #tpu.dot_dimension_numbers<[1], [0], [0], [1], [0, 0, 1, 1], [], []>} : vector<16x32xbf16>, vector<32x128xbf16>, vector<16x128xf32> -> vector<16x128xf32>
    %61 = arith.addf %37, %60 : vector<16x128xf32>
    %62 = vector.extract_strided_slice %33 {offsets = [0, 32], sizes = [16, 32], strides = [1, 1]} : vector<32x384xf32> to vector<16x32xf32>
    %63 = vector.extract_strided_slice %33 {offsets = [0, 160], sizes = [16, 32], strides = [1, 1]} : vector<32x384xf32> to vector<16x32xf32>
    %64 = vector.extract_strided_slice %33 {offsets = [0, 288], sizes = [16, 32], strides = [1, 1]} : vector<32x384xf32> to vector<16x32xf32>
    %65 = tpu.transpose %63, [1, 0] : vector<16x32xf32> -> vector<32x16xf32>
    %cst_28 = arith.constant dense<0.000000e+00> : vector<16x16xf32>
    %66 = tpu.matmul %62, %65, %cst_28 {dimension_numbers = #tpu.dot_dimension_numbers<[1], [0], [0], [1], [0, 0, 1, 1], [], []>} : vector<16x32xf32>, vector<32x16xf32>, vector<16x16xf32> -> vector<16x16xf32>
    %cst_29 = arith.constant 0.176776692 : f32
    %67 = vector.broadcast %cst_29 : f32 to vector<16x16xf32>
    %68 = arith.mulf %66, %67 : vector<16x16xf32>
    %69 = vector.broadcast %36 : vector<1x16xf32> to vector<16x16xf32>
    %70 = arith.addf %68, %69 : vector<16x16xf32>
    %cst_30 = arith.constant dense<0xFF800000> : vector<16xf32>
    %71 = vector.multi_reduction <maximumf>, %70, %cst_30 [1] : vector<16x16xf32> to vector<16xf32>
    %72 = vector.shape_cast %71 : vector<16xf32> to vector<16x1xf32>
    %73 = vector.broadcast %72 : vector<16x1xf32> to vector<16x16xf32>
    %74 = arith.subf %70, %73 : vector<16x16xf32>
    %75 = math.exp %74 : vector<16x16xf32>
    %cst_31 = arith.constant dense<0.000000e+00> : vector<16xf32>
    %76 = vector.multi_reduction <add>, %75, %cst_31 [1] : vector<16x16xf32> to vector<16xf32>
    %77 = vector.shape_cast %76 : vector<16xf32> to vector<16x1xf32>
    %78 = tpu.reciprocal %77 {approx = true} : vector<16x1xf32> -> vector<16x1xf32>
    %79 = vector.broadcast %78 : vector<16x1xf32> to vector<16x16xf32>
    %80 = arith.mulf %75, %79 : vector<16x16xf32>
    %cst_32 = arith.constant dense<0.000000e+00> : vector<16x32xf32>
    %81 = tpu.matmul %80, %64, %cst_32 {dimension_numbers = #tpu.dot_dimension_numbers<[1], [0], [0], [1], [0, 0, 1, 1], [], []>} : vector<16x16xf32>, vector<16x32xf32>, vector<16x32xf32> -> vector<16x32xf32>
    %82 = arith.truncf %81 : vector<16x32xf32> to vector<16x32xbf16>
    %83 = vector.extract_strided_slice %35 {offsets = [32, 0], sizes = [32, 128], strides = [1, 1]} : vector<128x128xbf16> to vector<32x128xbf16>
    %cst_33 = arith.constant dense<0.000000e+00> : vector<16x128xf32>
    %84 = tpu.matmul %82, %83, %cst_33 {dimension_numbers = #tpu.dot_dimension_numbers<[1], [0], [0], [1], [0, 0, 1, 1], [], []>} : vector<16x32xbf16>, vector<32x128xbf16>, vector<16x128xf32> -> vector<16x128xf32>
    %85 = arith.addf %61, %84 : vector<16x128xf32>
    %86 = vector.extract_strided_slice %33 {offsets = [0, 64], sizes = [16, 32], strides = [1, 1]} : vector<32x384xf32> to vector<16x32xf32>
    %87 = vector.extract_strided_slice %33 {offsets = [0, 192], sizes = [16, 32], strides = [1, 1]} : vector<32x384xf32> to vector<16x32xf32>
    %88 = vector.extract_strided_slice %33 {offsets = [0, 320], sizes = [16, 32], strides = [1, 1]} : vector<32x384xf32> to vector<16x32xf32>
    %89 = tpu.transpose %87, [1, 0] : vector<16x32xf32> -> vector<32x16xf32>
    %cst_34 = arith.constant dense<0.000000e+00> : vector<16x16xf32>
    %90 = tpu.matmul %86, %89, %cst_34 {dimension_numbers = #tpu.dot_dimension_numbers<[1], [0], [0], [1], [0, 0, 1, 1], [], []>} : vector<16x32xf32>, vector<32x16xf32>, vector<16x16xf32> -> vector<16x16xf32>
    %cst_35 = arith.constant 0.176776692 : f32
    %91 = vector.broadcast %cst_35 : f32 to vector<16x16xf32>
    %92 = arith.mulf %90, %91 : vector<16x16xf32>
    %93 = vector.broadcast %36 : vector<1x16xf32> to vector<16x16xf32>
    %94 = arith.addf %92, %93 : vector<16x16xf32>
    %cst_36 = arith.constant dense<0xFF800000> : vector<16xf32>
    %95 = vector.multi_reduction <maximumf>, %94, %cst_36 [1] : vector<16x16xf32> to vector<16xf32>
    %96 = vector.shape_cast %95 : vector<16xf32> to vector<16x1xf32>
    %97 = vector.broadcast %96 : vector<16x1xf32> to vector<16x16xf32>
    %98 = arith.subf %94, %97 : vector<16x16xf32>
    %99 = math.exp %98 : vector<16x16xf32>
    %cst_37 = arith.constant dense<0.000000e+00> : vector<16xf32>
    %100 = vector.multi_reduction <add>, %99, %cst_37 [1] : vector<16x16xf32> to vector<16xf32>
    %101 = vector.shape_cast %100 : vector<16xf32> to vector<16x1xf32>
    %102 = tpu.reciprocal %101 {approx = true} : vector<16x1xf32> -> vector<16x1xf32>
    %103 = vector.broadcast %102 : vector<16x1xf32> to vector<16x16xf32>
    %104 = arith.mulf %99, %103 : vector<16x16xf32>
    %cst_38 = arith.constant dense<0.000000e+00> : vector<16x32xf32>
    %105 = tpu.matmul %104, %88, %cst_38 {dimension_numbers = #tpu.dot_dimension_numbers<[1], [0], [0], [1], [0, 0, 1, 1], [], []>} : vector<16x16xf32>, vector<16x32xf32>, vector<16x32xf32> -> vector<16x32xf32>
    %106 = arith.truncf %105 : vector<16x32xf32> to vector<16x32xbf16>
    %107 = vector.extract_strided_slice %35 {offsets = [64, 0], sizes = [32, 128], strides = [1, 1]} : vector<128x128xbf16> to vector<32x128xbf16>
    %cst_39 = arith.constant dense<0.000000e+00> : vector<16x128xf32>
    %108 = tpu.matmul %106, %107, %cst_39 {dimension_numbers = #tpu.dot_dimension_numbers<[1], [0], [0], [1], [0, 0, 1, 1], [], []>} : vector<16x32xbf16>, vector<32x128xbf16>, vector<16x128xf32> -> vector<16x128xf32>
    %109 = arith.addf %85, %108 : vector<16x128xf32>
    %110 = vector.extract_strided_slice %33 {offsets = [0, 96], sizes = [16, 32], strides = [1, 1]} : vector<32x384xf32> to vector<16x32xf32>
    %111 = vector.extract_strided_slice %33 {offsets = [0, 224], sizes = [16, 32], strides = [1, 1]} : vector<32x384xf32> to vector<16x32xf32>
    %112 = vector.extract_strided_slice %33 {offsets = [0, 352], sizes = [16, 32], strides = [1, 1]} : vector<32x384xf32> to vector<16x32xf32>
    %113 = tpu.transpose %111, [1, 0] : vector<16x32xf32> -> vector<32x16xf32>
    %cst_40 = arith.constant dense<0.000000e+00> : vector<16x16xf32>
    %114 = tpu.matmul %110, %113, %cst_40 {dimension_numbers = #tpu.dot_dimension_numbers<[1], [0], [0], [1], [0, 0, 1, 1], [], []>} : vector<16x32xf32>, vector<32x16xf32>, vector<16x16xf32> -> vector<16x16xf32>
    %cst_41 = arith.constant 0.176776692 : f32
    %115 = vector.broadcast %cst_41 : f32 to vector<16x16xf32>
    %116 = arith.mulf %114, %115 : vector<16x16xf32>
    %117 = vector.broadcast %36 : vector<1x16xf32> to vector<16x16xf32>
    %118 = arith.addf %116, %117 : vector<16x16xf32>
    %cst_42 = arith.constant dense<0xFF800000> : vector<16xf32>
    %119 = vector.multi_reduction <maximumf>, %118, %cst_42 [1] : vector<16x16xf32> to vector<16xf32>
    %120 = vector.shape_cast %119 : vector<16xf32> to vector<16x1xf32>
    %121 = vector.broadcast %120 : vector<16x1xf32> to vector<16x16xf32>
    %122 = arith.subf %118, %121 : vector<16x16xf32>
    %123 = math.exp %122 : vector<16x16xf32>
    %cst_43 = arith.constant dense<0.000000e+00> : vector<16xf32>
    %124 = vector.multi_reduction <add>, %123, %cst_43 [1] : vector<16x16xf32> to vector<16xf32>
    %125 = vector.shape_cast %124 : vector<16xf32> to vector<16x1xf32>
    %126 = tpu.reciprocal %125 {approx = true} : vector<16x1xf32> -> vector<16x1xf32>
    %127 = vector.broadcast %126 : vector<16x1xf32> to vector<16x16xf32>
    %128 = arith.mulf %123, %127 : vector<16x16xf32>
    %cst_44 = arith.constant dense<0.000000e+00> : vector<16x32xf32>
    %129 = tpu.matmul %128, %112, %cst_44 {dimension_numbers = #tpu.dot_dimension_numbers<[1], [0], [0], [1], [0, 0, 1, 1], [], []>} : vector<16x16xf32>, vector<16x32xf32>, vector<16x32xf32> -> vector<16x32xf32>
    %130 = arith.truncf %129 : vector<16x32xf32> to vector<16x32xbf16>
    %131 = vector.extract_strided_slice %35 {offsets = [96, 0], sizes = [32, 128], strides = [1, 1]} : vector<128x128xbf16> to vector<32x128xbf16>
    %cst_45 = arith.constant dense<0.000000e+00> : vector<16x128xf32>
    %132 = tpu.matmul %130, %131, %cst_45 {dimension_numbers = #tpu.dot_dimension_numbers<[1], [0], [0], [1], [0, 0, 1, 1], [], []>} : vector<16x32xbf16>, vector<32x128xbf16>, vector<16x128xf32> -> vector<16x128xf32>
    %133 = arith.addf %109, %132 : vector<16x128xf32>
    %134 = vector.extract_strided_slice %0 {offsets = [1, 0], sizes = [1, 16], strides = [1, 1]} : vector<2x16xf32> to vector<1x16xf32>
    %cst_46 = arith.constant 0.000000e+00 : f32
    %135 = vector.broadcast %cst_46 : f32 to vector<16x128xf32>
    %136 = vector.extract_strided_slice %33 {offsets = [16, 0], sizes = [16, 32], strides = [1, 1]} : vector<32x384xf32> to vector<16x32xf32>
    %137 = vector.extract_strided_slice %33 {offsets = [16, 128], sizes = [16, 32], strides = [1, 1]} : vector<32x384xf32> to vector<16x32xf32>
    %138 = vector.extract_strided_slice %33 {offsets = [16, 256], sizes = [16, 32], strides = [1, 1]} : vector<32x384xf32> to vector<16x32xf32>
    %139 = tpu.transpose %137, [1, 0] : vector<16x32xf32> -> vector<32x16xf32>
    %cst_47 = arith.constant dense<0.000000e+00> : vector<16x16xf32>
    %140 = tpu.matmul %136, %139, %cst_47 {dimension_numbers = #tpu.dot_dimension_numbers<[1], [0], [0], [1], [0, 0, 1, 1], [], []>} : vector<16x32xf32>, vector<32x16xf32>, vector<16x16xf32> -> vector<16x16xf32>
    %cst_48 = arith.constant 0.176776692 : f32
    %141 = vector.broadcast %cst_48 : f32 to vector<16x16xf32>
    %142 = arith.mulf %140, %141 : vector<16x16xf32>
    %143 = vector.broadcast %134 : vector<1x16xf32> to vector<16x16xf32>
    %144 = arith.addf %142, %143 : vector<16x16xf32>
    %cst_49 = arith.constant dense<0xFF800000> : vector<16xf32>
    %145 = vector.multi_reduction <maximumf>, %144, %cst_49 [1] : vector<16x16xf32> to vector<16xf32>
    %146 = vector.shape_cast %145 : vector<16xf32> to vector<16x1xf32>
    %147 = vector.broadcast %146 : vector<16x1xf32> to vector<16x16xf32>
    %148 = arith.subf %144, %147 : vector<16x16xf32>
    %149 = math.exp %148 : vector<16x16xf32>
    %cst_50 = arith.constant dense<0.000000e+00> : vector<16xf32>
    %150 = vector.multi_reduction <add>, %149, %cst_50 [1] : vector<16x16xf32> to vector<16xf32>
    %151 = vector.shape_cast %150 : vector<16xf32> to vector<16x1xf32>
    %152 = tpu.reciprocal %151 {approx = true} : vector<16x1xf32> -> vector<16x1xf32>
    %153 = vector.broadcast %152 : vector<16x1xf32> to vector<16x16xf32>
    %154 = arith.mulf %149, %153 : vector<16x16xf32>
    %cst_51 = arith.constant dense<0.000000e+00> : vector<16x32xf32>
    %155 = tpu.matmul %154, %138, %cst_51 {dimension_numbers = #tpu.dot_dimension_numbers<[1], [0], [0], [1], [0, 0, 1, 1], [], []>} : vector<16x16xf32>, vector<16x32xf32>, vector<16x32xf32> -> vector<16x32xf32>
    %156 = arith.truncf %155 : vector<16x32xf32> to vector<16x32xbf16>
    %157 = vector.extract_strided_slice %35 {offsets = [0, 0], sizes = [32, 128], strides = [1, 1]} : vector<128x128xbf16> to vector<32x128xbf16>
    %cst_52 = arith.constant dense<0.000000e+00> : vector<16x128xf32>
    %158 = tpu.matmul %156, %157, %cst_52 {dimension_numbers = #tpu.dot_dimension_numbers<[1], [0], [0], [1], [0, 0, 1, 1], [], []>} : vector<16x32xbf16>, vector<32x128xbf16>, vector<16x128xf32> -> vector<16x128xf32>
    %159 = arith.addf %135, %158 : vector<16x128xf32>
    %160 = vector.extract_strided_slice %33 {offsets = [16, 32], sizes = [16, 32], strides = [1, 1]} : vector<32x384xf32> to vector<16x32xf32>
    %161 = vector.extract_strided_slice %33 {offsets = [16, 160], sizes = [16, 32], strides = [1, 1]} : vector<32x384xf32> to vector<16x32xf32>
    %162 = vector.extract_strided_slice %33 {offsets = [16, 288], sizes = [16, 32], strides = [1, 1]} : vector<32x384xf32> to vector<16x32xf32>
    %163 = tpu.transpose %161, [1, 0] : vector<16x32xf32> -> vector<32x16xf32>
    %cst_53 = arith.constant dense<0.000000e+00> : vector<16x16xf32>
    %164 = tpu.matmul %160, %163, %cst_53 {dimension_numbers = #tpu.dot_dimension_numbers<[1], [0], [0], [1], [0, 0, 1, 1], [], []>} : vector<16x32xf32>, vector<32x16xf32>, vector<16x16xf32> -> vector<16x16xf32>
    %cst_54 = arith.constant 0.176776692 : f32
    %165 = vector.broadcast %cst_54 : f32 to vector<16x16xf32>
    %166 = arith.mulf %164, %165 : vector<16x16xf32>
    %167 = vector.broadcast %134 : vector<1x16xf32> to vector<16x16xf32>
    %168 = arith.addf %166, %167 : vector<16x16xf32>
    %cst_55 = arith.constant dense<0xFF800000> : vector<16xf32>
    %169 = vector.multi_reduction <maximumf>, %168, %cst_55 [1] : vector<16x16xf32> to vector<16xf32>
    %170 = vector.shape_cast %169 : vector<16xf32> to vector<16x1xf32>
    %171 = vector.broadcast %170 : vector<16x1xf32> to vector<16x16xf32>
    %172 = arith.subf %168, %171 : vector<16x16xf32>
    %173 = math.exp %172 : vector<16x16xf32>
    %cst_56 = arith.constant dense<0.000000e+00> : vector<16xf32>
    %174 = vector.multi_reduction <add>, %173, %cst_56 [1] : vector<16x16xf32> to vector<16xf32>
    %175 = vector.shape_cast %174 : vector<16xf32> to vector<16x1xf32>
    %176 = tpu.reciprocal %175 {approx = true} : vector<16x1xf32> -> vector<16x1xf32>
    %177 = vector.broadcast %176 : vector<16x1xf32> to vector<16x16xf32>
    %178 = arith.mulf %173, %177 : vector<16x16xf32>
    %cst_57 = arith.constant dense<0.000000e+00> : vector<16x32xf32>
    %179 = tpu.matmul %178, %162, %cst_57 {dimension_numbers = #tpu.dot_dimension_numbers<[1], [0], [0], [1], [0, 0, 1, 1], [], []>} : vector<16x16xf32>, vector<16x32xf32>, vector<16x32xf32> -> vector<16x32xf32>
    %180 = arith.truncf %179 : vector<16x32xf32> to vector<16x32xbf16>
    %181 = vector.extract_strided_slice %35 {offsets = [32, 0], sizes = [32, 128], strides = [1, 1]} : vector<128x128xbf16> to vector<32x128xbf16>
    %cst_58 = arith.constant dense<0.000000e+00> : vector<16x128xf32>
    %182 = tpu.matmul %180, %181, %cst_58 {dimension_numbers = #tpu.dot_dimension_numbers<[1], [0], [0], [1], [0, 0, 1, 1], [], []>} : vector<16x32xbf16>, vector<32x128xbf16>, vector<16x128xf32> -> vector<16x128xf32>
    %183 = arith.addf %159, %182 : vector<16x128xf32>
    %184 = vector.extract_strided_slice %33 {offsets = [16, 64], sizes = [16, 32], strides = [1, 1]} : vector<32x384xf32> to vector<16x32xf32>
    %185 = vector.extract_strided_slice %33 {offsets = [16, 192], sizes = [16, 32], strides = [1, 1]} : vector<32x384xf32> to vector<16x32xf32>
    %186 = vector.extract_strided_slice %33 {offsets = [16, 320], sizes = [16, 32], strides = [1, 1]} : vector<32x384xf32> to vector<16x32xf32>
    %187 = tpu.transpose %185, [1, 0] : vector<16x32xf32> -> vector<32x16xf32>
    %cst_59 = arith.constant dense<0.000000e+00> : vector<16x16xf32>
    %188 = tpu.matmul %184, %187, %cst_59 {dimension_numbers = #tpu.dot_dimension_numbers<[1], [0], [0], [1], [0, 0, 1, 1], [], []>} : vector<16x32xf32>, vector<32x16xf32>, vector<16x16xf32> -> vector<16x16xf32>
    %cst_60 = arith.constant 0.176776692 : f32
    %189 = vector.broadcast %cst_60 : f32 to vector<16x16xf32>
    %190 = arith.mulf %188, %189 : vector<16x16xf32>
    %191 = vector.broadcast %134 : vector<1x16xf32> to vector<16x16xf32>
    %192 = arith.addf %190, %191 : vector<16x16xf32>
    %cst_61 = arith.constant dense<0xFF800000> : vector<16xf32>
    %193 = vector.multi_reduction <maximumf>, %192, %cst_61 [1] : vector<16x16xf32> to vector<16xf32>
    %194 = vector.shape_cast %193 : vector<16xf32> to vector<16x1xf32>
    %195 = vector.broadcast %194 : vector<16x1xf32> to vector<16x16xf32>
    %196 = arith.subf %192, %195 : vector<16x16xf32>
    %197 = math.exp %196 : vector<16x16xf32>
    %cst_62 = arith.constant dense<0.000000e+00> : vector<16xf32>
    %198 = vector.multi_reduction <add>, %197, %cst_62 [1] : vector<16x16xf32> to vector<16xf32>
    %199 = vector.shape_cast %198 : vector<16xf32> to vector<16x1xf32>
    %200 = tpu.reciprocal %199 {approx = true} : vector<16x1xf32> -> vector<16x1xf32>
    %201 = vector.broadcast %200 : vector<16x1xf32> to vector<16x16xf32>
    %202 = arith.mulf %197, %201 : vector<16x16xf32>
    %cst_63 = arith.constant dense<0.000000e+00> : vector<16x32xf32>
    %203 = tpu.matmul %202, %186, %cst_63 {dimension_numbers = #tpu.dot_dimension_numbers<[1], [0], [0], [1], [0, 0, 1, 1], [], []>} : vector<16x16xf32>, vector<16x32xf32>, vector<16x32xf32> -> vector<16x32xf32>
    %204 = arith.truncf %203 : vector<16x32xf32> to vector<16x32xbf16>
    %205 = vector.extract_strided_slice %35 {offsets = [64, 0], sizes = [32, 128], strides = [1, 1]} : vector<128x128xbf16> to vector<32x128xbf16>
    %cst_64 = arith.constant dense<0.000000e+00> : vector<16x128xf32>
    %206 = tpu.matmul %204, %205, %cst_64 {dimension_numbers = #tpu.dot_dimension_numbers<[1], [0], [0], [1], [0, 0, 1, 1], [], []>} : vector<16x32xbf16>, vector<32x128xbf16>, vector<16x128xf32> -> vector<16x128xf32>
    %207 = arith.addf %183, %206 : vector<16x128xf32>
    %208 = vector.extract_strided_slice %33 {offsets = [16, 96], sizes = [16, 32], strides = [1, 1]} : vector<32x384xf32> to vector<16x32xf32>
    %209 = vector.extract_strided_slice %33 {offsets = [16, 224], sizes = [16, 32], strides = [1, 1]} : vector<32x384xf32> to vector<16x32xf32>
    %210 = vector.extract_strided_slice %33 {offsets = [16, 352], sizes = [16, 32], strides = [1, 1]} : vector<32x384xf32> to vector<16x32xf32>
    %211 = tpu.transpose %209, [1, 0] : vector<16x32xf32> -> vector<32x16xf32>
    %cst_65 = arith.constant dense<0.000000e+00> : vector<16x16xf32>
    %212 = tpu.matmul %208, %211, %cst_65 {dimension_numbers = #tpu.dot_dimension_numbers<[1], [0], [0], [1], [0, 0, 1, 1], [], []>} : vector<16x32xf32>, vector<32x16xf32>, vector<16x16xf32> -> vector<16x16xf32>
    %cst_66 = arith.constant 0.176776692 : f32
    %213 = vector.broadcast %cst_66 : f32 to vector<16x16xf32>
    %214 = arith.mulf %212, %213 : vector<16x16xf32>
    %215 = vector.broadcast %134 : vector<1x16xf32> to vector<16x16xf32>
    %216 = arith.addf %214, %215 : vector<16x16xf32>
    %cst_67 = arith.constant dense<0xFF800000> : vector<16xf32>
    %217 = vector.multi_reduction <maximumf>, %216, %cst_67 [1] : vector<16x16xf32> to vector<16xf32>
    %218 = vector.shape_cast %217 : vector<16xf32> to vector<16x1xf32>
    %219 = vector.broadcast %218 : vector<16x1xf32> to vector<16x16xf32>
    %220 = arith.subf %216, %219 : vector<16x16xf32>
    %221 = math.exp %220 : vector<16x16xf32>
    %cst_68 = arith.constant dense<0.000000e+00> : vector<16xf32>
    %222 = vector.multi_reduction <add>, %221, %cst_68 [1] : vector<16x16xf32> to vector<16xf32>
    %223 = vector.shape_cast %222 : vector<16xf32> to vector<16x1xf32>
    %224 = tpu.reciprocal %223 {approx = true} : vector<16x1xf32> -> vector<16x1xf32>
    %225 = vector.broadcast %224 : vector<16x1xf32> to vector<16x16xf32>
    %226 = arith.mulf %221, %225 : vector<16x16xf32>
    %cst_69 = arith.constant dense<0.000000e+00> : vector<16x32xf32>
    %227 = tpu.matmul %226, %210, %cst_69 {dimension_numbers = #tpu.dot_dimension_numbers<[1], [0], [0], [1], [0, 0, 1, 1], [], []>} : vector<16x16xf32>, vector<16x32xf32>, vector<16x32xf32> -> vector<16x32xf32>
    %228 = arith.truncf %227 : vector<16x32xf32> to vector<16x32xbf16>
    %229 = vector.extract_strided_slice %35 {offsets = [96, 0], sizes = [32, 128], strides = [1, 1]} : vector<128x128xbf16> to vector<32x128xbf16>
    %cst_70 = arith.constant dense<0.000000e+00> : vector<16x128xf32>
    %230 = tpu.matmul %228, %229, %cst_70 {dimension_numbers = #tpu.dot_dimension_numbers<[1], [0], [0], [1], [0, 0, 1, 1], [], []>} : vector<16x32xbf16>, vector<32x128xbf16>, vector<16x128xf32> -> vector<16x128xf32>
    %231 = arith.addf %207, %230 : vector<16x128xf32>
    %232 = tpu.concatenate %133, %231 in 0 : vector<16x128xf32>, vector<16x128xf32> -> vector<32x128xf32>
    %c0_71 = arith.constant 0 : index
    %c0_72 = arith.constant 0 : index
    %c0_73 = arith.constant 0 : index
    %233 = vector.load %arg7[%c0_71, %c0_72, %c0_73] : memref<2x1x128xf32, #tpu.memory_space<vmem>>, vector<1x1x128xf32>
    %234 = vector.shape_cast %233 : vector<1x1x128xf32> to vector<1x128xf32>
    %235 = vector.broadcast %234 : vector<1x128xf32> to vector<32x128xf32>
    %236 = arith.addf %232, %235 : vector<32x128xf32>
    %237 = arith.addf %25, %236 : vector<32x128xf32>
    %c0_74 = arith.constant 0 : index
    %c0_75 = arith.constant 0 : index
    %c0_76 = arith.constant 0 : index
    %238 = vector.load %arg8[%c0_74, %c0_75, %c0_76] : memref<2x1x128xf32, #tpu.memory_space<vmem>>, vector<1x1x128xf32>
    %239 = vector.shape_cast %238 : vector<1x1x128xf32> to vector<1x128xf32>
    %c0_77 = arith.constant 0 : index
    %c0_78 = arith.constant 0 : index
    %c0_79 = arith.constant 0 : index
    %240 = vector.load %arg9[%c0_77, %c0_78, %c0_79] : memref<2x1x128xf32, #tpu.memory_space<vmem>>, vector<1x1x128xf32>
    %241 = vector.shape_cast %240 : vector<1x1x128xf32> to vector<1x128xf32>
    %cst_80 = arith.constant dense<0.000000e+00> : vector<32xf32>
    %242 = vector.multi_reduction <add>, %237, %cst_80 [1] : vector<32x128xf32> to vector<32xf32>
    %243 = vector.shape_cast %242 : vector<32xf32> to vector<32x1xf32>
    %cst_81 = arith.constant 1.280000e+02 : f32
    %244 = vector.broadcast %cst_81 : f32 to vector<32x1xf32>
    %245 = arith.divf %243, %244 : vector<32x1xf32>
    %246 = vector.broadcast %245 : vector<32x1xf32> to vector<32x128xf32>
    %247 = arith.subf %237, %246 : vector<32x128xf32>
    %248 = arith.mulf %247, %247 : vector<32x128xf32>
    %cst_82 = arith.constant dense<0.000000e+00> : vector<32xf32>
    %249 = vector.multi_reduction <add>, %248, %cst_82 [1] : vector<32x128xf32> to vector<32xf32>
    %250 = vector.shape_cast %249 : vector<32xf32> to vector<32x1xf32>
    %cst_83 = arith.constant 1.280000e+02 : f32
    %251 = vector.broadcast %cst_83 : f32 to vector<32x1xf32>
    %252 = arith.divf %250, %251 : vector<32x1xf32>
    %253 = vector.broadcast %245 : vector<32x1xf32> to vector<32x128xf32>
    %254 = arith.subf %237, %253 : vector<32x128xf32>
    %cst_84 = arith.constant 9.99999974E-6 : f32
    %255 = vector.broadcast %cst_84 : f32 to vector<32x1xf32>
    %256 = arith.addf %252, %255 : vector<32x1xf32>
    %257 = math.rsqrt %256 : vector<32x1xf32>
    %258 = vector.broadcast %257 : vector<32x1xf32> to vector<32x128xf32>
    %259 = arith.mulf %254, %258 : vector<32x128xf32>
    %260 = vector.broadcast %239 : vector<1x128xf32> to vector<32x128xf32>
    %261 = arith.mulf %259, %260 : vector<32x128xf32>
    %262 = vector.broadcast %241 : vector<1x128xf32> to vector<32x128xf32>
    %263 = arith.addf %261, %262 : vector<32x128xf32>
    %c0_85 = arith.constant 0 : index
    %c0_86 = arith.constant 0 : index
    %c0_87 = arith.constant 0 : index
    %264 = vector.load %arg10[%c0_85, %c0_86, %c0_87] : memref<2x128x256xbf16, #tpu.memory_space<vmem>>, vector<1x128x256xbf16>
    %265 = vector.shape_cast %264 : vector<1x128x256xbf16> to vector<128x256xbf16>
    %266 = arith.truncf %263 : vector<32x128xf32> to vector<32x128xbf16>
    %cst_88 = arith.constant dense<0.000000e+00> : vector<32x256xf32>
    %267 = tpu.matmul %266, %265, %cst_88 {dimension_numbers = #tpu.dot_dimension_numbers<[1], [0], [0], [1], [0, 0, 1, 1], [], []>} : vector<32x128xbf16>, vector<128x256xbf16>, vector<32x256xf32> -> vector<32x256xf32>
    %c0_89 = arith.constant 0 : index
    %c0_90 = arith.constant 0 : index
    %c0_91 = arith.constant 0 : index
    %268 = vector.load %arg11[%c0_89, %c0_90, %c0_91] : memref<2x1x256xf32, #tpu.memory_space<vmem>>, vector<1x1x256xf32>
    %269 = vector.shape_cast %268 : vector<1x1x256xf32> to vector<1x256xf32>
    %270 = vector.broadcast %269 : vector<1x256xf32> to vector<32x256xf32>
    %271 = arith.addf %267, %270 : vector<32x256xf32>
    %272 = arith.mulf %271, %271 : vector<32x256xf32>
    %273 = arith.mulf %271, %272 : vector<32x256xf32>
    %cst_92 = arith.constant 4.471500e-02 : f32
    %274 = vector.broadcast %cst_92 : f32 to vector<32x256xf32>
    %275 = arith.mulf %274, %273 : vector<32x256xf32>
    %276 = arith.addf %271, %275 : vector<32x256xf32>
    %cst_93 = arith.constant 0.797884583 : f32
    %277 = vector.broadcast %cst_93 : f32 to vector<32x256xf32>
    %278 = arith.mulf %277, %276 : vector<32x256xf32>
    %279 = math.tanh %278 : vector<32x256xf32>
    %cst_94 = arith.constant 1.000000e+00 : f32
    %280 = vector.broadcast %cst_94 : f32 to vector<32x256xf32>
    %281 = arith.addf %280, %279 : vector<32x256xf32>
    %cst_95 = arith.constant 5.000000e-01 : f32
    %282 = vector.broadcast %cst_95 : f32 to vector<32x256xf32>
    %283 = arith.mulf %282, %281 : vector<32x256xf32>
    %284 = arith.mulf %271, %283 : vector<32x256xf32>
    %c0_96 = arith.constant 0 : index
    %c0_97 = arith.constant 0 : index
    %c0_98 = arith.constant 0 : index
    %285 = vector.load %arg12[%c0_96, %c0_97, %c0_98] : memref<2x256x128xbf16, #tpu.memory_space<vmem>>, vector<1x256x128xbf16>
    %286 = vector.shape_cast %285 : vector<1x256x128xbf16> to vector<256x128xbf16>
    %287 = arith.truncf %284 : vector<32x256xf32> to vector<32x256xbf16>
    %cst_99 = arith.constant dense<0.000000e+00> : vector<32x128xf32>
    %288 = tpu.matmul %287, %286, %cst_99 {dimension_numbers = #tpu.dot_dimension_numbers<[1], [0], [0], [1], [0, 0, 1, 1], [], []>} : vector<32x256xbf16>, vector<256x128xbf16>, vector<32x128xf32> -> vector<32x128xf32>
    %c0_100 = arith.constant 0 : index
    %c0_101 = arith.constant 0 : index
    %c0_102 = arith.constant 0 : index
    %289 = vector.load %arg13[%c0_100, %c0_101, %c0_102] : memref<2x1x128xf32, #tpu.memory_space<vmem>>, vector<1x1x128xf32>
    %290 = vector.shape_cast %289 : vector<1x1x128xf32> to vector<1x128xf32>
    %291 = vector.broadcast %290 : vector<1x128xf32> to vector<32x128xf32>
    %292 = arith.addf %288, %291 : vector<32x128xf32>
    %293 = arith.addf %263, %292 : vector<32x128xf32>
    %c0_103 = arith.constant 0 : index
    %c0_104 = arith.constant 0 : index
    %c0_105 = arith.constant 0 : index
    %294 = vector.load %arg14[%c0_103, %c0_104, %c0_105] : memref<2x1x128xf32, #tpu.memory_space<vmem>>, vector<1x1x128xf32>
    %295 = vector.shape_cast %294 : vector<1x1x128xf32> to vector<1x128xf32>
    %c0_106 = arith.constant 0 : index
    %c0_107 = arith.constant 0 : index
    %c0_108 = arith.constant 0 : index
    %296 = vector.load %arg15[%c0_106, %c0_107, %c0_108] : memref<2x1x128xf32, #tpu.memory_space<vmem>>, vector<1x1x128xf32>
    %297 = vector.shape_cast %296 : vector<1x1x128xf32> to vector<1x128xf32>
    %cst_109 = arith.constant dense<0.000000e+00> : vector<32xf32>
    %298 = vector.multi_reduction <add>, %293, %cst_109 [1] : vector<32x128xf32> to vector<32xf32>
    %299 = vector.shape_cast %298 : vector<32xf32> to vector<32x1xf32>
    %cst_110 = arith.constant 1.280000e+02 : f32
    %300 = vector.broadcast %cst_110 : f32 to vector<32x1xf32>
    %301 = arith.divf %299, %300 : vector<32x1xf32>
    %302 = vector.broadcast %301 : vector<32x1xf32> to vector<32x128xf32>
    %303 = arith.subf %293, %302 : vector<32x128xf32>
    %304 = arith.mulf %303, %303 : vector<32x128xf32>
    %cst_111 = arith.constant dense<0.000000e+00> : vector<32xf32>
    %305 = vector.multi_reduction <add>, %304, %cst_111 [1] : vector<32x128xf32> to vector<32xf32>
    %306 = vector.shape_cast %305 : vector<32xf32> to vector<32x1xf32>
    %cst_112 = arith.constant 1.280000e+02 : f32
    %307 = vector.broadcast %cst_112 : f32 to vector<32x1xf32>
    %308 = arith.divf %306, %307 : vector<32x1xf32>
    %309 = vector.broadcast %301 : vector<32x1xf32> to vector<32x128xf32>
    %310 = arith.subf %293, %309 : vector<32x128xf32>
    %cst_113 = arith.constant 9.99999974E-6 : f32
    %311 = vector.broadcast %cst_113 : f32 to vector<32x1xf32>
    %312 = arith.addf %308, %311 : vector<32x1xf32>
    %313 = math.rsqrt %312 : vector<32x1xf32>
    %314 = vector.broadcast %313 : vector<32x1xf32> to vector<32x128xf32>
    %315 = arith.mulf %310, %314 : vector<32x128xf32>
    %316 = vector.broadcast %295 : vector<1x128xf32> to vector<32x128xf32>
    %317 = arith.mulf %315, %316 : vector<32x128xf32>
    %318 = vector.broadcast %297 : vector<1x128xf32> to vector<32x128xf32>
    %319 = arith.addf %317, %318 : vector<32x128xf32>
    %c1 = arith.constant 1 : index
    %c0_114 = arith.constant 0 : index
    %c0_115 = arith.constant 0 : index
    %320 = vector.load %arg4[%c1, %c0_114, %c0_115] : memref<2x128x384xbf16, #tpu.memory_space<vmem>>, vector<1x128x384xbf16>
    %321 = vector.shape_cast %320 : vector<1x128x384xbf16> to vector<128x384xbf16>
    %322 = arith.truncf %319 : vector<32x128xf32> to vector<32x128xbf16>
    %cst_116 = arith.constant dense<0.000000e+00> : vector<32x384xf32>
    %323 = tpu.matmul %322, %321, %cst_116 {dimension_numbers = #tpu.dot_dimension_numbers<[1], [0], [0], [1], [0, 0, 1, 1], [], []>} : vector<32x128xbf16>, vector<128x384xbf16>, vector<32x384xf32> -> vector<32x384xf32>
    %c1_117 = arith.constant 1 : index
    %c0_118 = arith.constant 0 : index
    %c0_119 = arith.constant 0 : index
    %324 = vector.load %arg5[%c1_117, %c0_118, %c0_119] : memref<2x1x384xf32, #tpu.memory_space<vmem>>, vector<1x1x384xf32>
    %325 = vector.shape_cast %324 : vector<1x1x384xf32> to vector<1x384xf32>
    %326 = vector.broadcast %325 : vector<1x384xf32> to vector<32x384xf32>
    %327 = arith.addf %323, %326 : vector<32x384xf32>
    %c1_120 = arith.constant 1 : index
    %c0_121 = arith.constant 0 : index
    %c0_122 = arith.constant 0 : index
    %328 = vector.load %arg6[%c1_120, %c0_121, %c0_122] : memref<2x128x128xbf16, #tpu.memory_space<vmem>>, vector<1x128x128xbf16>
    %329 = vector.shape_cast %328 : vector<1x128x128xbf16> to vector<128x128xbf16>
    %330 = vector.extract_strided_slice %0 {offsets = [0, 0], sizes = [1, 16], strides = [1, 1]} : vector<2x16xf32> to vector<1x16xf32>
    %cst_123 = arith.constant 0.000000e+00 : f32
    %331 = vector.broadcast %cst_123 : f32 to vector<16x128xf32>
    %332 = vector.extract_strided_slice %327 {offsets = [0, 0], sizes = [16, 32], strides = [1, 1]} : vector<32x384xf32> to vector<16x32xf32>
    %333 = vector.extract_strided_slice %327 {offsets = [0, 128], sizes = [16, 32], strides = [1, 1]} : vector<32x384xf32> to vector<16x32xf32>
    %334 = vector.extract_strided_slice %327 {offsets = [0, 256], sizes = [16, 32], strides = [1, 1]} : vector<32x384xf32> to vector<16x32xf32>
    %335 = tpu.transpose %333, [1, 0] : vector<16x32xf32> -> vector<32x16xf32>
    %cst_124 = arith.constant dense<0.000000e+00> : vector<16x16xf32>
    %336 = tpu.matmul %332, %335, %cst_124 {dimension_numbers = #tpu.dot_dimension_numbers<[1], [0], [0], [1], [0, 0, 1, 1], [], []>} : vector<16x32xf32>, vector<32x16xf32>, vector<16x16xf32> -> vector<16x16xf32>
    %cst_125 = arith.constant 0.176776692 : f32
    %337 = vector.broadcast %cst_125 : f32 to vector<16x16xf32>
    %338 = arith.mulf %336, %337 : vector<16x16xf32>
    %339 = vector.broadcast %330 : vector<1x16xf32> to vector<16x16xf32>
    %340 = arith.addf %338, %339 : vector<16x16xf32>
    %cst_126 = arith.constant dense<0xFF800000> : vector<16xf32>
    %341 = vector.multi_reduction <maximumf>, %340, %cst_126 [1] : vector<16x16xf32> to vector<16xf32>
    %342 = vector.shape_cast %341 : vector<16xf32> to vector<16x1xf32>
    %343 = vector.broadcast %342 : vector<16x1xf32> to vector<16x16xf32>
    %344 = arith.subf %340, %343 : vector<16x16xf32>
    %345 = math.exp %344 : vector<16x16xf32>
    %cst_127 = arith.constant dense<0.000000e+00> : vector<16xf32>
    %346 = vector.multi_reduction <add>, %345, %cst_127 [1] : vector<16x16xf32> to vector<16xf32>
    %347 = vector.shape_cast %346 : vector<16xf32> to vector<16x1xf32>
    %348 = tpu.reciprocal %347 {approx = true} : vector<16x1xf32> -> vector<16x1xf32>
    %349 = vector.broadcast %348 : vector<16x1xf32> to vector<16x16xf32>
    %350 = arith.mulf %345, %349 : vector<16x16xf32>
    %cst_128 = arith.constant dense<0.000000e+00> : vector<16x32xf32>
    %351 = tpu.matmul %350, %334, %cst_128 {dimension_numbers = #tpu.dot_dimension_numbers<[1], [0], [0], [1], [0, 0, 1, 1], [], []>} : vector<16x16xf32>, vector<16x32xf32>, vector<16x32xf32> -> vector<16x32xf32>
    %352 = arith.truncf %351 : vector<16x32xf32> to vector<16x32xbf16>
    %353 = vector.extract_strided_slice %329 {offsets = [0, 0], sizes = [32, 128], strides = [1, 1]} : vector<128x128xbf16> to vector<32x128xbf16>
    %cst_129 = arith.constant dense<0.000000e+00> : vector<16x128xf32>
    %354 = tpu.matmul %352, %353, %cst_129 {dimension_numbers = #tpu.dot_dimension_numbers<[1], [0], [0], [1], [0, 0, 1, 1], [], []>} : vector<16x32xbf16>, vector<32x128xbf16>, vector<16x128xf32> -> vector<16x128xf32>
    %355 = arith.addf %331, %354 : vector<16x128xf32>
    %356 = vector.extract_strided_slice %327 {offsets = [0, 32], sizes = [16, 32], strides = [1, 1]} : vector<32x384xf32> to vector<16x32xf32>
    %357 = vector.extract_strided_slice %327 {offsets = [0, 160], sizes = [16, 32], strides = [1, 1]} : vector<32x384xf32> to vector<16x32xf32>
    %358 = vector.extract_strided_slice %327 {offsets = [0, 288], sizes = [16, 32], strides = [1, 1]} : vector<32x384xf32> to vector<16x32xf32>
    %359 = tpu.transpose %357, [1, 0] : vector<16x32xf32> -> vector<32x16xf32>
    %cst_130 = arith.constant dense<0.000000e+00> : vector<16x16xf32>
    %360 = tpu.matmul %356, %359, %cst_130 {dimension_numbers = #tpu.dot_dimension_numbers<[1], [0], [0], [1], [0, 0, 1, 1], [], []>} : vector<16x32xf32>, vector<32x16xf32>, vector<16x16xf32> -> vector<16x16xf32>
    %cst_131 = arith.constant 0.176776692 : f32
    %361 = vector.broadcast %cst_131 : f32 to vector<16x16xf32>
    %362 = arith.mulf %360, %361 : vector<16x16xf32>
    %363 = vector.broadcast %330 : vector<1x16xf32> to vector<16x16xf32>
    %364 = arith.addf %362, %363 : vector<16x16xf32>
    %cst_132 = arith.constant dense<0xFF800000> : vector<16xf32>
    %365 = vector.multi_reduction <maximumf>, %364, %cst_132 [1] : vector<16x16xf32> to vector<16xf32>
    %366 = vector.shape_cast %365 : vector<16xf32> to vector<16x1xf32>
    %367 = vector.broadcast %366 : vector<16x1xf32> to vector<16x16xf32>
    %368 = arith.subf %364, %367 : vector<16x16xf32>
    %369 = math.exp %368 : vector<16x16xf32>
    %cst_133 = arith.constant dense<0.000000e+00> : vector<16xf32>
    %370 = vector.multi_reduction <add>, %369, %cst_133 [1] : vector<16x16xf32> to vector<16xf32>
    %371 = vector.shape_cast %370 : vector<16xf32> to vector<16x1xf32>
    %372 = tpu.reciprocal %371 {approx = true} : vector<16x1xf32> -> vector<16x1xf32>
    %373 = vector.broadcast %372 : vector<16x1xf32> to vector<16x16xf32>
    %374 = arith.mulf %369, %373 : vector<16x16xf32>
    %cst_134 = arith.constant dense<0.000000e+00> : vector<16x32xf32>
    %375 = tpu.matmul %374, %358, %cst_134 {dimension_numbers = #tpu.dot_dimension_numbers<[1], [0], [0], [1], [0, 0, 1, 1], [], []>} : vector<16x16xf32>, vector<16x32xf32>, vector<16x32xf32> -> vector<16x32xf32>
    %376 = arith.truncf %375 : vector<16x32xf32> to vector<16x32xbf16>
    %377 = vector.extract_strided_slice %329 {offsets = [32, 0], sizes = [32, 128], strides = [1, 1]} : vector<128x128xbf16> to vector<32x128xbf16>
    %cst_135 = arith.constant dense<0.000000e+00> : vector<16x128xf32>
    %378 = tpu.matmul %376, %377, %cst_135 {dimension_numbers = #tpu.dot_dimension_numbers<[1], [0], [0], [1], [0, 0, 1, 1], [], []>} : vector<16x32xbf16>, vector<32x128xbf16>, vector<16x128xf32> -> vector<16x128xf32>
    %379 = arith.addf %355, %378 : vector<16x128xf32>
    %380 = vector.extract_strided_slice %327 {offsets = [0, 64], sizes = [16, 32], strides = [1, 1]} : vector<32x384xf32> to vector<16x32xf32>
    %381 = vector.extract_strided_slice %327 {offsets = [0, 192], sizes = [16, 32], strides = [1, 1]} : vector<32x384xf32> to vector<16x32xf32>
    %382 = vector.extract_strided_slice %327 {offsets = [0, 320], sizes = [16, 32], strides = [1, 1]} : vector<32x384xf32> to vector<16x32xf32>
    %383 = tpu.transpose %381, [1, 0] : vector<16x32xf32> -> vector<32x16xf32>
    %cst_136 = arith.constant dense<0.000000e+00> : vector<16x16xf32>
    %384 = tpu.matmul %380, %383, %cst_136 {dimension_numbers = #tpu.dot_dimension_numbers<[1], [0], [0], [1], [0, 0, 1, 1], [], []>} : vector<16x32xf32>, vector<32x16xf32>, vector<16x16xf32> -> vector<16x16xf32>
    %cst_137 = arith.constant 0.176776692 : f32
    %385 = vector.broadcast %cst_137 : f32 to vector<16x16xf32>
    %386 = arith.mulf %384, %385 : vector<16x16xf32>
    %387 = vector.broadcast %330 : vector<1x16xf32> to vector<16x16xf32>
    %388 = arith.addf %386, %387 : vector<16x16xf32>
    %cst_138 = arith.constant dense<0xFF800000> : vector<16xf32>
    %389 = vector.multi_reduction <maximumf>, %388, %cst_138 [1] : vector<16x16xf32> to vector<16xf32>
    %390 = vector.shape_cast %389 : vector<16xf32> to vector<16x1xf32>
    %391 = vector.broadcast %390 : vector<16x1xf32> to vector<16x16xf32>
    %392 = arith.subf %388, %391 : vector<16x16xf32>
    %393 = math.exp %392 : vector<16x16xf32>
    %cst_139 = arith.constant dense<0.000000e+00> : vector<16xf32>
    %394 = vector.multi_reduction <add>, %393, %cst_139 [1] : vector<16x16xf32> to vector<16xf32>
    %395 = vector.shape_cast %394 : vector<16xf32> to vector<16x1xf32>
    %396 = tpu.reciprocal %395 {approx = true} : vector<16x1xf32> -> vector<16x1xf32>
    %397 = vector.broadcast %396 : vector<16x1xf32> to vector<16x16xf32>
    %398 = arith.mulf %393, %397 : vector<16x16xf32>
    %cst_140 = arith.constant dense<0.000000e+00> : vector<16x32xf32>
    %399 = tpu.matmul %398, %382, %cst_140 {dimension_numbers = #tpu.dot_dimension_numbers<[1], [0], [0], [1], [0, 0, 1, 1], [], []>} : vector<16x16xf32>, vector<16x32xf32>, vector<16x32xf32> -> vector<16x32xf32>
    %400 = arith.truncf %399 : vector<16x32xf32> to vector<16x32xbf16>
    %401 = vector.extract_strided_slice %329 {offsets = [64, 0], sizes = [32, 128], strides = [1, 1]} : vector<128x128xbf16> to vector<32x128xbf16>
    %cst_141 = arith.constant dense<0.000000e+00> : vector<16x128xf32>
    %402 = tpu.matmul %400, %401, %cst_141 {dimension_numbers = #tpu.dot_dimension_numbers<[1], [0], [0], [1], [0, 0, 1, 1], [], []>} : vector<16x32xbf16>, vector<32x128xbf16>, vector<16x128xf32> -> vector<16x128xf32>
    %403 = arith.addf %379, %402 : vector<16x128xf32>
    %404 = vector.extract_strided_slice %327 {offsets = [0, 96], sizes = [16, 32], strides = [1, 1]} : vector<32x384xf32> to vector<16x32xf32>
    %405 = vector.extract_strided_slice %327 {offsets = [0, 224], sizes = [16, 32], strides = [1, 1]} : vector<32x384xf32> to vector<16x32xf32>
    %406 = vector.extract_strided_slice %327 {offsets = [0, 352], sizes = [16, 32], strides = [1, 1]} : vector<32x384xf32> to vector<16x32xf32>
    %407 = tpu.transpose %405, [1, 0] : vector<16x32xf32> -> vector<32x16xf32>
    %cst_142 = arith.constant dense<0.000000e+00> : vector<16x16xf32>
    %408 = tpu.matmul %404, %407, %cst_142 {dimension_numbers = #tpu.dot_dimension_numbers<[1], [0], [0], [1], [0, 0, 1, 1], [], []>} : vector<16x32xf32>, vector<32x16xf32>, vector<16x16xf32> -> vector<16x16xf32>
    %cst_143 = arith.constant 0.176776692 : f32
    %409 = vector.broadcast %cst_143 : f32 to vector<16x16xf32>
    %410 = arith.mulf %408, %409 : vector<16x16xf32>
    %411 = vector.broadcast %330 : vector<1x16xf32> to vector<16x16xf32>
    %412 = arith.addf %410, %411 : vector<16x16xf32>
    %cst_144 = arith.constant dense<0xFF800000> : vector<16xf32>
    %413 = vector.multi_reduction <maximumf>, %412, %cst_144 [1] : vector<16x16xf32> to vector<16xf32>
    %414 = vector.shape_cast %413 : vector<16xf32> to vector<16x1xf32>
    %415 = vector.broadcast %414 : vector<16x1xf32> to vector<16x16xf32>
    %416 = arith.subf %412, %415 : vector<16x16xf32>
    %417 = math.exp %416 : vector<16x16xf32>
    %cst_145 = arith.constant dense<0.000000e+00> : vector<16xf32>
    %418 = vector.multi_reduction <add>, %417, %cst_145 [1] : vector<16x16xf32> to vector<16xf32>
    %419 = vector.shape_cast %418 : vector<16xf32> to vector<16x1xf32>
    %420 = tpu.reciprocal %419 {approx = true} : vector<16x1xf32> -> vector<16x1xf32>
    %421 = vector.broadcast %420 : vector<16x1xf32> to vector<16x16xf32>
    %422 = arith.mulf %417, %421 : vector<16x16xf32>
    %cst_146 = arith.constant dense<0.000000e+00> : vector<16x32xf32>
    %423 = tpu.matmul %422, %406, %cst_146 {dimension_numbers = #tpu.dot_dimension_numbers<[1], [0], [0], [1], [0, 0, 1, 1], [], []>} : vector<16x16xf32>, vector<16x32xf32>, vector<16x32xf32> -> vector<16x32xf32>
    %424 = arith.truncf %423 : vector<16x32xf32> to vector<16x32xbf16>
    %425 = vector.extract_strided_slice %329 {offsets = [96, 0], sizes = [32, 128], strides = [1, 1]} : vector<128x128xbf16> to vector<32x128xbf16>
    %cst_147 = arith.constant dense<0.000000e+00> : vector<16x128xf32>
    %426 = tpu.matmul %424, %425, %cst_147 {dimension_numbers = #tpu.dot_dimension_numbers<[1], [0], [0], [1], [0, 0, 1, 1], [], []>} : vector<16x32xbf16>, vector<32x128xbf16>, vector<16x128xf32> -> vector<16x128xf32>
    %427 = arith.addf %403, %426 : vector<16x128xf32>
    %428 = vector.extract_strided_slice %0 {offsets = [1, 0], sizes = [1, 16], strides = [1, 1]} : vector<2x16xf32> to vector<1x16xf32>
    %cst_148 = arith.constant 0.000000e+00 : f32
    %429 = vector.broadcast %cst_148 : f32 to vector<16x128xf32>
    %430 = vector.extract_strided_slice %327 {offsets = [16, 0], sizes = [16, 32], strides = [1, 1]} : vector<32x384xf32> to vector<16x32xf32>
    %431 = vector.extract_strided_slice %327 {offsets = [16, 128], sizes = [16, 32], strides = [1, 1]} : vector<32x384xf32> to vector<16x32xf32>
    %432 = vector.extract_strided_slice %327 {offsets = [16, 256], sizes = [16, 32], strides = [1, 1]} : vector<32x384xf32> to vector<16x32xf32>
    %433 = tpu.transpose %431, [1, 0] : vector<16x32xf32> -> vector<32x16xf32>
    %cst_149 = arith.constant dense<0.000000e+00> : vector<16x16xf32>
    %434 = tpu.matmul %430, %433, %cst_149 {dimension_numbers = #tpu.dot_dimension_numbers<[1], [0], [0], [1], [0, 0, 1, 1], [], []>} : vector<16x32xf32>, vector<32x16xf32>, vector<16x16xf32> -> vector<16x16xf32>
    %cst_150 = arith.constant 0.176776692 : f32
    %435 = vector.broadcast %cst_150 : f32 to vector<16x16xf32>
    %436 = arith.mulf %434, %435 : vector<16x16xf32>
    %437 = vector.broadcast %428 : vector<1x16xf32> to vector<16x16xf32>
    %438 = arith.addf %436, %437 : vector<16x16xf32>
    %cst_151 = arith.constant dense<0xFF800000> : vector<16xf32>
    %439 = vector.multi_reduction <maximumf>, %438, %cst_151 [1] : vector<16x16xf32> to vector<16xf32>
    %440 = vector.shape_cast %439 : vector<16xf32> to vector<16x1xf32>
    %441 = vector.broadcast %440 : vector<16x1xf32> to vector<16x16xf32>
    %442 = arith.subf %438, %441 : vector<16x16xf32>
    %443 = math.exp %442 : vector<16x16xf32>
    %cst_152 = arith.constant dense<0.000000e+00> : vector<16xf32>
    %444 = vector.multi_reduction <add>, %443, %cst_152 [1] : vector<16x16xf32> to vector<16xf32>
    %445 = vector.shape_cast %444 : vector<16xf32> to vector<16x1xf32>
    %446 = tpu.reciprocal %445 {approx = true} : vector<16x1xf32> -> vector<16x1xf32>
    %447 = vector.broadcast %446 : vector<16x1xf32> to vector<16x16xf32>
    %448 = arith.mulf %443, %447 : vector<16x16xf32>
    %cst_153 = arith.constant dense<0.000000e+00> : vector<16x32xf32>
    %449 = tpu.matmul %448, %432, %cst_153 {dimension_numbers = #tpu.dot_dimension_numbers<[1], [0], [0], [1], [0, 0, 1, 1], [], []>} : vector<16x16xf32>, vector<16x32xf32>, vector<16x32xf32> -> vector<16x32xf32>
    %450 = arith.truncf %449 : vector<16x32xf32> to vector<16x32xbf16>
    %451 = vector.extract_strided_slice %329 {offsets = [0, 0], sizes = [32, 128], strides = [1, 1]} : vector<128x128xbf16> to vector<32x128xbf16>
    %cst_154 = arith.constant dense<0.000000e+00> : vector<16x128xf32>
    %452 = tpu.matmul %450, %451, %cst_154 {dimension_numbers = #tpu.dot_dimension_numbers<[1], [0], [0], [1], [0, 0, 1, 1], [], []>} : vector<16x32xbf16>, vector<32x128xbf16>, vector<16x128xf32> -> vector<16x128xf32>
    %453 = arith.addf %429, %452 : vector<16x128xf32>
    %454 = vector.extract_strided_slice %327 {offsets = [16, 32], sizes = [16, 32], strides = [1, 1]} : vector<32x384xf32> to vector<16x32xf32>
    %455 = vector.extract_strided_slice %327 {offsets = [16, 160], sizes = [16, 32], strides = [1, 1]} : vector<32x384xf32> to vector<16x32xf32>
    %456 = vector.extract_strided_slice %327 {offsets = [16, 288], sizes = [16, 32], strides = [1, 1]} : vector<32x384xf32> to vector<16x32xf32>
    %457 = tpu.transpose %455, [1, 0] : vector<16x32xf32> -> vector<32x16xf32>
    %cst_155 = arith.constant dense<0.000000e+00> : vector<16x16xf32>
    %458 = tpu.matmul %454, %457, %cst_155 {dimension_numbers = #tpu.dot_dimension_numbers<[1], [0], [0], [1], [0, 0, 1, 1], [], []>} : vector<16x32xf32>, vector<32x16xf32>, vector<16x16xf32> -> vector<16x16xf32>
    %cst_156 = arith.constant 0.176776692 : f32
    %459 = vector.broadcast %cst_156 : f32 to vector<16x16xf32>
    %460 = arith.mulf %458, %459 : vector<16x16xf32>
    %461 = vector.broadcast %428 : vector<1x16xf32> to vector<16x16xf32>
    %462 = arith.addf %460, %461 : vector<16x16xf32>
    %cst_157 = arith.constant dense<0xFF800000> : vector<16xf32>
    %463 = vector.multi_reduction <maximumf>, %462, %cst_157 [1] : vector<16x16xf32> to vector<16xf32>
    %464 = vector.shape_cast %463 : vector<16xf32> to vector<16x1xf32>
    %465 = vector.broadcast %464 : vector<16x1xf32> to vector<16x16xf32>
    %466 = arith.subf %462, %465 : vector<16x16xf32>
    %467 = math.exp %466 : vector<16x16xf32>
    %cst_158 = arith.constant dense<0.000000e+00> : vector<16xf32>
    %468 = vector.multi_reduction <add>, %467, %cst_158 [1] : vector<16x16xf32> to vector<16xf32>
    %469 = vector.shape_cast %468 : vector<16xf32> to vector<16x1xf32>
    %470 = tpu.reciprocal %469 {approx = true} : vector<16x1xf32> -> vector<16x1xf32>
    %471 = vector.broadcast %470 : vector<16x1xf32> to vector<16x16xf32>
    %472 = arith.mulf %467, %471 : vector<16x16xf32>
    %cst_159 = arith.constant dense<0.000000e+00> : vector<16x32xf32>
    %473 = tpu.matmul %472, %456, %cst_159 {dimension_numbers = #tpu.dot_dimension_numbers<[1], [0], [0], [1], [0, 0, 1, 1], [], []>} : vector<16x16xf32>, vector<16x32xf32>, vector<16x32xf32> -> vector<16x32xf32>
    %474 = arith.truncf %473 : vector<16x32xf32> to vector<16x32xbf16>
    %475 = vector.extract_strided_slice %329 {offsets = [32, 0], sizes = [32, 128], strides = [1, 1]} : vector<128x128xbf16> to vector<32x128xbf16>
    %cst_160 = arith.constant dense<0.000000e+00> : vector<16x128xf32>
    %476 = tpu.matmul %474, %475, %cst_160 {dimension_numbers = #tpu.dot_dimension_numbers<[1], [0], [0], [1], [0, 0, 1, 1], [], []>} : vector<16x32xbf16>, vector<32x128xbf16>, vector<16x128xf32> -> vector<16x128xf32>
    %477 = arith.addf %453, %476 : vector<16x128xf32>
    %478 = vector.extract_strided_slice %327 {offsets = [16, 64], sizes = [16, 32], strides = [1, 1]} : vector<32x384xf32> to vector<16x32xf32>
    %479 = vector.extract_strided_slice %327 {offsets = [16, 192], sizes = [16, 32], strides = [1, 1]} : vector<32x384xf32> to vector<16x32xf32>
    %480 = vector.extract_strided_slice %327 {offsets = [16, 320], sizes = [16, 32], strides = [1, 1]} : vector<32x384xf32> to vector<16x32xf32>
    %481 = tpu.transpose %479, [1, 0] : vector<16x32xf32> -> vector<32x16xf32>
    %cst_161 = arith.constant dense<0.000000e+00> : vector<16x16xf32>
    %482 = tpu.matmul %478, %481, %cst_161 {dimension_numbers = #tpu.dot_dimension_numbers<[1], [0], [0], [1], [0, 0, 1, 1], [], []>} : vector<16x32xf32>, vector<32x16xf32>, vector<16x16xf32> -> vector<16x16xf32>
    %cst_162 = arith.constant 0.176776692 : f32
    %483 = vector.broadcast %cst_162 : f32 to vector<16x16xf32>
    %484 = arith.mulf %482, %483 : vector<16x16xf32>
    %485 = vector.broadcast %428 : vector<1x16xf32> to vector<16x16xf32>
    %486 = arith.addf %484, %485 : vector<16x16xf32>
    %cst_163 = arith.constant dense<0xFF800000> : vector<16xf32>
    %487 = vector.multi_reduction <maximumf>, %486, %cst_163 [1] : vector<16x16xf32> to vector<16xf32>
    %488 = vector.shape_cast %487 : vector<16xf32> to vector<16x1xf32>
    %489 = vector.broadcast %488 : vector<16x1xf32> to vector<16x16xf32>
    %490 = arith.subf %486, %489 : vector<16x16xf32>
    %491 = math.exp %490 : vector<16x16xf32>
    %cst_164 = arith.constant dense<0.000000e+00> : vector<16xf32>
    %492 = vector.multi_reduction <add>, %491, %cst_164 [1] : vector<16x16xf32> to vector<16xf32>
    %493 = vector.shape_cast %492 : vector<16xf32> to vector<16x1xf32>
    %494 = tpu.reciprocal %493 {approx = true} : vector<16x1xf32> -> vector<16x1xf32>
    %495 = vector.broadcast %494 : vector<16x1xf32> to vector<16x16xf32>
    %496 = arith.mulf %491, %495 : vector<16x16xf32>
    %cst_165 = arith.constant dense<0.000000e+00> : vector<16x32xf32>
    %497 = tpu.matmul %496, %480, %cst_165 {dimension_numbers = #tpu.dot_dimension_numbers<[1], [0], [0], [1], [0, 0, 1, 1], [], []>} : vector<16x16xf32>, vector<16x32xf32>, vector<16x32xf32> -> vector<16x32xf32>
    %498 = arith.truncf %497 : vector<16x32xf32> to vector<16x32xbf16>
    %499 = vector.extract_strided_slice %329 {offsets = [64, 0], sizes = [32, 128], strides = [1, 1]} : vector<128x128xbf16> to vector<32x128xbf16>
    %cst_166 = arith.constant dense<0.000000e+00> : vector<16x128xf32>
    %500 = tpu.matmul %498, %499, %cst_166 {dimension_numbers = #tpu.dot_dimension_numbers<[1], [0], [0], [1], [0, 0, 1, 1], [], []>} : vector<16x32xbf16>, vector<32x128xbf16>, vector<16x128xf32> -> vector<16x128xf32>
    %501 = arith.addf %477, %500 : vector<16x128xf32>
    %502 = vector.extract_strided_slice %327 {offsets = [16, 96], sizes = [16, 32], strides = [1, 1]} : vector<32x384xf32> to vector<16x32xf32>
    %503 = vector.extract_strided_slice %327 {offsets = [16, 224], sizes = [16, 32], strides = [1, 1]} : vector<32x384xf32> to vector<16x32xf32>
    %504 = vector.extract_strided_slice %327 {offsets = [16, 352], sizes = [16, 32], strides = [1, 1]} : vector<32x384xf32> to vector<16x32xf32>
    %505 = tpu.transpose %503, [1, 0] : vector<16x32xf32> -> vector<32x16xf32>
    %cst_167 = arith.constant dense<0.000000e+00> : vector<16x16xf32>
    %506 = tpu.matmul %502, %505, %cst_167 {dimension_numbers = #tpu.dot_dimension_numbers<[1], [0], [0], [1], [0, 0, 1, 1], [], []>} : vector<16x32xf32>, vector<32x16xf32>, vector<16x16xf32> -> vector<16x16xf32>
    %cst_168 = arith.constant 0.176776692 : f32
    %507 = vector.broadcast %cst_168 : f32 to vector<16x16xf32>
    %508 = arith.mulf %506, %507 : vector<16x16xf32>
    %509 = vector.broadcast %428 : vector<1x16xf32> to vector<16x16xf32>
    %510 = arith.addf %508, %509 : vector<16x16xf32>
    %cst_169 = arith.constant dense<0xFF800000> : vector<16xf32>
    %511 = vector.multi_reduction <maximumf>, %510, %cst_169 [1] : vector<16x16xf32> to vector<16xf32>
    %512 = vector.shape_cast %511 : vector<16xf32> to vector<16x1xf32>
    %513 = vector.broadcast %512 : vector<16x1xf32> to vector<16x16xf32>
    %514 = arith.subf %510, %513 : vector<16x16xf32>
    %515 = math.exp %514 : vector<16x16xf32>
    %cst_170 = arith.constant dense<0.000000e+00> : vector<16xf32>
    %516 = vector.multi_reduction <add>, %515, %cst_170 [1] : vector<16x16xf32> to vector<16xf32>
    %517 = vector.shape_cast %516 : vector<16xf32> to vector<16x1xf32>
    %518 = tpu.reciprocal %517 {approx = true} : vector<16x1xf32> -> vector<16x1xf32>
    %519 = vector.broadcast %518 : vector<16x1xf32> to vector<16x16xf32>
    %520 = arith.mulf %515, %519 : vector<16x16xf32>
    %cst_171 = arith.constant dense<0.000000e+00> : vector<16x32xf32>
    %521 = tpu.matmul %520, %504, %cst_171 {dimension_numbers = #tpu.dot_dimension_numbers<[1], [0], [0], [1], [0, 0, 1, 1], [], []>} : vector<16x16xf32>, vector<16x32xf32>, vector<16x32xf32> -> vector<16x32xf32>
    %522 = arith.truncf %521 : vector<16x32xf32> to vector<16x32xbf16>
    %523 = vector.extract_strided_slice %329 {offsets = [96, 0], sizes = [32, 128], strides = [1, 1]} : vector<128x128xbf16> to vector<32x128xbf16>
    %cst_172 = arith.constant dense<0.000000e+00> : vector<16x128xf32>
    %524 = tpu.matmul %522, %523, %cst_172 {dimension_numbers = #tpu.dot_dimension_numbers<[1], [0], [0], [1], [0, 0, 1, 1], [], []>} : vector<16x32xbf16>, vector<32x128xbf16>, vector<16x128xf32> -> vector<16x128xf32>
    %525 = arith.addf %501, %524 : vector<16x128xf32>
    %526 = tpu.concatenate %427, %525 in 0 : vector<16x128xf32>, vector<16x128xf32> -> vector<32x128xf32>
    %c1_173 = arith.constant 1 : index
    %c0_174 = arith.constant 0 : index
    %c0_175 = arith.constant 0 : index
    %527 = vector.load %arg7[%c1_173, %c0_174, %c0_175] : memref<2x1x128xf32, #tpu.memory_space<vmem>>, vector<1x1x128xf32>
    %528 = vector.shape_cast %527 : vector<1x1x128xf32> to vector<1x128xf32>
    %529 = vector.broadcast %528 : vector<1x128xf32> to vector<32x128xf32>
    %530 = arith.addf %526, %529 : vector<32x128xf32>
    %531 = arith.addf %319, %530 : vector<32x128xf32>
    %c1_176 = arith.constant 1 : index
    %c0_177 = arith.constant 0 : index
    %c0_178 = arith.constant 0 : index
    %532 = vector.load %arg8[%c1_176, %c0_177, %c0_178] : memref<2x1x128xf32, #tpu.memory_space<vmem>>, vector<1x1x128xf32>
    %533 = vector.shape_cast %532 : vector<1x1x128xf32> to vector<1x128xf32>
    %c1_179 = arith.constant 1 : index
    %c0_180 = arith.constant 0 : index
    %c0_181 = arith.constant 0 : index
    %534 = vector.load %arg9[%c1_179, %c0_180, %c0_181] : memref<2x1x128xf32, #tpu.memory_space<vmem>>, vector<1x1x128xf32>
    %535 = vector.shape_cast %534 : vector<1x1x128xf32> to vector<1x128xf32>
    %cst_182 = arith.constant dense<0.000000e+00> : vector<32xf32>
    %536 = vector.multi_reduction <add>, %531, %cst_182 [1] : vector<32x128xf32> to vector<32xf32>
    %537 = vector.shape_cast %536 : vector<32xf32> to vector<32x1xf32>
    %cst_183 = arith.constant 1.280000e+02 : f32
    %538 = vector.broadcast %cst_183 : f32 to vector<32x1xf32>
    %539 = arith.divf %537, %538 : vector<32x1xf32>
    %540 = vector.broadcast %539 : vector<32x1xf32> to vector<32x128xf32>
    %541 = arith.subf %531, %540 : vector<32x128xf32>
    %542 = arith.mulf %541, %541 : vector<32x128xf32>
    %cst_184 = arith.constant dense<0.000000e+00> : vector<32xf32>
    %543 = vector.multi_reduction <add>, %542, %cst_184 [1] : vector<32x128xf32> to vector<32xf32>
    %544 = vector.shape_cast %543 : vector<32xf32> to vector<32x1xf32>
    %cst_185 = arith.constant 1.280000e+02 : f32
    %545 = vector.broadcast %cst_185 : f32 to vector<32x1xf32>
    %546 = arith.divf %544, %545 : vector<32x1xf32>
    %547 = vector.broadcast %539 : vector<32x1xf32> to vector<32x128xf32>
    %548 = arith.subf %531, %547 : vector<32x128xf32>
    %cst_186 = arith.constant 9.99999974E-6 : f32
    %549 = vector.broadcast %cst_186 : f32 to vector<32x1xf32>
    %550 = arith.addf %546, %549 : vector<32x1xf32>
    %551 = math.rsqrt %550 : vector<32x1xf32>
    %552 = vector.broadcast %551 : vector<32x1xf32> to vector<32x128xf32>
    %553 = arith.mulf %548, %552 : vector<32x128xf32>
    %554 = vector.broadcast %533 : vector<1x128xf32> to vector<32x128xf32>
    %555 = arith.mulf %553, %554 : vector<32x128xf32>
    %556 = vector.broadcast %535 : vector<1x128xf32> to vector<32x128xf32>
    %557 = arith.addf %555, %556 : vector<32x128xf32>
    %c1_187 = arith.constant 1 : index
    %c0_188 = arith.constant 0 : index
    %c0_189 = arith.constant 0 : index
    %558 = vector.load %arg10[%c1_187, %c0_188, %c0_189] : memref<2x128x256xbf16, #tpu.memory_space<vmem>>, vector<1x128x256xbf16>
    %559 = vector.shape_cast %558 : vector<1x128x256xbf16> to vector<128x256xbf16>
    %560 = arith.truncf %557 : vector<32x128xf32> to vector<32x128xbf16>
    %cst_190 = arith.constant dense<0.000000e+00> : vector<32x256xf32>
    %561 = tpu.matmul %560, %559, %cst_190 {dimension_numbers = #tpu.dot_dimension_numbers<[1], [0], [0], [1], [0, 0, 1, 1], [], []>} : vector<32x128xbf16>, vector<128x256xbf16>, vector<32x256xf32> -> vector<32x256xf32>
    %c1_191 = arith.constant 1 : index
    %c0_192 = arith.constant 0 : index
    %c0_193 = arith.constant 0 : index
    %562 = vector.load %arg11[%c1_191, %c0_192, %c0_193] : memref<2x1x256xf32, #tpu.memory_space<vmem>>, vector<1x1x256xf32>
    %563 = vector.shape_cast %562 : vector<1x1x256xf32> to vector<1x256xf32>
    %564 = vector.broadcast %563 : vector<1x256xf32> to vector<32x256xf32>
    %565 = arith.addf %561, %564 : vector<32x256xf32>
    %566 = arith.mulf %565, %565 : vector<32x256xf32>
    %567 = arith.mulf %565, %566 : vector<32x256xf32>
    %cst_194 = arith.constant 4.471500e-02 : f32
    %568 = vector.broadcast %cst_194 : f32 to vector<32x256xf32>
    %569 = arith.mulf %568, %567 : vector<32x256xf32>
    %570 = arith.addf %565, %569 : vector<32x256xf32>
    %cst_195 = arith.constant 0.797884583 : f32
    %571 = vector.broadcast %cst_195 : f32 to vector<32x256xf32>
    %572 = arith.mulf %571, %570 : vector<32x256xf32>
    %573 = math.tanh %572 : vector<32x256xf32>
    %cst_196 = arith.constant 1.000000e+00 : f32
    %574 = vector.broadcast %cst_196 : f32 to vector<32x256xf32>
    %575 = arith.addf %574, %573 : vector<32x256xf32>
    %cst_197 = arith.constant 5.000000e-01 : f32
    %576 = vector.broadcast %cst_197 : f32 to vector<32x256xf32>
    %577 = arith.mulf %576, %575 : vector<32x256xf32>
    %578 = arith.mulf %565, %577 : vector<32x256xf32>
    %c1_198 = arith.constant 1 : index
    %c0_199 = arith.constant 0 : index
    %c0_200 = arith.constant 0 : index
    %579 = vector.load %arg12[%c1_198, %c0_199, %c0_200] : memref<2x256x128xbf16, #tpu.memory_space<vmem>>, vector<1x256x128xbf16>
    %580 = vector.shape_cast %579 : vector<1x256x128xbf16> to vector<256x128xbf16>
    %581 = arith.truncf %578 : vector<32x256xf32> to vector<32x256xbf16>
    %cst_201 = arith.constant dense<0.000000e+00> : vector<32x128xf32>
    %582 = tpu.matmul %581, %580, %cst_201 {dimension_numbers = #tpu.dot_dimension_numbers<[1], [0], [0], [1], [0, 0, 1, 1], [], []>} : vector<32x256xbf16>, vector<256x128xbf16>, vector<32x128xf32> -> vector<32x128xf32>
    %c1_202 = arith.constant 1 : index
    %c0_203 = arith.constant 0 : index
    %c0_204 = arith.constant 0 : index
    %583 = vector.load %arg13[%c1_202, %c0_203, %c0_204] : memref<2x1x128xf32, #tpu.memory_space<vmem>>, vector<1x1x128xf32>
    %584 = vector.shape_cast %583 : vector<1x1x128xf32> to vector<1x128xf32>
    %585 = vector.broadcast %584 : vector<1x128xf32> to vector<32x128xf32>
    %586 = arith.addf %582, %585 : vector<32x128xf32>
    %587 = arith.addf %557, %586 : vector<32x128xf32>
    %c1_205 = arith.constant 1 : index
    %c0_206 = arith.constant 0 : index
    %c0_207 = arith.constant 0 : index
    %588 = vector.load %arg14[%c1_205, %c0_206, %c0_207] : memref<2x1x128xf32, #tpu.memory_space<vmem>>, vector<1x1x128xf32>
    %589 = vector.shape_cast %588 : vector<1x1x128xf32> to vector<1x128xf32>
    %c1_208 = arith.constant 1 : index
    %c0_209 = arith.constant 0 : index
    %c0_210 = arith.constant 0 : index
    %590 = vector.load %arg15[%c1_208, %c0_209, %c0_210] : memref<2x1x128xf32, #tpu.memory_space<vmem>>, vector<1x1x128xf32>
    %591 = vector.shape_cast %590 : vector<1x1x128xf32> to vector<1x128xf32>
    %cst_211 = arith.constant dense<0.000000e+00> : vector<32xf32>
    %592 = vector.multi_reduction <add>, %587, %cst_211 [1] : vector<32x128xf32> to vector<32xf32>
    %593 = vector.shape_cast %592 : vector<32xf32> to vector<32x1xf32>
    %cst_212 = arith.constant 1.280000e+02 : f32
    %594 = vector.broadcast %cst_212 : f32 to vector<32x1xf32>
    %595 = arith.divf %593, %594 : vector<32x1xf32>
    %596 = vector.broadcast %595 : vector<32x1xf32> to vector<32x128xf32>
    %597 = arith.subf %587, %596 : vector<32x128xf32>
    %598 = arith.mulf %597, %597 : vector<32x128xf32>
    %cst_213 = arith.constant dense<0.000000e+00> : vector<32xf32>
    %599 = vector.multi_reduction <add>, %598, %cst_213 [1] : vector<32x128xf32> to vector<32xf32>
    %600 = vector.shape_cast %599 : vector<32xf32> to vector<32x1xf32>
    %cst_214 = arith.constant 1.280000e+02 : f32
    %601 = vector.broadcast %cst_214 : f32 to vector<32x1xf32>
    %602 = arith.divf %600, %601 : vector<32x1xf32>
    %603 = vector.broadcast %595 : vector<32x1xf32> to vector<32x128xf32>
    %604 = arith.subf %587, %603 : vector<32x128xf32>
    %cst_215 = arith.constant 9.99999974E-6 : f32
    %605 = vector.broadcast %cst_215 : f32 to vector<32x1xf32>
    %606 = arith.addf %602, %605 : vector<32x1xf32>
    %607 = math.rsqrt %606 : vector<32x1xf32>
    %608 = vector.broadcast %607 : vector<32x1xf32> to vector<32x128xf32>
    %609 = arith.mulf %604, %608 : vector<32x128xf32>
    %610 = vector.broadcast %589 : vector<1x128xf32> to vector<32x128xf32>
    %611 = arith.mulf %609, %610 : vector<32x128xf32>
    %612 = vector.broadcast %591 : vector<1x128xf32> to vector<32x128xf32>
    %613 = arith.addf %611, %612 : vector<32x128xf32>
    %c0_216 = arith.constant 0 : index
    %c0_217 = arith.constant 0 : index
    %614 = vector.load %arg16[%c0_216, %c0_217] : memref<32x128xf32, #tpu.memory_space<vmem>>, vector<32x128xf32>
    tpu.vector_store %arg16[%c0_216, %c0_217], %613 {strides = array<i32>} : memref<32x128xf32, #tpu.memory_space<vmem>>, vector<32x128xf32>,
    return
  }
}

</mosaic_0001>

<bundles_post_ra>
// kernel: forward.1
= control target key start
LH: loop header
LB: loop body
LE: loop exit
PB: predicated region body
PF: predicated region fallthrough
CT: control target
= control target key end

     0   :  { %s8872_s0 = inlined_call_operand.vmem [shape: f32[32,128], index: 0, kind: input, shape index: {}]   ;;  %s8873_s1 = inlined_call_operand.vmem [shape: f32[2,16], index: 1, kind: input, shape index: {}]   ;;  %s8874_s2 = inlined_call_operand.vmem [shape: f32[1,128], index: 2, kind: input, shape index: {}]   ;;  %s8875_s3 = inlined_call_operand.vmem [shape: f32[1,128], index: 3, kind: input, shape index: {}]   ;;  %s8876_s4 = inlined_call_operand.vmem [shape: bf16[2,128,384], index: 4, kind: input, shape index: {}]   ;;  %s8877_s5 = inlined_call_operand.vmem [shape: f32[2,1,384], index: 5, kind: input, shape index: {}]   ;;  %s8878_s6 = inlined_call_operand.hbm [shape: bf16[2,128,128], index: 6, kind: input, shape index: {}]   ;;  %s8879_s7 = inlined_call_operand.vmem [shape: f32[2,1,128], index: 7, kind: input, shape index: {}]   ;;  %s8880_s8 = inlined_call_operand.vmem [shape: f32[2,1,128], index: 8, kind: input, shape index: {}]   ;;  %s8881_s9 = inlined_call_operand.vmem [shape: f32[2,1,128], index: 9, kind: input, shape index: {}]   ;;  %s8882_s10 = inlined_call_operand.vmem [shape: bf16[2,128,256], index: 10, kind: input, shape index: {}]   ;;  %s8883_s11 = inlined_call_operand.vmem [shape: f32[2,1,256], index: 11, kind: input, shape index: {}]   ;;  %s8884_s12 = inlined_call_operand.hbm [shape: bf16[2,256,128], index: 12, kind: input, shape index: {}]   ;;  %s8885_s13 = inlined_call_operand.vmem [shape: f32[2,1,128], index: 13, kind: input, shape index: {}]   ;;  %s8886_s14 = inlined_call_operand.vmem [shape: f32[2,1,128], index: 14, kind: input, shape index: {}]   ;;  %s8887_s15 = inlined_call_operand.vmem [shape: f32[2,1,128], index: 15, kind: input, shape index: {}]   ;;  %s8888_s16 = inlined_call_operand.vmem [shape: f32[32,128], index: 16, kind: output, shape index: {}]  }
   0x1   :  { %8890 = sst [smem:[#allocation8_spill]] %s8872_s0 }
   0x2   :  { %21 = vsyncpa [#allocation3], 0 }
   0x3   :  { %22 = vsyncpa [#allocation5], 0  ;;  %s7643_s21 = smov [#allocation2]   ;;  %s7595_s25 = scalar_lea.hbm %s8878_s6, 2048 }
   0x4   :  { %s40_s22 = sshll.u32 %s7643_s21, 4  ;;  %p7596_p0 = scmp.ne.s32.totalorder %s8878_s6, %s7595_s25  ;;  %s41_s22 = int_to_ptr.vmem [resolvable:$true] %s40_s22 }
   0x5   :  { %p7599_p1 = scmp.lt.u32.totalorder %s7595_s25, %s8878_s6 }
   0x7   :  { %p7601_p2 = pnand %p7599_p1, %p7596_p0 }
   0x9   :  { %7604 = shalt.err (!%p7601_p2)
}
   0xa   :  { %s7605_s30 = scalar_lea.vmem %s41_s22, 2048  ;;  %p7610_p4 = scmp.lt.s32.totalorder %s41_s22, %s41_s22 }
   0xb   :  { %p7606_p3 = scmp.ne.s32.totalorder %s41_s22, %s7605_s30  ;;  %p7611_p5 = scmp.lt.s32.totalorder %s7605_s30, %s7605_s30 }
   0xd   :  { %p7612_p6 = por %p7611_p5, %p7610_p4 }
   0xf   :  { %p7613_p7 = pnand %p7612_p6, %p7606_p3 }
  0x11   :  { %7616 = shalt.err (!%p7613_p7)
}
  0x12   :  { %s7644_s0 = smov 64   ;;  %s7645_s17 = smov 4  }
  0x13   :  { %46 = dma.hbm_to_vmem [thread:$0]  %s8878_s6, 2048, %s41_s22, [#allocation3], %s7644_s0, %s7644_s0, %s7645_s17  }
  0x14   :  { %s7646_s20 = smov [#allocation4]   ;;  %s7617_s25 = scalar_lea.hbm %s8884_s12, 4096 }
  0x15   :  { %s62_s21 = sshll.u32 %s7646_s20, 4  ;;  %p7618_p8 = scmp.ne.s32.totalorder %s8884_s12, %s7617_s25  ;;  %s63_s21 = int_to_ptr.vmem [resolvable:$true] %s62_s21 }
  0x16   :  { %p7621_p9 = scmp.lt.u32.totalorder %s7617_s25, %s8884_s12 }
  0x18   :  { %p7623_p10 = pnand %p7621_p9, %p7618_p8 }
  0x1a   :  { %7626 = shalt.err (!%p7623_p10)
}
  0x1b   :  { %s7627_s30 = scalar_lea.vmem %s63_s21, 4096  ;;  %p7632_p12 = scmp.lt.s32.totalorder %s63_s21, %s63_s21 }
  0x1c   :  { %p7628_p11 = scmp.ne.s32.totalorder %s63_s21, %s7627_s30  ;;  %p7633_p13 = scmp.lt.s32.totalorder %s7627_s30, %s7627_s30 }
  0x1e   :  { %p7634_p0 = por %p7633_p13, %p7632_p12 }
  0x20   :  { %p7635_p1 = pnand %p7634_p0, %p7628_p11 }
  0x22   :  { %7638 = shalt.err (!%p7635_p1)
}
  0x23   :  { %68 = dma.hbm_to_vmem [thread:$0]  %s8884_s12, 4096, %s63_s21, [#allocation5], %s7644_s0, %s7644_s0, %s7645_s17  }
  0x24   :  { %7639 = dma.done.wait [#allocation3], 2048  }
  0x25   :  { %7640 = vsyncadd [#allocation3], 4294965248 }
  0x26   :  { %7641 = dma.done.wait [#allocation5], 4096  }
  0x27   :  { %7642 = vsyncadd [#allocation5], 4294963200  ;;  %s8891_s20 = sld [smem:[#allocation8_spill]]  ;;  %v7235_v3 = vld [vmem:[%s8876_s4 + $0x4] ss:$12 sps:$4 sm:$0xff]   ;;  %v7647_v23 = vmov 0  }
  0x28   :  { %v7237_v4 = vld [vmem:[%s8876_s4] ss:$12 sps:$4 sm:$0xff]   ;;  %v7238_v5 = vld [vmem:[%s8876_s4 + $0x1c] ss:$12 sps:$4 sm:$0xff]   ;;  %333 = vmatprep.subr.bf16.mxu0 %v7235_v3  ;;  %v7240_v15 = vld [vmem:[%s8876_s4 + $0x18] ss:$12 sps:$4 sm:$0xff]   ;;  %365 = vmatprep.mubr.bf16.mxu0 %v7647_v23 }
  0x29   :  { %334 = vmatpush1.bf16.msra.mxu0 %v7237_v4  ;;  %v7241_v16 = vld [vmem:[%s8876_s4 + $0x34] ss:$12 sps:$4 sm:$0xff]   ;;  %v7243_v17 = vld [vmem:[%s8876_s4 + $0x30] ss:$12 sps:$4 sm:$0xff]   ;;  %v7244_v18 = vld [vmem:[%s8876_s4 + $0x4c] ss:$12 sps:$4 sm:$0xff]  }
  0x2a   :  { %335 = vmatprep.subr.bf16.mxu0 %v7238_v5  ;;  %v7246_v19 = vld [vmem:[%s8876_s4 + $0x48] ss:$12 sps:$4 sm:$0xff]   ;;  %v7247_v20 = vld [vmem:[%s8876_s4 + $0x64] ss:$12 sps:$4 sm:$0xff]   ;;  %v7249_v21 = vld [vmem:[%s8876_s4 + $0x60] ss:$12 sps:$4 sm:$0xff]  }
  0x2b   :  { %v7250_v22 = vld [vmem:[%s8876_s4 + $0x7c] ss:$12 sps:$4 sm:$0xff]   ;;  %v7252_v24 = vld [vmem:[%s8876_s4 + $0x78] ss:$12 sps:$4 sm:$0xff]   ;;  %v7253_v25 = vld [vmem:[%s8876_s4 + $0x94] ss:$12 sps:$4 sm:$0xff]  }
  0x2c   :  { %v7255_v26 = vld [vmem:[%s8876_s4 + $0x90] ss:$12 sps:$4 sm:$0xff]   ;;  %v7256_v27 = vld [vmem:[%s8876_s4 + $0xac] ss:$12 sps:$4 sm:$0xff]   ;;  %v7258_v28 = vld [vmem:[%s8876_s4 + $0xa8] ss:$12 sps:$4 sm:$0xff]  }
  0x2d   :  { %v83_v0 = vld [vmem:[%s8891_s20] sm:$0xff]  ;;  %v84_v1 = vld [vmem:[%s8891_s20 + $0x8] sm:$0xff]  ;;  %v85_v2 = vld [vmem:[%s8891_s20 + $0x10] sm:$0xff]  ;;  %336 = vmatpush1.bf16.msra.mxu0 %v7240_v15  ;;  %vm451_vm0 = vcmask 261120   ;;  %s7648_s30 = smov 96   ;;  %vm547_vm2 = vcmask 130048  }
  0x2e   :  { %89 = vadd.xlane.f32.xlu0 %v83_v0  ;;  %v86_v14 = vld [vmem:[%s8891_s20 + $0x18] sm:$0xff]  ;;  %337 = vmatprep.subr.bf16.mxu0 %v7241_v16  ;;  %v7259_v30 = vld [vmem:[%s8876_s4 + $0x8] ss:$12 sps:$4 sm:$0xff]   ;;  %v7260_v31 = vld [vmem:[%s8876_s4 + $0x20] ss:$12 sps:$4 sm:$0xff]   ;;  %vm7650_vm3 = vmmov 0  }
  0x2f   :  { %6554 = vmatprep.subr.bf16.mxu1 %v7259_v30  ;;  %v7261_v34 = vld [vmem:[%s8876_s4 + $0x38] ss:$12 sps:$4 sm:$0xff]   ;;  %v5992_v48 = vld [vmem:[%s8874_s2] ss:$0 sm:$0xff]  ;;  %v7262_v57 = vld [vmem:[%s8876_s4 + $0x50] ss:$12 sps:$4 sm:$0xff]  }
  0x30   :  { %6555 = vmatpush3.bf16.msra.mxu1 %v7259_v30  ;;  %v5993_v52 = vld [vmem:[%s8875_s3] ss:$0 sm:$0xff]  ;;  %v7263_v58 = vld [vmem:[%s8876_s4 + $0x68] ss:$12 sps:$4 sm:$0xff]   ;;  %v7265_v60 = vld [vmem:[%s8876_s4 + $0x98] ss:$12 sps:$4 sm:$0xff]  }
  0x31   :  { %338 = vmatpush1.bf16.msra.mxu0 %v7243_v17  ;;  %6556 = vmatprep.subr.bf16.mxu1 %v7260_v31  ;;  %v7264_v59 = vld [vmem:[%s8876_s4 + $0x80] ss:$12 sps:$4 sm:$0xff]   ;;  %v7266_v61 = vld [vmem:[%s8876_s4 + $0xb0] ss:$12 sps:$4 sm:$0xff]   ;;  %vm7906_vm1 = vmpackc.low %vm451_vm0, %vm451_vm0 }
  0x32   :  { %91 = vadd.xlane.f32.xlu0 %v84_v1  ;;  %339 = vmatprep.subr.bf16.mxu0 %v7244_v18  ;;  %v188_v16 = vld [vmem:[%s8877_s5] sm:$0x7] }
  0x34   :  { %6557 = vmatpush3.bf16.msra.mxu1 %v7260_v31 }
  0x35   :  { %340 = vmatpush1.bf16.msra.mxu0 %v7246_v19  ;;  %6558 = vmatprep.subr.bf16.mxu1 %v7261_v34 }
  0x36   :  { %93 = vadd.xlane.f32.xlu0 %v85_v2  ;;  %341 = vmatprep.subr.bf16.mxu0 %v7247_v20 }
  0x38   :  { %6559 = vmatpush3.bf16.msra.mxu1 %v7261_v34 }
  0x39   :  { %342 = vmatpush1.bf16.msra.mxu0 %v7249_v21  ;;  %6560 = vmatprep.subr.bf16.mxu1 %v7262_v57 }
  0x3a   :  { %343 = vmatprep.subr.bf16.mxu0 %v7250_v22 }
  0x3c   :  { %6561 = vmatpush3.bf16.msra.mxu1 %v7262_v57 }
  0x3d   :  { %344 = vmatpush1.bf16.msra.mxu0 %v7252_v24  ;;  %6562 = vmatprep.subr.bf16.mxu1 %v7263_v58 }
  0x3e   :  { %345 = vmatprep.subr.bf16.mxu0 %v7253_v25 }
  0x40   :  { %6563 = vmatpush3.bf16.msra.mxu1 %v7263_v58 }
  0x41   :  { %346 = vmatpush1.bf16.msra.mxu0 %v7255_v26  ;;  %6564 = vmatprep.subr.bf16.mxu1 %v7264_v59 }
  0x42   :  { %347 = vmatprep.subr.bf16.mxu0 %v7256_v27 }
  0x44   :  { %6565 = vmatpush3.bf16.msra.mxu1 %v7264_v59 }
  0x45   :  { %348 = vmatpush1.bf16.msra.mxu0 %v7258_v28  ;;  %6566 = vmatprep.subr.bf16.mxu1 %v7265_v60 }
  0x48   :  { %6567 = vmatpush3.bf16.msra.mxu1 %v7265_v60 }
  0x49   :  { %6568 = vmatprep.subr.bf16.mxu1 %v7266_v61 }
  0x4c   :  { %6569 = vmatpush3.bf16.msra.mxu1 %v7266_v61 }
  0xbb   :  { %v90_v6 = vpop.xlane.xlu0 %89 }
  0xbc   :  { %v98_v7 = vmul.f32 0.0078125, %v90_v6 }
  0xbe   :  { %v7783_v8 = vsub.f32 %v83_v0, %v98_v7 }
  0xbf   :  { %v92_v9 = vpop.xlane.xlu0 %91 }
  0xc0   :  { %v99_v10 = vmul.f32 0.0078125, %v92_v9  ;;  %v106_v11 = vmul.f32 %v7783_v8, %v7783_v8 }
  0xc2   :  { %110 = vadd.xlane.f32.xlu1 %v106_v11  ;;  %v7787_v12 = vsub.f32 %v84_v1, %v99_v10 }
  0xc3   :  { %v94_v29 = vpop.xlane.xlu0 %93 }
  0xc4   :  { %v107_v13 = vmul.f32 %v7787_v12, %v7787_v12  ;;  %v100_v32 = vmul.f32 0.0078125, %v94_v29 }
  0xc6   :  { %112 = vadd.xlane.f32.xlu1 %v107_v13  ;;  %v104_v33 = vsub.f32 %v85_v2, %v100_v32  ;;  %v190_v13 = vlaneseq }
  0xc8   :  { %v108_v35 = vmul.f32 %v104_v33, %v104_v33 }
  0xca   :  { %95 = vadd.xlane.f32.xlu1 %v86_v14  ;;  %114 = vadd.xlane.f32.xlu0 %v108_v35 }
 0x14f   :  { %v111_v36 = vpop.xlane.xlu1 %110 }
 0x150   :  { %v118_v37 = vmul.f32 0.0078125, %v111_v36 }
 0x152   :  { %v122_v38 = vadd.f32 1e-05, %v118_v37 }
 0x153   :  { %v113_v39 = vpop.xlane.xlu1 %112 }
 0x154   :  { %7395 = vrsqrt.f32 %v122_v38  ;;  %v119_v40 = vmul.f32 0.0078125, %v113_v39 }
 0x156   :  { %v123_v41 = vadd.f32 1e-05, %v119_v40 }
 0x157   :  { %v96_v42 = vpop.xlane.xlu1 %95  ;;  %v115_v62 = vpop.xlane.xlu0 %114 }
 0x158   :  { %7397 = vrsqrt.f32 %v123_v41  ;;  %v101_v43 = vmul.f32 0.0078125, %v96_v42  ;;  %v120_v63 = vmul.f32 0.0078125, %v115_v62  ;;  %v7948_v62 = vld [vmem:[%s8873_s1] sm:$0x3]  ;;  %s7651_s1 = smov 32  }
 0x15a   :  { %v105_v44 = vsub.f32 %v86_v14, %v101_v43  ;;  %v124_v0 = vadd.f32 1e-05, %v120_v63  ;;  %v7879_v14 = vshrl.u32 %v190_v13, 7 }
 0x15c   :  { %v109_v45 = vmul.f32 %v105_v44, %v105_v44  ;;  %7399 = vrsqrt.f32 %v124_v0  ;;  %v7882_v15 = vsub.s32 0, %v7879_v14  ;;  %v7888_v17 = vsub.s32 1, %v7879_v14 }
 0x15d   :  { %v200_v38 = vsub.s32 2, %v7879_v14 }
 0x15e   :  { %v7396_v46 = vpop.eup %7395  ;;  %116 = vadd.xlane.f32.xlu1 %v109_v45  ;;  %v7891_v18 = vrot.slane %v188_v16, %v7882_v15  ;;  %v197_v20 = vrot.slane %v188_v16, %v7888_v17  ;;  %v7952_v63 = vrot.slane %v7948_v62, %v7882_v15 }
 0x15f   :  { %v130_v47 = vmul.f32 %v7396_v46, %v7783_v8  ;;  %v201_v39 = vrot.slane %v188_v16, %v200_v38 }
 0x161   :  { %v140_v51 = vmul.f32 %v5992_v48, %v130_v47 }
 0x162   :  { %v7398_v49 = vpop.eup %7397 }
 0x163   :  { %v131_v50 = vmul.f32 %v7398_v49, %v7787_v12  ;;  %v7851_v54 = vadd.f32 %v5993_v52, %v140_v51 }
 0x165   :  { %v141_v53 = vmul.f32 %v5992_v48, %v131_v50 }
 0x166   :  { %v7400_v4 = vpop.eup %7399 }
 0x167   :  { %v7853_v55 = vadd.f32 %v5993_v52, %v141_v53  ;;  %v132_v5 = vmul.f32 %v7400_v4, %v104_v33 }
 0x169   :  { %v186_v56 = vpack.c.bf16 %v7853_v55, %v7851_v54  ;;  %v142_v6 = vmul.f32 %v5992_v48, %v132_v5 }
 0x16b   :  { %366 = vmatmul.mubr.bf16.vlgmr.msra.gmra.mrb[0].mxu0 %v186_v56  ;;  %6570 = vmatprep.mubr.bf16.mxu1 %v186_v56  ;;  %v7873_v10 = vadd.f32 %v5993_v52, %v142_v6 }
 0x16c   :  { %375 = vmatprep.mubr.bf16.mxu0 %v7647_v23 }
 0x1eb   :  { %v117_v1 = vpop.xlane.xlu1 %116 }
 0x1ec   :  { %v121_v2 = vmul.f32 0.0078125, %v117_v1 }
 0x1ee   :  { %v125_v3 = vadd.f32 1e-05, %v121_v2 }
 0x1f0   :  { %7401 = vrsqrt.f32 %v125_v3 }
 0x1fa   :  { %v7402_v7 = vpop.eup %7401 }
 0x1fb   :  { %v133_v8 = vmul.f32 %v7402_v7, %v105_v44 }
 0x1fd   :  { %v143_v9 = vmul.f32 %v5992_v48, %v133_v8 }
 0x1ff   :  { %v7875_v11 = vadd.f32 %v5993_v52, %v143_v9 }
 0x201   :  { %v187_v12 = vpack.c.bf16 %v7875_v11, %v7873_v10 }
 0x203   :  { %6571 = vmatmul.mubr.bf16.vlgmr.msra.gmra.mrb[0].mxu1 %v187_v12  ;;  %376 = vmatmul.mubr.bf16.gmra.mrb[4].mxu0 %v187_v12 }
 0x23e   :  { %v367_v19 = vpop.f32.mrb[0].mxu0 }
 0x23f   :  { %v7895_v21 = vadd.f32 %v367_v19, %v7891_v18  ;;  %v369_v22 = vpop.f32.mrb[1].mxu0 }
 0x240   :  { %v371_v24 = vpop.f32.mrb[2].mxu0  ;;  %v370_v26 = vadd.f32 %v369_v22, %v197_v20 }
 0x241   :  { %v373_v25 = vpop.f32.mrb[3].mxu0  ;;  %652 = vrot.lane.b32.xlu1 %v7895_v21, %s7648_s30  ;;  %6578 = vmatprep.mubr.msk.f32.mxu1 %vm451_vm0, %v7895_v21  ;;  %v7902_v28 = vadd.f32 %v371_v24, %v7891_v18 }
 0x242   :  { %v374_v27 = vadd.f32 %v373_v25, %v197_v20 }
 0x244   :  { %v6946_v30 = vpack.c.bf16 %v374_v27, %v370_v26  ;;  %v7910_v31 = vpack.i.bf16 %v374_v27, %v370_v26 }
 0x245   :  { %654 = vrot.lane.b32.xlu1 %v7902_v28, %s7648_s30 }
 0x246   :  { %6948 = vmatprep.subr.msk.bf16.mxu1 %vm7906_vm1, %v6946_v30  ;;  %7116 = vrot.lane.b32.xlu0 %v7910_v31, %s7648_s30 }
 0x247   :  { %6951 = vmatpush3.bf16.xpose.msk.msra.mxu1 %vm7906_vm1, %v6946_v30 }
 0x24e   :  { %6579 = vmatmul.mubr.msk.f32.vlgmr.msra.gmra.mrb[4].mxu1 %vm451_vm0, %v7902_v28 }
 0x2b3   :  { %v653_v32 = vpop.permute.xlu1 %652 }
 0x2b4   :  { %6592 = vmatprep.mubr.msk.f32.mxu0 %vm451_vm0, %v653_v32 }
 0x2b7   :  { %v655_v37 = vpop.permute.xlu1 %654 }
 0x2b8   :  { %v7117_v33 = vpop.permute.xlu0 %7116 }
 0x2b9   :  { %v7119_v34 = vunpack.i.h.bf16 %v7117_v33  ;;  %v7118_v35 = vunpack.i.l.bf16 %v7117_v33 }
 0x2bb   :  { %v6956_v36 = vpack.c.bf16 %v7119_v34, %v7118_v35 }
 0x2bd   :  { %6958 = vmatprep.subr.msk.bf16.mxu0 %vm7906_vm1, %v6956_v36 }
 0x2be   :  { %6961 = vmatpush3.bf16.xpose.msk.msra.mxu0 %vm7906_vm1, %v6956_v36 }
 0x2c5   :  { %6593 = vmatmul.mubr.msk.f32.vlgmr.msra.gmra.mrb[8].mxu0 %vm451_vm0, %v655_v37 }
 0x2d6   :  { %v6572_v40 = vpop.f32.mrb[0].mxu1  ;;  %v7931_v41 = vpop.f32.mrb[4].mxu0 }
 0x2d7   :  { %v429_v42 = vadd.f32 %v6572_v40, %v201_v39  ;;  %v420_v43 = vpop.f32.mrb[1].mxu1  ;;  %v379_v44 = vpop.f32.mrb[5].mxu0 }
 0x2d8   :  { %v421_v45 = vadd.f32 %v420_v43, %v201_v39  ;;  %v6573_v46 = vpop.f32.mrb[2].mxu1  ;;  %v7933_v47 = vpop.f32.mrb[6].mxu0  ;;  %v380_v48 = vadd.f32 %v379_v44, %v197_v20 }
 0x2d9   :  { %v432_v49 = vadd.f32 %v6573_v46, %v201_v39  ;;  %v423_v50 = vpop.f32.mrb[3].mxu1  ;;  %v383_v51 = vpop.f32.mrb[7].mxu0 }
 0x2da   :  { %v424_v52 = vadd.f32 %v423_v50, %v201_v39  ;;  %v384_v53 = vadd.f32 %v383_v51, %v197_v20  ;;  %v7968_v50 = vld [vmem:[#allocation2 + $0x10] sm:$0xff]   ;;  %v7649_v51 = vmov 0.0  }
 0x2db   :  { %v7935_v56 = vpack.c.bf16 %v432_v49, %v429_v42  ;;  %v7937_v57 = vpack.i.bf16 %v432_v49, %v429_v42  ;;  %6602 = vmatprep.subr.bf16.mxu0 %v7649_v51  ;;  %6606 = vmatprep.mubr.msk.bf16.mxu0 %vm7650_vm3, %v7649_v51 }
 0x2dc   :  { %v6952_v58 = vpack.c.bf16 %v424_v52, %v421_v45  ;;  %v7939_v59 = vpack.i.bf16 %v424_v52, %v421_v45  ;;  %v7941_v60 = vpack.c.bf16 %v384_v53, %v380_v48  ;;  %v7943_v61 = vpack.i.bf16 %v384_v53, %v380_v48  ;;  %6603 = vmatpush3.bf16.msra.mxu0 %v7968_v50 }
 0x2dd   :  { %6604 = vmatprep.subr.bf16.mxu0 %v7649_v51 }
 0x2de   :  { %6953 = vmatprep.subr.bf16.mxu1 %v6952_v58 }
 0x2df   :  { %6955 = vmatpush3.bf16.msra.mxu1 %v6952_v58  ;;  %v7975_v58 = vld [vmem:[#allocation2 + $0x18] sm:$0xff]  }
 0x2e0   :  { %6605 = vmatpush3.bf16.msra.mxu0 %v7975_v58 }
 0x321   :  { %v6580_v0 = vpop.f32.mrb[4].mxu1 }
 0x322   :  { %v540_v1 = vmul.f32 0.17677669, %v6580_v0  ;;  %v530_v2 = vpop.f32.mrb[5].mxu1 }
 0x323   :  { %v539_v3 = vmul.f32 0.17677669, %v530_v2 }
 0x324   :  { %v546_v4 = vadd.f32 %v7952_v63, %v540_v1 }
 0x325   :  { %v545_v5 = vadd.f32 %v7952_v63, %v539_v3 }
 0x326   :  { %v551_v6 = vsel %vm547_vm2, %v546_v4, -inf }
 0x327   :  { %552 = vmax.xlane.f32.xlu0 %v551_v6  ;;  %v548_v7 = vsel %vm547_vm2, %v545_v5, -inf }
 0x328   :  { %549 = vmax.xlane.f32.xlu1 %v548_v7 }
 0x398   :  { %v6594_v8 = vpop.f32.mrb[8].mxu0 }
 0x399   :  { %v734_v9 = vpop.f32.mrb[9].mxu0  ;;  %v744_v12 = vmul.f32 0.17677669, %v6594_v8 }
 0x39a   :  { %v743_v13 = vmul.f32 0.17677669, %v734_v9 }
 0x39b   :  { %v746_v20 = vadd.f32 %v744_v12, %v7952_v63 }
 0x39c   :  { %v745_v16 = vadd.f32 %v743_v13, %v7952_v63 }
 0x39d   :  { %v750_v22 = vsel %vm547_vm2, %v746_v20, -inf }
 0x39e   :  { %v747_v19 = vsel %vm547_vm2, %v745_v16, -inf }
 0x39f   :  { %748 = vmax.xlane.f32.xlu0 %v747_v19 }
 0x3a3   :  { %751 = vmax.xlane.f32.xlu0 %v750_v22 }
 0x3b4   :  { %v553_v24 = vpop.xlane.xlu0 %552 }
 0x3b5   :  { %v555_v25 = vsub.f32 %v546_v4, %v553_v24  ;;  %v550_v26 = vpop.xlane.xlu1 %549 }
 0x3b6   :  { %v554_v27 = vsub.f32 %v545_v5, %v550_v26 }
 0x3b7   :  { %v558_v30 = vmul.f32 1.442695, %v555_v25  ;;  %v7990_v25 = vld [vmem:[#allocation2] sm:$0xff]  }
 0x3b8   :  { %v556_v32 = vmul.f32 1.442695, %v554_v27  ;;  %v7994_v27 = vld [vmem:[#allocation2 + $0x8] sm:$0xff]  }
 0x3b9   :  { %7403 = vpow2.f32 %v558_v30 }
 0x3ba   :  { %7405 = vpow2.f32 %v556_v32 }
 0x3c3   :  { %v7404_v33 = vpop.eup %7403 }
 0x3c4   :  { %v7406_v34 = vpop.eup %7405  ;;  %v563_v35 = vsel %vm547_vm2, %v7404_v33, 0.0 }
 0x3c5   :  { %564 = vadd.xlane.f32.xlu0 %v563_v35  ;;  %v560_v36 = vsel %vm547_vm2, %v7406_v34, 0.0 }
 0x3c6   :  { %561 = vadd.xlane.f32.xlu1 %v560_v36 }
 0x42c   :  { %v749_v37 = vpop.xlane.xlu0 %748 }
 0x42d   :  { %v753_v39 = vsub.f32 %v745_v16, %v749_v37 }
 0x42f   :  { %v755_v40 = vmul.f32 1.442695, %v753_v39 }
 0x430   :  { %v752_v42 = vpop.xlane.xlu0 %751 }
 0x431   :  { %7407 = vpow2.f32 %v755_v40  ;;  %v754_v43 = vsub.f32 %v746_v20, %v752_v42 }
 0x433   :  { %v757_v44 = vmul.f32 1.442695, %v754_v43 }
 0x435   :  { %7409 = vpow2.f32 %v757_v44 }
 0x43b   :  { %v7408_v45 = vpop.eup %7407 }
 0x43c   :  { %v759_v46 = vsel %vm547_vm2, %v7408_v45, 0.0 }
 0x43d   :  { %760 = vadd.xlane.f32.xlu1 %v759_v46 }
 0x43f   :  { %v7410_v48 = vpop.eup %7409 }
 0x440   :  { %v762_v49 = vsel %vm547_vm2, %v7410_v48, 0.0 }
 0x441   :  { %763 = vadd.xlane.f32.xlu0 %v762_v49 }
 0x44e   :  { %7121 = vrot.lane.b32.xlu1 %v7939_v59, %s7648_s30 }
 0x452   :  { %v565_v52 = vpop.xlane.xlu0 %564  ;;  %971 = vrot.lane.b32.xlu1 %v7895_v21, %s7644_s0 }
 0x453   :  { %7411 = vrcp.f32 %v565_v52  ;;  %v562_v53 = vpop.xlane.xlu1 %561 }
 0x454   :  { %7413 = vrcp.f32 %v562_v53 }
 0x456   :  { %973 = vrot.lane.b32.xlu1 %v7902_v28, %s7644_s0 }
 0x457   :  { %7126 = vrot.lane.b32.xlu0 %v7910_v31, %s7644_s0 }
 0x45d   :  { %v7412_v0 = vpop.eup %7411 }
 0x45e   :  { %v7414_v1 = vpop.eup %7413  ;;  %v569_v3 = vmul.f32 %v7412_v0, %v7404_v33 }
 0x45f   :  { %v568_v2 = vmul.f32 %v7414_v1, %v7406_v34 }
 0x461   :  { %6585 = vmatprep.mubr.msk.f32.mxu1 %vm547_vm2, %v568_v2 }
 0x462   :  { %6586 = vmatmul.mubr.msk.f32.vlgmr.msra.gmra.mrb[6].mxu1 %vm547_vm2, %v569_v3 }
 0x4ca   :  { %v761_v4 = vpop.xlane.xlu1 %760 }
 0x4cb   :  { %7415 = vrcp.f32 %v761_v4 }
 0x4ce   :  { %v764_v5 = vpop.xlane.xlu0 %763  ;;  %v7122_v6 = vpop.permute.xlu1 %7121 }
 0x4cf   :  { %7417 = vrcp.f32 %v764_v5  ;;  %v7124_v7 = vunpack.i.h.bf16 %v7122_v6  ;;  %v7123_v8 = vunpack.i.l.bf16 %v7122_v6 }
 0x4d1   :  { %v6962_v9 = vpack.c.bf16 %v7124_v7, %v7123_v8 }
 0x4d2   :  { %v7127_v12 = vpop.permute.xlu0 %7126  ;;  %v972_v37 = vpop.permute.xlu1 %971 }
 0x4d3   :  { %v7129_v13 = vunpack.i.h.bf16 %v7127_v12  ;;  %v7128_v16 = vunpack.i.l.bf16 %v7127_v12  ;;  %6963 = vmatprep.subr.bf16.mxu1 %v6962_v9 }
 0x4d4   :  { %6965 = vmatpush3.bf16.msra.mxu1 %v6962_v9 }
 0x4d5   :  { %v7416_v19 = vpop.eup %7415  ;;  %v6966_v20 = vpack.c.bf16 %v7129_v13, %v7128_v16  ;;  %6610 = vmatprep.subr.bf16.mxu1 %v7649_v51 }
 0x4d6   :  { %v767_v22 = vmul.f32 %v7416_v19, %v7408_v45  ;;  %v974_v39 = vpop.permute.xlu1 %973 }
 0x4d7   :  { %6968 = vmatprep.subr.msk.bf16.mxu0 %vm7906_vm1, %v6966_v20 }
 0x4d8   :  { %6599 = vmatprep.mubr.msk.f32.mxu1 %vm547_vm2, %v767_v22 }
 0x4d9   :  { %v7418_v24 = vpop.eup %7417 }
 0x4da   :  { %v768_v26 = vmul.f32 %v7418_v24, %v7410_v48 }
 0x4dc   :  { %6600 = vmatmul.mubr.msk.f32.vlgmr.msra.gmra.mrb[8].mxu1 %vm547_vm2, %v768_v26 }
 0x4dd   :  { %6611 = vmatpush3.bf16.msra.mxu1 %v7990_v25  ;;  %6614 = vmatprep.mubr.msk.bf16.mxu1 %vm7650_vm3, %v7649_v51 }
 0x4de   :  { %6612 = vmatprep.subr.bf16.mxu1 %v7649_v51 }
 0x4e1   :  { %6613 = vmatpush3.bf16.msra.mxu1 %v7994_v27 }
 0x535   :  { %v6587_v30 = vpop.f32.mrb[6].mxu1 }
 0x536   :  { %v642_v32 = vpop.f32.mrb[7].mxu1 }
 0x537   :  { %v651_v33 = vpack.c.bf16 %v6587_v30, %v642_v32 }
 0x539   :  { %6615 = vmatmul.mubr.msk.bf16.vlgmr.msra.gmra.mrb[12].mxu1 %vm451_vm0, %v651_v33  ;;  %v8027_v33 = vld [vmem:[#allocation2 + $0x20] sm:$0xff]  }
 0x5af   :  { %v6601_v34 = vpop.f32.mrb[8].mxu1 }
 0x5b0   :  { %v849_v35 = vpop.f32.mrb[9].mxu1 }
 0x5b1   :  { %v858_v36 = vpack.c.bf16 %v6601_v34, %v849_v35 }
 0x5b3   :  { %6607 = vmatmul.mubr.msk.bf16.vlgmr.msra.gmra.mrb[12].mxu0 %vm451_vm0, %v858_v36 }
 0x5b4   :  { %6971 = vmatpush3.bf16.xpose.msk.msra.mxu0 %vm7906_vm1, %v6966_v20  ;;  %6622 = vmatprep.mubr.msk.f32.mxu0 %vm451_vm0, %v972_v37 }
 0x5b5   :  { %6632 = vmatprep.subr.bf16.mxu0 %v7649_v51 }
 0x5bb   :  { %6623 = vmatmul.mubr.msk.f32.vlgmr.msra.gmra.mrb[10].mxu0 %vm451_vm0, %v974_v39 }
 0x5bc   :  { %6636 = vmatprep.mubr.msk.bf16.mxu0 %vm7650_vm3, %v7649_v51  ;;  %6633 = vmatpush3.bf16.msra.mxu0 %v8027_v33 }
 0x5bd   :  { %6634 = vmatprep.subr.bf16.mxu0 %v7649_v51 }
 0x60c   :  { %v964_v40 = vpop.f32.mrb[12].mxu1 }
 0x60d   :  { %v6616_v42 = vpop.f32.mrb[13].mxu1 }
 0x60e   :  { %v967_v43 = vpop.f32.mrb[14].mxu1 }
 0x60f   :  { %v6617_v44 = vpop.f32.mrb[15].mxu1 }
 0x686   :  { %v908_v45 = vpop.f32.mrb[12].mxu0 }
 0x687   :  { %v8009_v46 = vadd.f32 %v964_v40, %v908_v45  ;;  %v6608_v48 = vpop.f32.mrb[13].mxu0 }
 0x688   :  { %v911_v49 = vpop.f32.mrb[14].mxu0 }
 0x689   :  { %v8011_v52 = vadd.f32 %v967_v43, %v911_v49  ;;  %v6609_v53 = vpop.f32.mrb[15].mxu0  ;;  %v8039_v49 = vld [vmem:[#allocation2 + $0x28] sm:$0xff]  }
 0x68a   :  { %6635 = vmatpush3.bf16.msra.mxu0 %v8039_v49 }
 0x68b   :  { %6654 = vmatprep.subr.bf16.mxu0 %v7649_v51 }
 0x68e   :  { %v6624_v0 = vpop.f32.mrb[10].mxu0 }
 0x68f   :  { %v1063_v1 = vmul.f32 0.17677669, %v6624_v0  ;;  %v1053_v2 = vpop.f32.mrb[11].mxu0 }
 0x690   :  { %v1062_v3 = vmul.f32 0.17677669, %v1053_v2 }
 0x691   :  { %v1065_v4 = vadd.f32 %v1063_v1, %v7952_v63  ;;  %v8043_v1 = vld [vmem:[#allocation2 + $0x30] sm:$0xff]  }
 0x692   :  { %v1064_v5 = vadd.f32 %v1062_v3, %v7952_v63  ;;  %v8047_v3 = vld [vmem:[#allocation2 + $0x38] sm:$0xff]  }
 0x693   :  { %v1069_v6 = vsel %vm547_vm2, %v1065_v4, -inf }
 0x694   :  { %1070 = vmax.xlane.f32.xlu0 %v1069_v6  ;;  %v1066_v7 = vsel %vm547_vm2, %v1064_v5, -inf }
 0x695   :  { %1067 = vmax.xlane.f32.xlu1 %v1066_v7 }
 0x6a6   :  { %7131 = vrot.lane.b32.xlu1 %v7939_v59, %s7644_s0 }
 0x6aa   :  { %1234 = vrot.lane.b32.xlu1 %v7895_v21, %s7651_s1 }
 0x6ae   :  { %1236 = vrot.lane.b32.xlu1 %v7902_v28, %s7651_s1 }
 0x721   :  { %v1071_v8 = vpop.xlane.xlu0 %1070 }
 0x722   :  { %v1073_v9 = vsub.f32 %v1065_v4, %v1071_v8  ;;  %v1068_v12 = vpop.xlane.xlu1 %1067 }
 0x723   :  { %v1072_v13 = vsub.f32 %v1064_v5, %v1068_v12 }
 0x724   :  { %v1076_v16 = vmul.f32 1.442695, %v1073_v9 }
 0x725   :  { %v1074_v19 = vmul.f32 1.442695, %v1072_v13 }
 0x726   :  { %7419 = vpow2.f32 %v1076_v16  ;;  %v7132_v20 = vpop.permute.xlu1 %7131  ;;  %v8062_v16 = vadd.f32 %v7931_v41, %v7891_v18 }
 0x727   :  { %v7134_v22 = vunpack.i.h.bf16 %v7132_v20  ;;  %v7133_v24 = vunpack.i.l.bf16 %v7132_v20  ;;  %7421 = vpow2.f32 %v1074_v19  ;;  %v8068_v19 = vadd.f32 %v7933_v47, %v7891_v18 }
 0x729   :  { %v6972_v26 = vpack.c.bf16 %v7134_v22, %v7133_v24 }
 0x72a   :  { %v1235_v45 = vpop.permute.xlu1 %1234 }
 0x72b   :  { %6973 = vmatprep.subr.bf16.mxu1 %v6972_v26 }
 0x72c   :  { %6975 = vmatpush3.bf16.msra.mxu1 %v6972_v26 }
 0x72e   :  { %v1237_v48 = vpop.permute.xlu1 %1236 }
 0x730   :  { %v7420_v30 = vpop.eup %7419 }
 0x731   :  { %v1081_v21 = vsel %vm547_vm2, %v7420_v30, 0.0  ;;  %v7422_v32 = vpop.eup %7421 }
 0x732   :  { %1082 = vadd.xlane.f32.xlu0 %v1081_v21  ;;  %v1078_v28 = vsel %vm547_vm2, %v7422_v32, 0.0 }
 0x736   :  { %1079 = vadd.xlane.f32.xlu0 %v1078_v28 }
 0x74c   :  { %7136 = vrot.lane.b32.xlu0 %v7910_v31, %s7651_s1 }
 0x7bf   :  { %v1083_v34 = vpop.xlane.xlu0 %1082 }
 0x7c0   :  { %7423 = vrcp.f32 %v1083_v34 }
 0x7c3   :  { %v1080_v35 = vpop.xlane.xlu0 %1079 }
 0x7c4   :  { %7425 = vrcp.f32 %v1080_v35 }
 0x7c7   :  { %v7137_v36 = vpop.permute.xlu0 %7136 }
 0x7c8   :  { %v7139_v37 = vunpack.i.h.bf16 %v7137_v36  ;;  %v7138_v39 = vunpack.i.l.bf16 %v7137_v36 }
 0x7ca   :  { %v6976_v40 = vpack.c.bf16 %v7139_v37, %v7138_v39  ;;  %v7424_v42 = vpop.eup %7423 }
 0x7cb   :  { %v1087_v44 = vmul.f32 %v7424_v42, %v7420_v30 }
 0x7cc   :  { %6978 = vmatprep.subr.msk.bf16.mxu1 %vm7906_vm1, %v6976_v40 }
 0x7ce   :  { %v7426_v43 = vpop.eup %7425 }
 0x7cf   :  { %v1086_v31 = vmul.f32 %v7426_v43, %v7422_v32 }
 0x7d1   :  { %6629 = vmatprep.mubr.msk.f32.mxu1 %vm547_vm2, %v1086_v31 }
 0x7d2   :  { %6630 = vmatmul.mubr.msk.f32.vlgmr.msra.gmra.mrb[10].mxu1 %vm547_vm2, %v1087_v44 }
 0x7d3   :  { %6981 = vmatpush3.bf16.xpose.msk.msra.mxu1 %vm7906_vm1, %v6976_v40  ;;  %6644 = vmatprep.mubr.msk.f32.mxu1 %vm451_vm0, %v1235_v45 }
 0x7da   :  { %6645 = vmatmul.mubr.msk.f32.vlgmr.msra.gmra.mrb[16].mxu1 %vm451_vm0, %v1237_v48 }
 0x8a5   :  { %v6631_v53 = vpop.f32.mrb[10].mxu1 }
 0x8a6   :  { %v1166_v0 = vpop.f32.mrb[11].mxu1 }
 0x8a7   :  { %v1175_v2 = vpack.c.bf16 %v6631_v53, %v1166_v0 }
 0x8a9   :  { %6637 = vmatmul.mubr.msk.bf16.vlgmr.msra.gmra.mrb[16].mxu0 %vm451_vm0, %v1175_v2 }
 0x8aa   :  { %6655 = vmatpush3.bf16.msra.mxu0 %v8043_v1  ;;  %6658 = vmatprep.mubr.msk.bf16.mxu0 %vm7650_vm3, %v7649_v51 }
 0x8ab   :  { %6656 = vmatprep.subr.bf16.mxu0 %v7649_v51 }
 0x8ad   :  { %v6646_v4 = vpop.f32.mrb[16].mxu1 }
 0x8ae   :  { %v1326_v5 = vmul.f32 0.17677669, %v6646_v4  ;;  %v1316_v6 = vpop.f32.mrb[17].mxu1  ;;  %6657 = vmatpush3.bf16.msra.mxu0 %v8047_v3 }
 0x8af   :  { %v1325_v7 = vmul.f32 0.17677669, %v1316_v6  ;;  %6993 = vmatprep.subr.bf16.mxu0 %v7935_v56 }
 0x8b0   :  { %v1328_v8 = vadd.f32 %v1326_v5, %v7952_v63 }
 0x8b1   :  { %v1327_v9 = vadd.f32 %v1325_v7, %v7952_v63 }
 0x8b2   :  { %v1332_v12 = vsel %vm547_vm2, %v1328_v8, -inf }
 0x8b3   :  { %1333 = vmax.xlane.f32.xlu0 %v1332_v12  ;;  %v1329_v13 = vsel %vm547_vm2, %v1327_v9, -inf }
 0x8b4   :  { %1330 = vmax.xlane.f32.xlu1 %v1329_v13 }
 0x8c5   :  { %7141 = vrot.lane.b32.xlu1 %v7939_v59, %s7651_s1 }
 0x8c9   :  { %1696 = vrot.lane.b32.xlu1 %v8062_v16, %s7648_s30 }
 0x8cd   :  { %1698 = vrot.lane.b32.xlu1 %v8068_v19, %s7648_s30 }
 0x940   :  { %v1334_v20 = vpop.xlane.xlu0 %1333 }
 0x941   :  { %v1336_v22 = vsub.f32 %v1328_v8, %v1334_v20  ;;  %v1331_v24 = vpop.xlane.xlu1 %1330 }
 0x942   :  { %v1335_v26 = vsub.f32 %v1327_v9, %v1331_v24  ;;  %v8110_v9 = vrot.slane %v7948_v62, %v7888_v17 }
 0x943   :  { %v1339_v30 = vmul.f32 1.442695, %v1336_v22 }
 0x944   :  { %v1337_v59 = vmul.f32 1.442695, %v1335_v26 }
 0x945   :  { %v7142_v21 = vpop.permute.xlu1 %7141 }
 0x946   :  { %7427 = vpow2.f32 %v1337_v59  ;;  %v7144_v41 = vunpack.i.h.bf16 %v7142_v21  ;;  %v7143_v32 = vunpack.i.l.bf16 %v7142_v21 }
 0x947   :  { %7429 = vpow2.f32 %v1339_v30 }
 0x948   :  { %v6982_v28 = vpack.c.bf16 %v7144_v41, %v7143_v32 }
 0x94a   :  { %6983 = vmatprep.subr.bf16.mxu1 %v6982_v28 }
 0x94b   :  { %6985 = vmatpush3.bf16.msra.mxu1 %v6982_v28 }
 0x94c   :  { %6988 = vmatprep.subr.msk.bf16.mxu1 %vm7906_vm1, %v7941_v60 }
 0x950   :  { %v7428_v18 = vpop.eup %7427 }
 0x951   :  { %v1341_v47 = vsel %vm547_vm2, %v7428_v18, 0.0  ;;  %v7430_v34 = vpop.eup %7429 }
 0x952   :  { %1342 = vadd.xlane.f32.xlu0 %v1341_v47  ;;  %v1344_v35 = vsel %vm547_vm2, %v7430_v34, 0.0 }
 0x956   :  { %1345 = vadd.xlane.f32.xlu0 %v1344_v35 }
 0x96c   :  { %7146 = vrot.lane.b32.xlu0 %v7943_v61, %s7648_s30 }
 0x97c   :  { %v1225_v36 = vpop.f32.mrb[16].mxu0 }
 0x97d   :  { %v8080_v37 = vadd.f32 %v1225_v36, %v8009_v46  ;;  %v6638_v39 = vpop.f32.mrb[17].mxu0 }
 0x97e   :  { %v1228_v40 = vpop.f32.mrb[18].mxu0 }
 0x97f   :  { %v8083_v42 = vadd.f32 %v1228_v40, %v8011_v52  ;;  %v6639_v43 = vpop.f32.mrb[19].mxu0  ;;  %v1697_v52 = vpop.permute.xlu1 %1696 }
 0x983   :  { %v1699_v6 = vpop.permute.xlu1 %1698 }
 0x9df   :  { %v1343_v31 = vpop.xlane.xlu0 %1342 }
 0x9e0   :  { %7431 = vrcp.f32 %v1343_v31 }
 0x9e3   :  { %v1346_v44 = vpop.xlane.xlu0 %1345 }
 0x9e4   :  { %7433 = vrcp.f32 %v1346_v44 }
 0x9e7   :  { %v7147_v48 = vpop.permute.xlu0 %7146 }
 0x9e8   :  { %v7149_v0 = vunpack.i.h.bf16 %v7147_v48  ;;  %v7148_v2 = vunpack.i.l.bf16 %v7147_v48 }
 0x9ea   :  { %v7432_v45 = vpop.eup %7431  ;;  %v6996_v5 = vpack.c.bf16 %v7149_v0, %v7148_v2 }
 0x9eb   :  { %v1349_v53 = vmul.f32 %v7432_v45, %v7428_v18 }
 0x9ed   :  { %6651 = vmatprep.mubr.msk.f32.mxu1 %vm547_vm2, %v1349_v53 }
 0x9ee   :  { %v7434_v4 = vpop.eup %7433 }
 0x9ef   :  { %v1350_v46 = vmul.f32 %v7434_v4, %v7430_v34 }
 0x9f1   :  { %6652 = vmatmul.mubr.msk.f32.vlgmr.msra.gmra.mrb[18].mxu1 %vm547_vm2, %v1350_v46 }
 0x9f2   :  { %6991 = vmatpush3.bf16.xpose.msk.msra.mxu1 %vm7906_vm1, %v7941_v60  ;;  %6666 = vmatprep.mubr.msk.f32.mxu1 %vm451_vm0, %v8062_v16 }
 0x9f3   :  { %6998 = vmatprep.subr.msk.bf16.mxu1 %vm7906_vm1, %v6996_v5 }
 0x9f9   :  { %6667 = vmatmul.mubr.msk.f32.vlgmr.msra.gmra.mrb[20].mxu1 %vm451_vm0, %v8068_v19 }
 0x9fa   :  { %7001 = vmatpush3.bf16.xpose.msk.msra.mxu1 %vm7906_vm1, %v6996_v5  ;;  %6680 = vmatprep.mubr.msk.f32.mxu1 %vm451_vm0, %v1697_v52 }
 0x9fb   :  { %6698 = vmatprep.subr.bf16.mxu1 %v7649_v51 }
 0xa01   :  { %6681 = vmatmul.mubr.msk.f32.vlgmr.msra.gmra.mrb[22].mxu1 %vm451_vm0, %v1699_v6 }
 0xa02   :  { %6699 = vmatpush3.bf16.msra.mxu1 %v7990_v25  ;;  %6702 = vmatprep.mubr.msk.bf16.mxu1 %vm7650_vm3, %v7649_v51 }
 0xa03   :  { %6700 = vmatprep.subr.bf16.mxu1 %v7649_v51 }
 0xa06   :  { %6701 = vmatpush3.bf16.msra.mxu1 %v7994_v27 }
 0xac4   :  { %v6653_v60 = vpop.f32.mrb[18].mxu1 }
 0xac5   :  { %v1429_v7 = vpop.f32.mrb[19].mxu1 }
 0xac6   :  { %v1438_v8 = vpack.c.bf16 %v6653_v60, %v1429_v7 }
 0xac8   :  { %6659 = vmatmul.mubr.msk.bf16.vlgmr.msra.gmra.mrb[20].mxu0 %vm451_vm0, %v1438_v8 }
 0xac9   :  { %6995 = vmatpush3.bf16.msra.mxu0 %v7935_v56 }
 0xacc   :  { %v6668_v12 = vpop.f32.mrb[20].mxu1 }
 0xacd   :  { %v1585_v25 = vmul.f32 0.17677669, %v6668_v12  ;;  %v1575_v13 = vpop.f32.mrb[21].mxu1 }
 0xace   :  { %v1584_v20 = vmul.f32 0.17677669, %v1575_v13 }
 0xacf   :  { %v1591_v22 = vadd.f32 %v8110_v9, %v1585_v25 }
 0xad0   :  { %v1590_v24 = vadd.f32 %v8110_v9, %v1584_v20 }
 0xad1   :  { %v1595_v27 = vsel %vm547_vm2, %v1591_v22, -inf }
 0xad2   :  { %1596 = vmax.xlane.f32.xlu0 %v1595_v27  ;;  %v1592_v26 = vsel %vm547_vm2, %v1590_v24, -inf }
 0xad3   :  { %1593 = vmax.xlane.f32.xlu1 %v1592_v26 }
 0xad4   :  { %v6682_v30 = vpop.f32.mrb[22].mxu1 }
 0xad5   :  { %v1778_v56 = vpop.f32.mrb[23].mxu1  ;;  %v1788_v59 = vmul.f32 0.17677669, %v6682_v30 }
 0xad6   :  { %v1787_v21 = vmul.f32 0.17677669, %v1778_v56 }
 0xad7   :  { %v1790_v32 = vadd.f32 %v1788_v59, %v8110_v9 }
 0xad8   :  { %v1789_v62 = vadd.f32 %v1787_v21, %v8110_v9 }
 0xad9   :  { %v1794_v28 = vsel %vm547_vm2, %v1790_v32, -inf }
 0xada   :  { %v1791_v41 = vsel %vm547_vm2, %v1789_v62, -inf }
 0xadb   :  { %1792 = vmax.xlane.f32.xlu0 %v1791_v41 }
 0xadf   :  { %1795 = vmax.xlane.f32.xlu0 %v1794_v28 }
 0xb5f   :  { %v1597_v18 = vpop.xlane.xlu0 %1596 }
 0xb60   :  { %v1599_v47 = vsub.f32 %v1591_v22, %v1597_v18  ;;  %v1594_v34 = vpop.xlane.xlu1 %1593 }
 0xb61   :  { %v1598_v35 = vsub.f32 %v1590_v24, %v1594_v34 }
 0xb62   :  { %v1602_v36 = vmul.f32 1.442695, %v1599_v47 }
 0xb63   :  { %v1600_v39 = vmul.f32 1.442695, %v1598_v35 }
 0xb64   :  { %7435 = vpow2.f32 %v1602_v36 }
 0xb65   :  { %7437 = vpow2.f32 %v1600_v39 }
 0xb68   :  { %v1793_v40 = vpop.xlane.xlu0 %1792 }
 0xb69   :  { %v1797_v43 = vsub.f32 %v1789_v62, %v1793_v40 }
 0xb6b   :  { %v1799_v31 = vmul.f32 1.442695, %v1797_v43 }
 0xb6c   :  { %v1796_v44 = vpop.xlane.xlu0 %1795 }
 0xb6d   :  { %7439 = vpow2.f32 %v1799_v31  ;;  %v1798_v45 = vsub.f32 %v1790_v32, %v1796_v44 }
 0xb6e   :  { %v7436_v48 = vpop.eup %7435 }
 0xb6f   :  { %v7438_v53 = vpop.eup %7437  ;;  %v1801_v0 = vmul.f32 1.442695, %v1798_v45  ;;  %v1607_v2 = vsel %vm547_vm2, %v7436_v48, 0.0 }
 0xb70   :  { %1608 = vadd.xlane.f32.xlu0 %v1607_v2  ;;  %v1604_v4 = vsel %vm547_vm2, %v7438_v53, 0.0 }
 0xb71   :  { %7441 = vpow2.f32 %v1801_v0  ;;  %1605 = vadd.xlane.f32.xlu1 %v1604_v4 }
 0xb77   :  { %v7440_v46 = vpop.eup %7439 }
 0xb78   :  { %v1803_v5 = vsel %vm547_vm2, %v7440_v46, 0.0 }
 0xb79   :  { %1804 = vadd.xlane.f32.xlu1 %v1803_v5 }
 0xb7b   :  { %v7442_v52 = vpop.eup %7441 }
 0xb7c   :  { %v1806_v6 = vsel %vm547_vm2, %v7442_v52, 0.0 }
 0xb7d   :  { %1807 = vadd.xlane.f32.xlu0 %v1806_v6 }
 0xb8a   :  { %7151 = vrot.lane.b32.xlu1 %v7937_v57, %s7648_s30 }
 0xb8e   :  { %1991 = vrot.lane.b32.xlu1 %v8062_v16, %s7644_s0 }
 0xb92   :  { %1993 = vrot.lane.b32.xlu1 %v8068_v19, %s7644_s0 }
 0xb93   :  { %7156 = vrot.lane.b32.xlu0 %v7943_v61, %s7644_s0 }
 0xb9b   :  { %v1488_v60 = vpop.f32.mrb[20].mxu0 }
 0xb9c   :  { %v8133_v7 = vadd.f32 %v1488_v60, %v8080_v37  ;;  %v6660_v8 = vpop.f32.mrb[21].mxu0 }
 0xb9d   :  { %v1491_v12 = vpop.f32.mrb[22].mxu0 }
 0xb9e   :  { %v8136_v25 = vadd.f32 %v1491_v12, %v8083_v42  ;;  %v6661_v13 = vpop.f32.mrb[23].mxu0 }
 0xbfd   :  { %v1609_v20 = vpop.xlane.xlu0 %1608 }
 0xbfe   :  { %7443 = vrcp.f32 %v1609_v20  ;;  %v1606_v22 = vpop.xlane.xlu1 %1605 }
 0xbff   :  { %7445 = vrcp.f32 %v1606_v22 }
 0xc06   :  { %v1805_v24 = vpop.xlane.xlu1 %1804 }
 0xc07   :  { %7447 = vrcp.f32 %v1805_v24 }
 0xc08   :  { %v7444_v27 = vpop.eup %7443 }
 0xc09   :  { %v7446_v26 = vpop.eup %7445  ;;  %v1613_v62 = vmul.f32 %v7444_v27, %v7436_v48 }
 0xc0a   :  { %v1808_v30 = vpop.xlane.xlu0 %1807  ;;  %v7152_v56 = vpop.permute.xlu1 %7151  ;;  %v1612_v59 = vmul.f32 %v7446_v26, %v7438_v53 }
 0xc0b   :  { %7449 = vrcp.f32 %v1808_v30  ;;  %v7154_v37 = vunpack.i.h.bf16 %v7152_v56  ;;  %v7153_v21 = vunpack.i.l.bf16 %v7152_v56 }
 0xc0c   :  { %6673 = vmatprep.mubr.msk.f32.mxu0 %vm547_vm2, %v1612_v59 }
 0xc0d   :  { %6674 = vmatmul.mubr.msk.f32.vlgmr.msra.gmra.mrb[24].mxu0 %vm547_vm2, %v1613_v62  ;;  %v7002_v42 = vpack.c.bf16 %v7154_v37, %v7153_v21 }
 0xc0e   :  { %v7157_v18 = vpop.permute.xlu0 %7156 }
 0xc0f   :  { %7003 = vmatprep.subr.bf16.mxu0 %v7002_v42  ;;  %v7159_v34 = vunpack.i.h.bf16 %v7157_v18  ;;  %v7158_v35 = vunpack.i.l.bf16 %v7157_v18 }
 0xc10   :  { %7005 = vmatpush3.bf16.msra.mxu0 %v7002_v42 }
 0xc11   :  { %v7448_v41 = vpop.eup %7447  ;;  %6690 = vmatprep.subr.bf16.mxu0 %v7649_v51  ;;  %v7006_v36 = vpack.c.bf16 %v7159_v34, %v7158_v35 }
 0xc12   :  { %v1811_v32 = vmul.f32 %v7448_v41, %v7440_v46 }
 0xc14   :  { %6687 = vmatprep.mubr.msk.f32.mxu0 %vm547_vm2, %v1811_v32 }
 0xc15   :  { %v7450_v28 = vpop.eup %7449 }
 0xc16   :  { %v1812_v47 = vmul.f32 %v7450_v28, %v7442_v52 }
 0xc18   :  { %6688 = vmatmul.mubr.msk.f32.vlgmr.msra.gmra.mrb[26].mxu0 %vm547_vm2, %v1812_v47 }
 0xc19   :  { %6691 = vmatpush3.bf16.msra.mxu0 %v7968_v50  ;;  %6694 = vmatprep.mubr.msk.bf16.mxu0 %vm7650_vm3, %v7649_v51  ;;  %v1992_v50 = vpop.permute.xlu1 %1991 }
 0xc1a   :  { %6692 = vmatprep.subr.bf16.mxu0 %v7649_v51 }
 0xc1d   :  { %6693 = vmatpush3.bf16.msra.mxu0 %v7975_v58  ;;  %v1994_v58 = vpop.permute.xlu1 %1993 }
 0xc1e   :  { %7008 = vmatprep.subr.msk.bf16.mxu0 %vm7906_vm1, %v7006_v36 }
 0xce0   :  { %v6675_v39 = vpop.f32.mrb[24].mxu0 }
 0xce1   :  { %v1686_v40 = vpop.f32.mrb[25].mxu0 }
 0xce2   :  { %v1695_v43 = vpack.c.bf16 %v6675_v39, %v1686_v40 }
 0xce4   :  { %6703 = vmatmul.mubr.msk.bf16.vlgmr.msra.gmra.mrb[24].mxu1 %vm451_vm0, %v1695_v43 }
 0xceb   :  { %v6689_v31 = vpop.f32.mrb[26].mxu0 }
 0xcec   :  { %v1893_v44 = vpop.f32.mrb[27].mxu0 }
 0xced   :  { %v1902_v45 = vpack.c.bf16 %v6689_v31, %v1893_v44 }
 0xcef   :  { %6695 = vmatmul.mubr.msk.bf16.vlgmr.msra.gmra.mrb[28].mxu0 %vm451_vm0, %v1902_v45 }
 0xcf0   :  { %7011 = vmatpush3.bf16.xpose.msk.msra.mxu0 %vm7906_vm1, %v7006_v36  ;;  %6710 = vmatprep.mubr.msk.f32.mxu0 %vm451_vm0, %v1992_v50 }
 0xcf1   :  { %6720 = vmatprep.subr.bf16.mxu0 %v7649_v51 }
 0xcf7   :  { %6711 = vmatmul.mubr.msk.f32.vlgmr.msra.gmra.mrb[32].mxu0 %vm451_vm0, %v1994_v58 }
 0xcf8   :  { %6721 = vmatpush3.bf16.msra.mxu0 %v8027_v33  ;;  %6724 = vmatprep.mubr.msk.bf16.mxu0 %vm7650_vm3, %v7649_v51 }
 0xcf9   :  { %6722 = vmatprep.subr.bf16.mxu0 %v7649_v51 }
 0xcfc   :  { %6723 = vmatpush3.bf16.msra.mxu0 %v8039_v49 }
 0xcfd   :  { %6742 = vmatprep.subr.bf16.mxu0 %v7649_v51 }
 0xdb7   :  { %v1984_v48 = vpop.f32.mrb[24].mxu1 }
 0xdb8   :  { %v6704_v53 = vpop.f32.mrb[25].mxu1 }
 0xdb9   :  { %v1987_v0 = vpop.f32.mrb[26].mxu1 }
 0xdba   :  { %v6705_v2 = vpop.f32.mrb[27].mxu1 }
 0xdc2   :  { %v1940_v4 = vpop.f32.mrb[28].mxu0 }
 0xdc3   :  { %v8163_v46 = vadd.f32 %v1984_v48, %v1940_v4  ;;  %v6696_v5 = vpop.f32.mrb[29].mxu0 }
 0xdc4   :  { %v1943_v52 = vpop.f32.mrb[30].mxu0 }
 0xdc5   :  { %v8165_v6 = vadd.f32 %v1987_v0, %v1943_v52  ;;  %v6697_v33 = vpop.f32.mrb[31].mxu0 }
 0xdca   :  { %v6712_v60 = vpop.f32.mrb[32].mxu0 }
 0xdcb   :  { %v2083_v8 = vmul.f32 0.17677669, %v6712_v60  ;;  %v2073_v12 = vpop.f32.mrb[33].mxu0 }
 0xdcc   :  { %v2082_v13 = vmul.f32 0.17677669, %v2073_v12 }
 0xdcd   :  { %v2085_v49 = vadd.f32 %v2083_v8, %v8110_v9 }
 0xdce   :  { %v2084_v20 = vadd.f32 %v2082_v13, %v8110_v9 }
 0xdcf   :  { %v2089_v22 = vsel %vm547_vm2, %v2085_v49, -inf }
 0xdd0   :  { %2090 = vmax.xlane.f32.xlu0 %v2089_v22  ;;  %v2086_v24 = vsel %vm547_vm2, %v2084_v20, -inf }
 0xdd1   :  { %2087 = vmax.xlane.f32.xlu1 %v2086_v24 }
 0xde2   :  { %7161 = vrot.lane.b32.xlu1 %v7937_v57, %s7644_s0 }
 0xde6   :  { %2242 = vrot.lane.b32.xlu1 %v8062_v16, %s7651_s1 }
 0xdea   :  { %2244 = vrot.lane.b32.xlu1 %v8068_v19, %s7651_s1 }
 0xe5d   :  { %v2091_v27 = vpop.xlane.xlu0 %2090 }
 0xe5e   :  { %v2093_v26 = vsub.f32 %v2085_v49, %v2091_v27  ;;  %v2088_v30 = vpop.xlane.xlu1 %2087 }
 0xe5f   :  { %v2092_v56 = vsub.f32 %v2084_v20, %v2088_v30  ;;  %v8204_v30 = vld [vmem:[%s8879_s7] ss:$0 sm:$0xff] }
 0xe60   :  { %v2096_v59 = vmul.f32 1.442695, %v2093_v26 }
 0xe61   :  { %v2094_v37 = vmul.f32 1.442695, %v2092_v56 }
 0xe62   :  { %7451 = vpow2.f32 %v2096_v59  ;;  %v7162_v21 = vpop.permute.xlu1 %7161  ;;  %v2500_v59 = vadd.f32 %v8204_v30, %v8133_v7 }
 0xe63   :  { %v7164_v62 = vunpack.i.h.bf16 %v7162_v21  ;;  %v7163_v42 = vunpack.i.l.bf16 %v7162_v21  ;;  %7453 = vpow2.f32 %v2094_v37  ;;  %v2501_v21 = vadd.f32 %v8204_v30, %v8136_v25 }
 0xe65   :  { %v7012_v41 = vpack.c.bf16 %v7164_v62, %v7163_v42  ;;  %v2504_v62 = vadd.f32 %v2500_v59, %v7851_v54  ;;  %v2505_v42 = vadd.f32 %v2501_v21, %v7853_v55 }
 0xe66   :  { %v2243_v45 = vpop.permute.xlu1 %2242 }
 0xe67   :  { %7013 = vmatprep.subr.bf16.mxu1 %v7012_v41 }
 0xe68   :  { %7015 = vmatpush3.bf16.msra.mxu1 %v7012_v41  ;;  %v7277_v41 = vld [vmem:[%s8882_s10 + $0x4] ss:$8 sps:$4 sm:$0xff]  }
 0xe6c   :  { %v7452_v32 = vpop.eup %7451 }
 0xe6d   :  { %v2101_v16 = vsel %vm547_vm2, %v7452_v32, 0.0  ;;  %v7454_v28 = vpop.eup %7453 }
 0xe6e   :  { %2102 = vadd.xlane.f32.xlu0 %v2101_v16  ;;  %v2098_v19 = vsel %vm547_vm2, %v7454_v28, 0.0 }
 0xe72   :  { %2099 = vadd.xlane.f32.xlu0 %v2098_v19 }
 0xe88   :  { %7166 = vrot.lane.b32.xlu0 %v7943_v61, %s7651_s1  ;;  %v2245_v61 = vpop.permute.xlu1 %2244 }
 0xefb   :  { %v2103_v18 = vpop.xlane.xlu0 %2102 }
 0xefc   :  { %7455 = vrcp.f32 %v2103_v18 }
 0xeff   :  { %v2100_v47 = vpop.xlane.xlu0 %2099 }
 0xf00   :  { %7457 = vrcp.f32 %v2100_v47 }
 0xf03   :  { %v7167_v34 = vpop.permute.xlu0 %7166 }
 0xf04   :  { %v7169_v35 = vunpack.i.h.bf16 %v7167_v34  ;;  %v7168_v36 = vunpack.i.l.bf16 %v7167_v34 }
 0xf06   :  { %v7016_v39 = vpack.c.bf16 %v7169_v35, %v7168_v36  ;;  %v7456_v40 = vpop.eup %7455 }
 0xf07   :  { %v2107_v44 = vmul.f32 %v7456_v40, %v7452_v32 }
 0xf08   :  { %7018 = vmatprep.subr.msk.bf16.mxu1 %vm7906_vm1, %v7016_v39 }
 0xf0a   :  { %v7458_v43 = vpop.eup %7457 }
 0xf0b   :  { %v2106_v31 = vmul.f32 %v7458_v43, %v7454_v28 }
 0xf0d   :  { %6717 = vmatprep.mubr.msk.f32.mxu1 %vm547_vm2, %v2106_v31 }
 0xf0e   :  { %6718 = vmatmul.mubr.msk.f32.vlgmr.msra.gmra.mrb[28].mxu1 %vm547_vm2, %v2107_v44 }
 0xf0f   :  { %7021 = vmatpush3.bf16.xpose.msk.msra.mxu1 %vm7906_vm1, %v7016_v39  ;;  %6732 = vmatprep.mubr.msk.f32.mxu1 %vm451_vm0, %v2243_v45 }
 0xf16   :  { %6733 = vmatmul.mubr.msk.f32.vlgmr.msra.gmra.mrb[30].mxu1 %vm451_vm0, %v2245_v61  ;;  %v7280_v61 = vld [vmem:[%s8882_s10 + $0x14] ss:$8 sps:$4 sm:$0xff]  }
 0xfe1   :  { %v6719_v50 = vpop.f32.mrb[28].mxu1 }
 0xfe2   :  { %v2186_v58 = vpop.f32.mrb[29].mxu1 }
 0xfe3   :  { %v2195_v48 = vpack.c.bf16 %v6719_v50, %v2186_v58  ;;  %v7278_v50 = vld [vmem:[%s8882_s10 + $0x10] ss:$8 sps:$4 sm:$0xff]   ;;  %v7283_v58 = vld [vmem:[%s8882_s10 + $0x24] ss:$8 sps:$4 sm:$0xff]  }
 0xfe5   :  { %6725 = vmatmul.mubr.msk.bf16.vlgmr.msra.gmra.mrb[36].mxu0 %vm451_vm0, %v2195_v48  ;;  %v7281_v48 = vld [vmem:[%s8882_s10 + $0x20] ss:$8 sps:$4 sm:$0xff]  }
 0xfe6   :  { %6743 = vmatpush3.bf16.msra.mxu0 %v8043_v1  ;;  %6746 = vmatprep.mubr.msk.bf16.mxu0 %vm7650_vm3, %v7649_v51 }
 0xfe7   :  { %6744 = vmatprep.subr.bf16.mxu0 %v7649_v51 }
 0xfe9   :  { %v6734_v53 = vpop.f32.mrb[30].mxu1 }
 0xfea   :  { %v2334_v0 = vmul.f32 0.17677669, %v6734_v53  ;;  %v2324_v2 = vpop.f32.mrb[31].mxu1  ;;  %6745 = vmatpush3.bf16.msra.mxu0 %v8047_v3  ;;  %v7286_v53 = vld [vmem:[%s8882_s10 + $0x34] ss:$8 sps:$4 sm:$0xff]  }
 0xfeb   :  { %v2333_v4 = vmul.f32 0.17677669, %v2324_v2  ;;  %v7289_v2 = vld [vmem:[%s8882_s10 + $0x44] ss:$8 sps:$4 sm:$0xff]  }
 0xfec   :  { %v2336_v5 = vadd.f32 %v2334_v0, %v8110_v9  ;;  %v7284_v0 = vld [vmem:[%s8882_s10 + $0x30] ss:$8 sps:$4 sm:$0xff]  }
 0xfed   :  { %v2335_v52 = vadd.f32 %v2333_v4, %v8110_v9  ;;  %v7287_v4 = vld [vmem:[%s8882_s10 + $0x40] ss:$8 sps:$4 sm:$0xff]  }
 0xfee   :  { %v2340_v33 = vsel %vm547_vm2, %v2336_v5, -inf }
 0xfef   :  { %2341 = vmax.xlane.f32.xlu0 %v2340_v33  ;;  %v2337_v1 = vsel %vm547_vm2, %v2335_v52, -inf  ;;  %v7295_v33 = vld [vmem:[%s8882_s10 + $0x64] ss:$8 sps:$4 sm:$0xff]  }
 0xff0   :  { %2338 = vmax.xlane.f32.xlu1 %v2337_v1  ;;  %v7293_v1 = vld [vmem:[%s8882_s10 + $0x60] ss:$8 sps:$4 sm:$0xff]  }
0x1001   :  { %7171 = vrot.lane.b32.xlu1 %v7937_v57, %s7651_s1 }
0x107c   :  { %v2342_v60 = vpop.xlane.xlu0 %2341 }
0x107d   :  { %v2344_v8 = vsub.f32 %v2336_v5, %v2342_v60  ;;  %v2339_v12 = vpop.xlane.xlu1 %2338  ;;  %v7292_v5 = vld [vmem:[%s8882_s10 + $0x54] ss:$8 sps:$4 sm:$0xff]  }
0x107e   :  { %v2343_v13 = vsub.f32 %v2335_v52, %v2339_v12  ;;  %v7290_v52 = vld [vmem:[%s8882_s10 + $0x50] ss:$8 sps:$4 sm:$0xff]   ;;  %v7298_v60 = vld [vmem:[%s8882_s10 + $0x74] ss:$8 sps:$4 sm:$0xff]  }
0x107f   :  { %v2347_v49 = vmul.f32 1.442695, %v2344_v8  ;;  %v7296_v8 = vld [vmem:[%s8882_s10 + $0x70] ss:$8 sps:$4 sm:$0xff]  }
0x1080   :  { %v2345_v3 = vmul.f32 1.442695, %v2343_v13 }
0x1081   :  { %v7172_v20 = vpop.permute.xlu1 %7171 }
0x1082   :  { %7459 = vpow2.f32 %v2345_v3  ;;  %v7174_v22 = vunpack.i.h.bf16 %v7172_v20  ;;  %v7173_v24 = vunpack.i.l.bf16 %v7172_v20 }
0x1083   :  { %7461 = vpow2.f32 %v2347_v49 }
0x1084   :  { %v7022_v27 = vpack.c.bf16 %v7174_v22, %v7173_v24 }
0x1086   :  { %7023 = vmatprep.subr.bf16.mxu1 %v7022_v27 }
0x1087   :  { %7025 = vmatpush3.bf16.msra.mxu1 %v7022_v27 }
0x1088   :  { %2684 = vmatprep.subr.bf16.mxu1 %v7277_v41 }
0x108c   :  { %v7460_v26 = vpop.eup %7459 }
0x108d   :  { %v2349_v57 = vsel %vm547_vm2, %v7460_v26, 0.0  ;;  %v7462_v56 = vpop.eup %7461 }
0x108e   :  { %2350 = vadd.xlane.f32.xlu0 %v2349_v57  ;;  %v2352_v37 = vsel %vm547_vm2, %v7462_v56, 0.0 }
0x1092   :  { %2353 = vadd.xlane.f32.xlu0 %v2352_v37  ;;  %v8280_v37 = vld [vmem:[%s8881_s9] ss:$0 sm:$0xff] }
0x1096   :  { %2510 = vadd.xlane.f32.xlu0 %v2504_v62 }
0x109a   :  { %2512 = vadd.xlane.f32.xlu0 %v2505_v42 }
0x10b8   :  { %v2233_v32 = vpop.f32.mrb[36].mxu0 }
0x10b9   :  { %v8218_v7 = vadd.f32 %v2233_v32, %v8163_v46  ;;  %v6726_v16 = vpop.f32.mrb[37].mxu0 }
0x10ba   :  { %v2236_v28 = vpop.f32.mrb[38].mxu0 }
0x10bb   :  { %v8221_v19 = vadd.f32 %v2236_v28, %v8165_v6  ;;  %v6727_v25 = vpop.f32.mrb[39].mxu0  ;;  %v7275_v6 = vld [vmem:[%s8882_s10] ss:$8 sps:$4 sm:$0xff]  }
0x10bc   :  { %v7299_v25 = vld [vmem:[#allocation4 + $0x40] sm:$0xff]  }
0x10bd   :  { %6400 = vmatprep.subr.bf16.mxu0 %v7299_v25 }
0x111b   :  { %v2351_v54 = vpop.xlane.xlu0 %2350 }
0x111c   :  { %7463 = vrcp.f32 %v2351_v54  ;;  %v7300_v54 = vld [vmem:[#allocation4] sm:$0xff]  }
0x111f   :  { %v2354_v18 = vpop.xlane.xlu0 %2353 }
0x1120   :  { %7465 = vrcp.f32 %v2354_v18  ;;  %v7301_v18 = vld [vmem:[#allocation4 + $0x48] sm:$0xff]  }
0x1123   :  { %v2511_v55 = vpop.xlane.xlu0 %2510 }
0x1124   :  { %v2518_v47 = vmul.f32 0.0078125, %v2511_v55  ;;  %v7302_v55 = vld [vmem:[#allocation4 + $0x8] sm:$0xff]  }
0x1126   :  { %v7464_v34 = vpop.eup %7463  ;;  %v2522_v35 = vsub.f32 %v2504_v62, %v2518_v47  ;;  %v7303_v47 = vld [vmem:[#allocation4 + $0x50] sm:$0xff]  }
0x1127   :  { %v2513_v36 = vpop.xlane.xlu0 %2512  ;;  %v2357_v39 = vmul.f32 %v7464_v34, %v7460_v26  ;;  %v8274_v26 = vld [vmem:[%s8880_s8] ss:$0 sm:$0xff]  ;;  %v7304_v34 = vld [vmem:[#allocation4 + $0x10] sm:$0xff]  }
0x1128   :  { %v2519_v40 = vmul.f32 0.0078125, %v2513_v36  ;;  %v2526_v43 = vmul.f32 %v2522_v35, %v2522_v35  ;;  %v7306_v36 = vld [vmem:[#allocation4 + $0x18] sm:$0xff]  }
0x1129   :  { %6739 = vmatprep.mubr.msk.f32.mxu1 %vm547_vm2, %v2357_v39  ;;  %v7307_v39 = vld [vmem:[#allocation4 + $0x60] sm:$0xff]  }
0x112a   :  { %v7466_v46 = vpop.eup %7465  ;;  %v2523_v31 = vsub.f32 %v2505_v42, %v2519_v40  ;;  %2530 = vadd.xlane.f32.xlu0 %v2526_v43  ;;  %v7308_v40 = vld [vmem:[#allocation4 + $0x20] sm:$0xff]   ;;  %v7309_v43 = vld [vmem:[#allocation4 + $0x68] sm:$0xff]  }
0x112b   :  { %v2358_v44 = vmul.f32 %v7466_v46, %v7462_v56  ;;  %v7310_v46 = vld [vmem:[#allocation4 + $0x28] sm:$0xff]  }
0x112c   :  { %v2527_v45 = vmul.f32 %v2523_v31, %v2523_v31 }
0x112d   :  { %6740 = vmatmul.mubr.msk.f32.vlgmr.msra.gmra.mrb[32].mxu1 %vm547_vm2, %v2358_v44  ;;  %v7313_v44 = vld [vmem:[#allocation4 + $0x78] sm:$0xff]  }
0x112e   :  { %2532 = vadd.xlane.f32.xlu0 %v2527_v45  ;;  %2685 = vmatpush1.bf16.msra.mxu1 %v7275_v6  ;;  %v7312_v6 = vld [vmem:[#allocation4 + $0x30] sm:$0xff]   ;;  %v7314_v45 = vld [vmem:[#allocation4 + $0x38] sm:$0xff]  }
0x112f   :  { %2716 = vmatprep.mubr.bf16.mxu1 %v7647_v23  ;;  %2686 = vmatprep.subr.bf16.mxu1 %v7280_v61  ;;  %v2592_v61 = vld [vmem:[%s8883_s11] sm:$0x3] }
0x1132   :  { %2687 = vmatpush1.bf16.msra.mxu1 %v7278_v50  ;;  %v8297_v50 = vrot.slane %v2592_v61, %v7882_v15 }
0x1133   :  { %2688 = vmatprep.subr.bf16.mxu1 %v7283_v58  ;;  %v8300_v58 = vrot.slane %v2592_v61, %v7888_v17 }
0x1136   :  { %2689 = vmatpush1.bf16.msra.mxu1 %v7281_v48 }
0x1137   :  { %2690 = vmatprep.subr.bf16.mxu1 %v7286_v53 }
0x113a   :  { %2691 = vmatpush1.bf16.msra.mxu1 %v7284_v0 }
0x113b   :  { %2692 = vmatprep.subr.bf16.mxu1 %v7289_v2 }
0x113e   :  { %2693 = vmatpush1.bf16.msra.mxu1 %v7287_v4 }
0x113f   :  { %2694 = vmatprep.subr.bf16.mxu1 %v7292_v5 }
0x1142   :  { %2695 = vmatpush1.bf16.msra.mxu1 %v7290_v52 }
0x1143   :  { %2696 = vmatprep.subr.bf16.mxu1 %v7295_v33 }
0x1146   :  { %2697 = vmatpush1.bf16.msra.mxu1 %v7293_v1 }
0x1147   :  { %2698 = vmatprep.subr.bf16.mxu1 %v7298_v60 }
0x114a   :  { %2699 = vmatpush1.bf16.msra.mxu1 %v7296_v8 }
0x11b7   :  { %v2531_v12 = vpop.xlane.xlu0 %2530 }
0x11b8   :  { %v2538_v13 = vmul.f32 0.0078125, %v2531_v12 }
0x11ba   :  { %v2542_v49 = vadd.f32 1e-05, %v2538_v13 }
0x11bb   :  { %v2533_v3 = vpop.xlane.xlu0 %2532 }
0x11bc   :  { %7467 = vrsqrt.f32 %v2542_v49  ;;  %v2539_v20 = vmul.f32 0.0078125, %v2533_v3 }
0x11be   :  { %v2543_v22 = vadd.f32 1e-05, %v2539_v20 }
0x11c0   :  { %7469 = vrsqrt.f32 %v2543_v22 }
0x11c6   :  { %v7468_v24 = vpop.eup %7467 }
0x11c7   :  { %v2550_v27 = vmul.f32 %v7468_v24, %v2522_v35  ;;  %v7305_v35 = vld [vmem:[#allocation4 + $0x58] sm:$0xff]  }
0x11c9   :  { %v2560_v59 = vmul.f32 %v8274_v26, %v2550_v27 }
0x11ca   :  { %v7470_v57 = vpop.eup %7469 }
0x11cb   :  { %v2551_v56 = vmul.f32 %v7470_v57, %v2523_v31  ;;  %v8284_v62 = vadd.f32 %v8280_v37, %v2560_v59  ;;  %v7311_v31 = vld [vmem:[#allocation4 + $0x70] sm:$0xff]  }
0x11cd   :  { %v2561_v21 = vmul.f32 %v8274_v26, %v2551_v56 }
0x11cf   :  { %v8287_v42 = vadd.f32 %v8280_v37, %v2561_v21 }
0x11d1   :  { %v2590_v41 = vpack.c.bf16 %v8287_v42, %v8284_v62 }
0x11d3   :  { %2717 = vmatmul.mubr.bf16.vlgmr.msra.gmra.mrb[36].mxu1 %v2590_v41 }
0x11d4   :  { %2726 = vmatprep.mubr.bf16.mxu1 %v7647_v23 }
0x1200   :  { %v6741_v32 = vpop.f32.mrb[32].mxu1 }
0x1201   :  { %v2437_v16 = vpop.f32.mrb[33].mxu1 }
0x1202   :  { %v2446_v28 = vpack.c.bf16 %v6741_v32, %v2437_v16 }
0x1204   :  { %6747 = vmatmul.mubr.msk.bf16.vlgmr.msra.gmra.mrb[40].mxu0 %vm451_vm0, %v2446_v28 }
0x1205   :  { %6401 = vmatpush3.bf16.msra.mxu0 %v7300_v54 }
0x1206   :  { %6402 = vmatprep.subr.bf16.mxu0 %v7301_v18 }
0x1209   :  { %6403 = vmatpush3.bf16.msra.mxu0 %v7302_v55 }
0x120a   :  { %6404 = vmatprep.subr.bf16.mxu0 %v7303_v47 }
0x120d   :  { %6405 = vmatpush3.bf16.msra.mxu0 %v7304_v34 }
0x120e   :  { %6406 = vmatprep.subr.bf16.mxu0 %v7305_v35 }
0x1211   :  { %6407 = vmatpush3.bf16.msra.mxu0 %v7306_v36 }
0x1212   :  { %6408 = vmatprep.subr.bf16.mxu0 %v7307_v39 }
0x1215   :  { %6409 = vmatpush3.bf16.msra.mxu0 %v7308_v40 }
0x1216   :  { %6410 = vmatprep.subr.bf16.mxu0 %v7309_v43 }
0x1219   :  { %6411 = vmatpush3.bf16.msra.mxu0 %v7310_v46 }
0x121a   :  { %6412 = vmatprep.subr.bf16.mxu0 %v7311_v31 }
0x121d   :  { %6413 = vmatpush3.bf16.msra.mxu0 %v7312_v6 }
0x121e   :  { %6414 = vmatprep.subr.bf16.mxu0 %v7313_v44 }
0x1221   :  { %6415 = vmatpush3.bf16.msra.mxu0 %v7314_v45 }
0x12a6   :  { %v2718_v48 = vpop.f32.mrb[36].mxu1 }
0x12a7   :  { %v2719_v53 = vadd.f32 %v2718_v48, %v8297_v50  ;;  %v2720_v0 = vpop.f32.mrb[37].mxu1 }
0x12a8   :  { %v2721_v2 = vadd.f32 %v2720_v0, %v8300_v58  ;;  %v2722_v4 = vpop.f32.mrb[38].mxu1 }
0x12a9   :  { %v2737_v5 = vmul.f32 %v2719_v53, %v2719_v53  ;;  %v2723_v52 = vadd.f32 %v2722_v4, %v8297_v50  ;;  %v2724_v33 = vpop.f32.mrb[39].mxu1 }
0x12aa   :  { %v2738_v1 = vmul.f32 %v2721_v2, %v2721_v2  ;;  %v2725_v60 = vadd.f32 %v2724_v33, %v8300_v58 }
0x12ab   :  { %v2745_v8 = vmul.f32 %v2737_v5, %v2719_v53  ;;  %v2739_v12 = vmul.f32 %v2723_v52, %v2723_v52 }
0x12ac   :  { %v2746_v13 = vmul.f32 %v2738_v1, %v2721_v2  ;;  %v2740_v49 = vmul.f32 %v2725_v60, %v2725_v60 }
0x12ad   :  { %v2753_v3 = vmul.f32 0.044715, %v2745_v8  ;;  %v2747_v20 = vmul.f32 %v2739_v12, %v2723_v52 }
0x12ae   :  { %v2754_v22 = vmul.f32 0.044715, %v2746_v13  ;;  %v2748_v24 = vmul.f32 %v2740_v49, %v2725_v60 }
0x12af   :  { %v2761_v27 = vadd.f32 %v2753_v3, %v2719_v53  ;;  %v2755_v57 = vmul.f32 0.044715, %v2747_v20 }
0x12b0   :  { %v2762_v56 = vadd.f32 %v2754_v22, %v2721_v2  ;;  %v2756_v59 = vmul.f32 0.044715, %v2748_v24 }
0x12b1   :  { %v2769_v21 = vmul.f32 0.7978846, %v2761_v27  ;;  %v2763_v41 = vadd.f32 %v2755_v57, %v2723_v52 }
0x12b2   :  { %v2770_v32 = vmul.f32 0.7978846, %v2762_v56  ;;  %v2764_v16 = vadd.f32 %v2756_v59, %v2725_v60 }
0x12b3   :  { %7471 = vtanh.f32 %v2769_v21  ;;  %v2771_v28 = vmul.f32 0.7978846, %v2763_v41 }
0x12b4   :  { %7473 = vtanh.f32 %v2770_v32  ;;  %v2772_v25 = vmul.f32 0.7978846, %v2764_v16 }
0x12b5   :  { %7475 = vtanh.f32 %v2771_v28  ;;  %v7315_v28 = vld [vmem:[%s8876_s4 + $0xc0] ss:$12 sps:$4 sm:$0xff]  }
0x12b6   :  { %7477 = vtanh.f32 %v2772_v25  ;;  %v7317_v25 = vld [vmem:[%s8876_s4 + $0xc4] ss:$12 sps:$4 sm:$0xff]  }
0x12b7   :  { %3248 = vmatprep.subr.bf16.mxu1 %v7317_v25  ;;  %v8401_v25 = vld [vmem:[%s8886_s14] ss:$0 sm:$0xff] }
0x12b8   :  { %3249 = vmatpush1.bf16.msra.mxu1 %v7315_v28 }
0x12bd   :  { %v7472_v54 = vpop.eup %7471 }
0x12be   :  { %v7474_v18 = vpop.eup %7473  ;;  %v2785_v55 = vadd.f32 1.0, %v7472_v54  ;;  %v7320_v54 = vld [vmem:[%s8876_s4 + $0xdc] ss:$12 sps:$4 sm:$0xff]  }
0x12bf   :  { %v7476_v47 = vpop.eup %7475  ;;  %v2786_v34 = vadd.f32 1.0, %v7474_v18  ;;  %3250 = vmatprep.subr.bf16.mxu1 %v7320_v54 }
0x12c0   :  { %v7478_v35 = vpop.eup %7477  ;;  %v2793_v36 = vmul.f32 0.5, %v2785_v55  ;;  %v2787_v39 = vadd.f32 1.0, %v7476_v47 }
0x12c1   :  { %v2788_v40 = vadd.f32 1.0, %v7478_v35  ;;  %v2794_v43 = vmul.f32 0.5, %v2786_v34 }
0x12c2   :  { %v2795_v46 = vmul.f32 0.5, %v2787_v39  ;;  %v2801_v6 = vmul.f32 %v2793_v36, %v2719_v53 }
0x12c3   :  { %v2796_v31 = vmul.f32 0.5, %v2788_v40  ;;  %v2802_v45 = vmul.f32 %v2794_v43, %v2721_v2 }
0x12c4   :  { %v2803_v44 = vmul.f32 %v2795_v46, %v2723_v52 }
0x12c5   :  { %v2804_v61 = vmul.f32 %v2796_v31, %v2725_v60 }
0x12c6   :  { %v2841_v48 = vpack.c.bf16 %v2803_v44, %v2801_v6 }
0x12c7   :  { %v2842_v0 = vpack.c.bf16 %v2804_v61, %v2802_v45 }
0x12c9   :  { %2980 = vmatprep.mubr.bf16.mxu0 %v2842_v0 }
0x12ca   :  { %2981 = vmatmul.mubr.bf16.vlgmr.msra.gmra.mrb[44].mxu0 %v2841_v48 }
0x12d7   :  { %v2484_v4 = vpop.f32.mrb[40].mxu0 }
0x12d8   :  { %v2491_v5 = vadd.f32 %v2484_v4, %v8218_v7  ;;  %v6748_v33 = vpop.f32.mrb[41].mxu0 }
0x12d9   :  { %v2487_v1 = vpop.f32.mrb[42].mxu0 }
0x12da   :  { %v2502_v8 = vadd.f32 %v8204_v30, %v2491_v5  ;;  %v2492_v12 = vadd.f32 %v2487_v1, %v8221_v19  ;;  %v6749_v13 = vpop.f32.mrb[43].mxu0 }
0x12db   :  { %v7324_v13 = vld [vmem:[%s8876_s4 + $0x108] ss:$12 sps:$4 sm:$0xff]  }
0x12dc   :  { %v2503_v49 = vadd.f32 %v8204_v30, %v2492_v12  ;;  %v2506_v53 = vadd.f32 %v2502_v8, %v7873_v10  ;;  %v8315_v30 = vld [vmem:[%s8885_s13] ss:$0 sm:$0xff]  ;;  %v7321_v8 = vld [vmem:[%s8876_s4 + $0xf0] ss:$12 sps:$4 sm:$0xff]   ;;  %v7326_v12 = vld [vmem:[%s8876_s4 + $0x10c] ss:$12 sps:$4 sm:$0xff]  }
0x12de   :  { %2514 = vadd.xlane.f32.xlu1 %v2506_v53  ;;  %v2507_v2 = vadd.f32 %v2503_v49, %v7875_v11  ;;  %v7329_v49 = vld [vmem:[%s8876_s4 + $0x124] ss:$12 sps:$4 sm:$0xff]  }
0x12e0   :  { %2516 = vadd.xlane.f32.xlu0 %v2507_v2 }
0x136b   :  { %v2515_v52 = vpop.xlane.xlu1 %2514 }
0x136c   :  { %v2520_v60 = vmul.f32 0.0078125, %v2515_v52  ;;  %v7330_v52 = vld [vmem:[%s8876_s4 + $0x138] ss:$12 sps:$4 sm:$0xff]  }
0x136d   :  { %v2517_v3 = vpop.xlane.xlu0 %2516 }
0x136e   :  { %v2524_v20 = vsub.f32 %v2506_v53, %v2520_v60  ;;  %v2521_v7 = vmul.f32 0.0078125, %v2517_v3  ;;  %v7327_v53 = vld [vmem:[%s8876_s4 + $0x120] ss:$12 sps:$4 sm:$0xff]   ;;  %v7333_v3 = vld [vmem:[%s8876_s4 + $0x150] ss:$12 sps:$4 sm:$0xff]  }
0x136f   :  { %v7335_v60 = vld [vmem:[%s8876_s4 + $0x154] ss:$12 sps:$4 sm:$0xff]  }
0x1370   :  { %v2525_v22 = vsub.f32 %v2507_v2, %v2521_v7  ;;  %v2528_v24 = vmul.f32 %v2524_v20, %v2524_v20  ;;  %v7332_v2 = vld [vmem:[%s8876_s4 + $0x13c] ss:$12 sps:$4 sm:$0xff]   ;;  %v7338_v7 = vld [vmem:[%s8876_s4 + $0x16c] ss:$12 sps:$4 sm:$0xff]  }
0x1372   :  { %2534 = vadd.xlane.f32.xlu0 %v2528_v24  ;;  %v2529_v27 = vmul.f32 %v2525_v22, %v2525_v22  ;;  %v7340_v24 = vld [vmem:[%s8876_s4 + $0xe0] ss:$12 sps:$4 sm:$0xff]  }
0x1376   :  { %2536 = vadd.xlane.f32.xlu0 %v2529_v27  ;;  %v7341_v27 = vld [vmem:[%s8876_s4 + $0xf8] ss:$12 sps:$4 sm:$0xff]  }
0x139d   :  { %v6416_v19 = vpop.f32.mrb[44].mxu0 }
0x139e   :  { %v6417_v10 = vpop.f32.mrb[45].mxu0 }
0x139f   :  { %v6418_v57 = vadd.f32 %v6417_v10, %v6416_v19  ;;  %v6419_v11 = vpop.f32.mrb[46].mxu0  ;;  %v7342_v19 = vld [vmem:[%s8876_s4 + $0x110] ss:$12 sps:$4 sm:$0xff]   ;;  %v7343_v10 = vld [vmem:[%s8876_s4 + $0x128] ss:$12 sps:$4 sm:$0xff]  }
0x13a0   :  { %v6420_v56 = vpop.f32.mrb[47].mxu0 }
0x13a1   :  { %v2983_v59 = vadd.f32 %v6418_v57, %v8315_v30  ;;  %v6421_v21 = vadd.f32 %v6420_v56, %v6419_v11  ;;  %v7344_v57 = vld [vmem:[%s8876_s4 + $0x140] ss:$12 sps:$4 sm:$0xff]  }
0x13a3   :  { %v2986_v41 = vadd.f32 %v6421_v21, %v8315_v30  ;;  %v2997_v32 = vadd.f32 %v2983_v59, %v8284_v62  ;;  %v7318_v62 = vld [vmem:[%s8876_s4 + $0xd8] ss:$12 sps:$4 sm:$0xff]  }
0x13a4   :  { %3251 = vmatpush1.bf16.msra.mxu1 %v7318_v62 }
0x13a5   :  { %3003 = vadd.xlane.f32.xlu0 %v2997_v32  ;;  %v2998_v16 = vadd.f32 %v2986_v41, %v8287_v42 }
0x13a9   :  { %3005 = vadd.xlane.f32.xlu0 %v2998_v16 }
0x13ff   :  { %v2535_v42 = vpop.xlane.xlu0 %2534 }
0x1400   :  { %v2540_v18 = vmul.f32 0.0078125, %v2535_v42 }
0x1402   :  { %v2544_v55 = vadd.f32 1e-05, %v2540_v18  ;;  %v8407_v18 = vld [vmem:[%s8887_s15] ss:$0 sm:$0xff] }
0x1403   :  { %v2537_v47 = vpop.xlane.xlu0 %2536 }
0x1404   :  { %7479 = vrsqrt.f32 %v2544_v55  ;;  %v2541_v34 = vmul.f32 0.0078125, %v2537_v47 }
0x1406   :  { %v2545_v35 = vadd.f32 1e-05, %v2541_v34 }
0x1408   :  { %7481 = vrsqrt.f32 %v2545_v35 }
0x140e   :  { %v7480_v36 = vpop.eup %7479 }
0x140f   :  { %v2552_v39 = vmul.f32 %v7480_v36, %v2524_v20  ;;  %v7336_v20 = vld [vmem:[%s8876_s4 + $0x168] ss:$12 sps:$4 sm:$0xff]  }
0x1411   :  { %v2562_v46 = vmul.f32 %v8274_v26, %v2552_v39 }
0x1412   :  { %v7482_v40 = vpop.eup %7481 }
0x1413   :  { %v2553_v43 = vmul.f32 %v7482_v40, %v2525_v22  ;;  %v8336_v6 = vadd.f32 %v8280_v37, %v2562_v46  ;;  %v7339_v22 = vld [vmem:[%s8876_s4 + $0xc8] ss:$12 sps:$4 sm:$0xff]  }
0x1414   :  { %6750 = vmatprep.subr.bf16.mxu0 %v7339_v22 }
0x1415   :  { %v2563_v31 = vmul.f32 %v8274_v26, %v2553_v43  ;;  %6751 = vmatpush3.bf16.msra.mxu0 %v7339_v22 }
0x1416   :  { %6752 = vmatprep.subr.bf16.mxu0 %v7340_v24 }
0x1417   :  { %v8339_v44 = vadd.f32 %v8280_v37, %v2563_v31  ;;  %v7323_v37 = vld [vmem:[%s8876_s4 + $0xf4] ss:$12 sps:$4 sm:$0xff]  }
0x1418   :  { %3252 = vmatprep.subr.bf16.mxu1 %v7323_v37 }
0x1419   :  { %v2591_v45 = vpack.c.bf16 %v8339_v44, %v8336_v6  ;;  %3253 = vmatpush1.bf16.msra.mxu1 %v7321_v8  ;;  %6753 = vmatpush3.bf16.msra.mxu0 %v7340_v24 }
0x141a   :  { %3254 = vmatprep.subr.bf16.mxu1 %v7326_v12  ;;  %6754 = vmatprep.subr.bf16.mxu0 %v7341_v27 }
0x141b   :  { %2727 = vmatmul.mubr.bf16.gmra.mrb[40].mxu1 %v2591_v45 }
0x141c   :  { %3280 = vmatprep.mubr.bf16.mxu1 %v7647_v23 }
0x141d   :  { %3255 = vmatpush1.bf16.msra.mxu1 %v7324_v13  ;;  %6755 = vmatpush3.bf16.msra.mxu0 %v7341_v27 }
0x141e   :  { %3256 = vmatprep.subr.bf16.mxu1 %v7329_v49  ;;  %6756 = vmatprep.subr.bf16.mxu0 %v7342_v19 }
0x1421   :  { %3257 = vmatpush1.bf16.msra.mxu1 %v7327_v53  ;;  %6757 = vmatpush3.bf16.msra.mxu0 %v7342_v19 }
0x1422   :  { %3258 = vmatprep.subr.bf16.mxu1 %v7332_v2  ;;  %6758 = vmatprep.subr.bf16.mxu0 %v7343_v10 }
0x1425   :  { %3259 = vmatpush1.bf16.msra.mxu1 %v7330_v52  ;;  %6759 = vmatpush3.bf16.msra.mxu0 %v7343_v10 }
0x1426   :  { %3260 = vmatprep.subr.bf16.mxu1 %v7335_v60  ;;  %6760 = vmatprep.subr.bf16.mxu0 %v7344_v57 }
0x1429   :  { %3261 = vmatpush1.bf16.msra.mxu1 %v7333_v3  ;;  %6761 = vmatpush3.bf16.msra.mxu0 %v7344_v57 }
0x142a   :  { %3262 = vmatprep.subr.bf16.mxu1 %v7338_v7 }
0x142d   :  { %3263 = vmatpush1.bf16.msra.mxu1 %v7336_v20 }
0x1432   :  { %v3004_v61 = vpop.xlane.xlu0 %3003 }
0x1433   :  { %v3011_v48 = vmul.f32 0.0078125, %v3004_v61 }
0x1435   :  { %v3015_v0 = vsub.f32 %v2997_v32, %v3011_v48 }
0x1436   :  { %v3006_v4 = vpop.xlane.xlu0 %3005 }
0x1437   :  { %v3012_v5 = vmul.f32 0.0078125, %v3006_v4  ;;  %v3019_v33 = vmul.f32 %v3015_v0, %v3015_v0 }
0x1439   :  { %v3016_v1 = vsub.f32 %v2998_v16, %v3012_v5  ;;  %3023 = vadd.xlane.f32.xlu0 %v3019_v33 }
0x143b   :  { %v3020_v26 = vmul.f32 %v3016_v1, %v3016_v1 }
0x143d   :  { %3025 = vadd.xlane.f32.xlu0 %v3020_v26 }
0x14c6   :  { %v3024_v11 = vpop.xlane.xlu0 %3023 }
0x14c7   :  { %v3031_v56 = vmul.f32 0.0078125, %v3024_v11 }
0x14c9   :  { %v3035_v59 = vadd.f32 1e-05, %v3031_v56 }
0x14ca   :  { %v3026_v21 = vpop.xlane.xlu0 %3025 }
0x14cb   :  { %7483 = vrsqrt.f32 %v3035_v59  ;;  %v3032_v41 = vmul.f32 0.0078125, %v3026_v21 }
0x14cd   :  { %v3036_v32 = vadd.f32 1e-05, %v3032_v41 }
0x14cf   :  { %7485 = vrsqrt.f32 %v3036_v32 }
0x14d5   :  { %v7484_v16 = vpop.eup %7483 }
0x14d6   :  { %v3043_v28 = vmul.f32 %v7484_v16, %v3015_v0 }
0x14d8   :  { %v3053_v62 = vmul.f32 %v8401_v25, %v3043_v28 }
0x14d9   :  { %v7486_v54 = vpop.eup %7485 }
0x14da   :  { %v3044_v42 = vmul.f32 %v7486_v54, %v3016_v1  ;;  %v8411_v47 = vadd.f32 %v8407_v18, %v3053_v62 }
0x14dc   :  { %v3054_v55 = vmul.f32 %v8401_v25, %v3044_v42 }
0x14de   :  { %v8414_v34 = vadd.f32 %v8407_v18, %v3054_v55  ;;  %v7345_v55 = vld [vmem:[%s8876_s4 + $0x158] ss:$12 sps:$4 sm:$0xff]  }
0x14df   :  { %6762 = vmatprep.subr.bf16.mxu0 %v7345_v55 }
0x14e0   :  { %v3100_v35 = vpack.c.bf16 %v8414_v34, %v8411_v47  ;;  %6763 = vmatpush3.bf16.msra.mxu0 %v7345_v55 }
0x14e2   :  { %3281 = vmatmul.mubr.bf16.vlgmr.msra.gmra.mrb[44].mxu1 %v3100_v35 }
0x14e3   :  { %3290 = vmatprep.mubr.bf16.mxu1 %v7647_v23 }
0x14ee   :  { %v2728_v36 = vpop.f32.mrb[40].mxu1 }
0x14ef   :  { %v2729_v39 = vadd.f32 %v2728_v36, %v8297_v50  ;;  %v2730_v40 = vpop.f32.mrb[41].mxu1  ;;  %v7346_v36 = vld [vmem:[%s8876_s4 + $0x170] ss:$12 sps:$4 sm:$0xff]  }
0x14f0   :  { %v2731_v43 = vadd.f32 %v2730_v40, %v8300_v58  ;;  %v2732_v46 = vpop.f32.mrb[42].mxu1  ;;  %6764 = vmatprep.subr.bf16.mxu0 %v7346_v36 }
0x14f1   :  { %v2741_v31 = vmul.f32 %v2729_v39, %v2729_v39  ;;  %v2733_v45 = vadd.f32 %v2732_v46, %v8297_v50  ;;  %v2734_v61 = vpop.f32.mrb[43].mxu1  ;;  %6765 = vmatpush3.bf16.msra.mxu0 %v7346_v36 }
0x14f2   :  { %v2742_v48 = vmul.f32 %v2731_v43, %v2731_v43  ;;  %v2735_v0 = vadd.f32 %v2734_v61, %v8300_v58 }
0x14f3   :  { %v2749_v4 = vmul.f32 %v2741_v31, %v2729_v39  ;;  %v2743_v5 = vmul.f32 %v2733_v45, %v2733_v45 }
0x14f4   :  { %v2750_v33 = vmul.f32 %v2742_v48, %v2731_v43  ;;  %v2744_v1 = vmul.f32 %v2735_v0, %v2735_v0 }
0x14f5   :  { %v2757_v26 = vmul.f32 0.044715, %v2749_v4  ;;  %v2751_v37 = vmul.f32 %v2743_v5, %v2733_v45 }
0x14f6   :  { %v2758_v8 = vmul.f32 0.044715, %v2750_v33  ;;  %v2752_v12 = vmul.f32 %v2744_v1, %v2735_v0 }
0x14f7   :  { %v2765_v13 = vadd.f32 %v2757_v26, %v2729_v39  ;;  %v2759_v49 = vmul.f32 0.044715, %v2751_v37 }
0x14f8   :  { %v2766_v53 = vadd.f32 %v2758_v8, %v2731_v43  ;;  %v2760_v2 = vmul.f32 0.044715, %v2752_v12 }
0x14f9   :  { %v2773_v52 = vmul.f32 0.7978846, %v2765_v13  ;;  %v2767_v60 = vadd.f32 %v2759_v49, %v2733_v45 }
0x14fa   :  { %v2774_v3 = vmul.f32 0.7978846, %v2766_v53  ;;  %v2768_v50 = vadd.f32 %v2760_v2, %v2735_v0 }
0x14fb   :  { %7487 = vtanh.f32 %v2773_v52  ;;  %v2775_v20 = vmul.f32 0.7978846, %v2767_v60 }
0x14fc   :  { %7489 = vtanh.f32 %v2774_v3  ;;  %v2776_v58 = vmul.f32 0.7978846, %v2768_v50 }
0x14fd   :  { %7491 = vtanh.f32 %v2775_v20 }
0x14fe   :  { %7493 = vtanh.f32 %v2776_v58 }
0x1505   :  { %v7488_v7 = vpop.eup %7487 }
0x1506   :  { %v7490_v22 = vpop.eup %7489  ;;  %v2789_v24 = vadd.f32 1.0, %v7488_v7 }
0x1507   :  { %v7492_v27 = vpop.eup %7491  ;;  %v2790_v19 = vadd.f32 1.0, %v7490_v22 }
0x1508   :  { %v7494_v10 = vpop.eup %7493  ;;  %v2791_v57 = vadd.f32 1.0, %v7492_v27  ;;  %v2797_v11 = vmul.f32 0.5, %v2789_v24 }
0x1509   :  { %v2792_v56 = vadd.f32 1.0, %v7494_v10  ;;  %v2798_v59 = vmul.f32 0.5, %v2790_v19 }
0x150a   :  { %v2799_v21 = vmul.f32 0.5, %v2791_v57  ;;  %v2805_v32 = vmul.f32 %v2797_v11, %v2729_v39  ;;  %v8432_v39 = vld [vmem:[%s8877_s5 + $0x3] sm:$0x7] }
0x150b   :  { %v2800_v41 = vmul.f32 0.5, %v2792_v56  ;;  %v2806_v28 = vmul.f32 %v2798_v59, %v2731_v43  ;;  %v8450_v7 = vrot.slane %v8432_v39, %v7882_v15 }
0x150c   :  { %v2807_v16 = vmul.f32 %v2799_v21, %v2733_v45 }
0x150d   :  { %v2808_v54 = vmul.f32 %v2800_v41, %v2735_v0 }
0x150e   :  { %v2843_v62 = vpack.c.bf16 %v2807_v16, %v2805_v32 }
0x150f   :  { %v2844_v42 = vpack.c.bf16 %v2808_v54, %v2806_v28 }
0x1511   :  { %2988 = vmatprep.mubr.bf16.mxu0 %v2844_v42 }
0x1512   :  { %2989 = vmatmul.mubr.bf16.gmra.mrb[48].mxu0 %v2843_v62 }
0x1513   :  { %6766 = vmatprep.mubr.bf16.mxu0 %v3100_v35  ;;  %v8436_v35 = vrot.slane %v8432_v39, %v7888_v17 }
0x15b5   :  { %v3282_v40 = vpop.f32.mrb[44].mxu1 }
0x15b6   :  { %v3284_v43 = vpop.f32.mrb[45].mxu1 }
0x15b7   :  { %v3286_v46 = vpop.f32.mrb[46].mxu1  ;;  %v3285_v45 = vadd.f32 %v3284_v43, %v8436_v35 }
0x15b8   :  { %v3288_v31 = vpop.f32.mrb[47].mxu1 }
0x15b9   :  { %v3289_v61 = vadd.f32 %v3288_v31, %v8436_v35 }
0x15bb   :  { %v7026_v48 = vpack.c.bf16 %v3289_v61, %v3285_v45  ;;  %v8440_v0 = vpack.i.bf16 %v3289_v61, %v3285_v45 }
0x15bd   :  { %7028 = vmatprep.subr.msk.bf16.mxu0 %vm7906_vm1, %v7026_v48 }
0x15e5   :  { %v6422_v4 = vpop.f32.mrb[48].mxu0 }
0x15e6   :  { %v6423_v5 = vpop.f32.mrb[49].mxu0 }
0x15e7   :  { %v6424_v33 = vadd.f32 %v6423_v5, %v6422_v4  ;;  %v6425_v1 = vpop.f32.mrb[50].mxu0 }
0x15e8   :  { %v6426_v26 = vpop.f32.mrb[51].mxu0 }
0x15e9   :  { %v2991_v37 = vadd.f32 %v6424_v33, %v8315_v30  ;;  %v6427_v8 = vadd.f32 %v6426_v26, %v6425_v1 }
0x15eb   :  { %v2994_v12 = vadd.f32 %v6427_v8, %v8315_v30  ;;  %v2999_v13 = vadd.f32 %v2991_v37, %v8336_v6  ;;  %v8455_v30 = vadd.f32 %v3286_v46, %v8450_v7  ;;  %v8460_v6 = vadd.f32 %v3282_v40, %v8450_v7 }
0x15ed   :  { %3007 = vadd.xlane.f32.xlu0 %v2999_v13  ;;  %v3000_v49 = vadd.f32 %v2994_v12, %v8339_v44 }
0x15f1   :  { %3009 = vadd.xlane.f32.xlu0 %v3000_v49 }
0x167a   :  { %v3008_v53 = vpop.xlane.xlu0 %3007 }
0x167b   :  { %v3013_v2 = vmul.f32 0.0078125, %v3008_v53 }
0x167d   :  { %v3017_v52 = vsub.f32 %v2999_v13, %v3013_v2 }
0x167e   :  { %v3010_v60 = vpop.xlane.xlu0 %3009 }
0x167f   :  { %v3014_v3 = vmul.f32 0.0078125, %v3010_v60  ;;  %v3021_v50 = vmul.f32 %v3017_v52, %v3017_v52 }
0x1681   :  { %v3018_v20 = vsub.f32 %v3000_v49, %v3014_v3  ;;  %3027 = vadd.xlane.f32.xlu1 %v3021_v50 }
0x1683   :  { %v3022_v58 = vmul.f32 %v3018_v20, %v3018_v20 }
0x1685   :  { %3029 = vadd.xlane.f32.xlu0 %v3022_v58 }
0x1692   :  { %7176 = vrot.lane.b32.xlu1 %v8440_v0, %s7648_s30 }
0x1696   :  { %3564 = vrot.lane.b32.xlu1 %v8455_v30, %s7648_s30 }
0x169b   :  { %3562 = vrot.lane.b32.xlu0 %v8460_v6, %s7648_s30 }
0x170e   :  { %v3028_v44 = vpop.xlane.xlu1 %3027 }
0x170f   :  { %v3033_v22 = vmul.f32 0.0078125, %v3028_v44 }
0x1711   :  { %v3037_v24 = vadd.f32 1e-05, %v3033_v22 }
0x1712   :  { %v7177_v27 = vpop.permute.xlu1 %7176  ;;  %v3030_v19 = vpop.xlane.xlu0 %3029 }
0x1713   :  { %7495 = vrsqrt.f32 %v3037_v24  ;;  %v7179_v10 = vunpack.i.h.bf16 %v7177_v27  ;;  %v7178_v57 = vunpack.i.l.bf16 %v7177_v27  ;;  %v3034_v11 = vmul.f32 0.0078125, %v3030_v19 }
0x1715   :  { %v7036_v56 = vpack.c.bf16 %v7179_v10, %v7178_v57  ;;  %v3038_v59 = vadd.f32 1e-05, %v3034_v11 }
0x1716   :  { %v3563_v36 = vpop.permute.xlu0 %3562 }
0x1717   :  { %7497 = vrsqrt.f32 %v3038_v59  ;;  %7038 = vmatprep.subr.msk.bf16.mxu1 %vm7906_vm1, %v7036_v56 }
0x1718   :  { %7041 = vmatpush3.bf16.xpose.msk.msra.mxu1 %vm7906_vm1, %v7036_v56 }
0x1719   :  { %6798 = vmatprep.subr.bf16.mxu1 %v7649_v51 }
0x171d   :  { %v7496_v21 = vpop.eup %7495 }
0x171e   :  { %v3045_v41 = vmul.f32 %v7496_v21, %v3017_v52 }
0x1720   :  { %v3055_v28 = vmul.f32 %v8401_v25, %v3045_v41 }
0x1721   :  { %v7498_v32 = vpop.eup %7497 }
0x1722   :  { %v3046_v16 = vmul.f32 %v7498_v32, %v3018_v20  ;;  %v8472_v62 = vadd.f32 %v8407_v18, %v3055_v28 }
0x1724   :  { %v3056_v54 = vmul.f32 %v8401_v25, %v3046_v16  ;;  %v3565_v25 = vpop.permute.xlu1 %3564 }
0x1726   :  { %v8475_v42 = vadd.f32 %v8407_v18, %v3056_v54  ;;  %v3116_v18 = vrot.slane %v8432_v39, %v200_v38 }
0x1728   :  { %v3101_v55 = vpack.c.bf16 %v8475_v42, %v8472_v62 }
0x172a   :  { %3291 = vmatmul.mubr.bf16.gmra.mrb[48].mxu1 %v3101_v55  ;;  %6767 = vmatmul.mubr.bf16.vlgmr.msra.gmra.mrb[52].mxu0 %v3101_v55 }
0x172b   :  { %7031 = vmatpush3.bf16.xpose.msk.msra.mxu0 %vm7906_vm1, %v7026_v48  ;;  %6774 = vmatprep.mubr.msk.f32.mxu0 %vm451_vm0, %v8460_v6 }
0x172c   :  { %6788 = vmatprep.mubr.msk.f32.mxu1 %vm451_vm0, %v3563_v36 }
0x1732   :  { %6775 = vmatmul.mubr.msk.f32.vlgmr.msra.gmra.mrb[34].mxu0 %vm451_vm0, %v8455_v30  ;;  %6789 = vmatmul.mubr.msk.f32.vlgmr.msra.gmra.mrb[34].mxu1 %vm451_vm0, %v3565_v25 }
0x1733   :  { %6802 = vmatprep.mubr.msk.bf16.mxu1 %vm7650_vm3, %v7649_v51 }
0x17fd   :  { %v8492_v40 = vpop.f32.mrb[48].mxu1  ;;  %v6768_v43 = vpop.f32.mrb[52].mxu0 }
0x17fe   :  { %v3344_v46 = vadd.f32 %v6768_v43, %v3116_v18  ;;  %v3294_v31 = vpop.f32.mrb[49].mxu1  ;;  %v3335_v45 = vpop.f32.mrb[53].mxu0 }
0x17ff   :  { %v8494_v61 = vpop.f32.mrb[50].mxu1  ;;  %v6769_v48 = vpop.f32.mrb[54].mxu0  ;;  %v3295_v1 = vadd.f32 %v3294_v31, %v8436_v35  ;;  %v3336_v26 = vadd.f32 %v3335_v45, %v3116_v18 }
0x1800   :  { %v3347_v4 = vadd.f32 %v6769_v48, %v3116_v18  ;;  %v3298_v5 = vpop.f32.mrb[51].mxu1  ;;  %v3338_v33 = vpop.f32.mrb[55].mxu0 }
0x1801   :  { %v3299_v37 = vadd.f32 %v3298_v5, %v8436_v35  ;;  %v3339_v14 = vadd.f32 %v3338_v33, %v3116_v18  ;;  %v8520_v33 = vld [vmem:[#allocation2 + $0x50] sm:$0xff]  }
0x1802   :  { %v8498_v8 = vpack.c.bf16 %v3347_v4, %v3344_v46  ;;  %v8500_v38 = vpack.i.bf16 %v3347_v4, %v3344_v46  ;;  %6799 = vmatpush3.bf16.msra.mxu1 %v8520_v33 }
0x1803   :  { %v7032_v39 = vpack.c.bf16 %v3339_v14, %v3336_v26  ;;  %v8502_v12 = vpack.i.bf16 %v3339_v14, %v3336_v26  ;;  %v8504_v13 = vpack.i.bf16 %v3299_v37, %v3295_v1  ;;  %v8506_v49 = vpack.c.bf16 %v3299_v37, %v3295_v1  ;;  %6800 = vmatprep.subr.bf16.mxu1 %v7649_v51  ;;  %v8526_v1 = vld [vmem:[#allocation2 + $0x58] sm:$0xff]  }
0x1805   :  { %v6776_v53 = vpop.f32.mrb[34].mxu0  ;;  %7033 = vmatprep.subr.bf16.mxu0 %v7032_v39  ;;  %v6790_v2 = vpop.f32.mrb[34].mxu1 }
0x1806   :  { %v3455_v52 = vmul.f32 0.17677669, %v6776_v53  ;;  %v3445_v60 = vpop.f32.mrb[35].mxu0  ;;  %7035 = vmatpush3.bf16.msra.mxu0 %v7032_v39  ;;  %v3644_v3 = vpop.f32.mrb[35].mxu1  ;;  %v3654_v35 = vmul.f32 0.17677669, %v6790_v2  ;;  %6801 = vmatpush3.bf16.msra.mxu1 %v8526_v1 }
0x1807   :  { %v3454_v50 = vmul.f32 0.17677669, %v3445_v60  ;;  %v3653_v20 = vmul.f32 0.17677669, %v3644_v3 }
0x1808   :  { %v3457_v58 = vadd.f32 %v3455_v52, %v7952_v63  ;;  %v3656_v19 = vadd.f32 %v3654_v35, %v7952_v63 }
0x1809   :  { %v3456_v44 = vadd.f32 %v3454_v50, %v7952_v63  ;;  %v3655_v24 = vadd.f32 %v3653_v20, %v7952_v63 }
0x180a   :  { %v3461_v22 = vsel %vm547_vm2, %v3457_v58, -inf  ;;  %v3660_v57 = vsel %vm547_vm2, %v3656_v19, -inf }
0x180b   :  { %3462 = vmax.xlane.f32.xlu0 %v3461_v22  ;;  %v3458_v27 = vsel %vm547_vm2, %v3456_v44, -inf  ;;  %v3657_v10 = vsel %vm547_vm2, %v3655_v24, -inf }
0x180c   :  { %3459 = vmax.xlane.f32.xlu1 %v3458_v27 }
0x180f   :  { %3658 = vmax.xlane.f32.xlu0 %v3657_v10 }
0x1810   :  { %3661 = vmax.xlane.f32.xlu1 %v3660_v57 }
0x1898   :  { %v3463_v11 = vpop.xlane.xlu0 %3462 }
0x1899   :  { %v3465_v56 = vsub.f32 %v3457_v58, %v3463_v11  ;;  %v3460_v59 = vpop.xlane.xlu1 %3459  ;;  %v8540_v11 = vld [vmem:[#allocation2 + $0x40] sm:$0xff]  }
0x189a   :  { %v3464_v21 = vsub.f32 %v3456_v44, %v3460_v59 }
0x189b   :  { %v3468_v41 = vmul.f32 1.442695, %v3465_v56  ;;  %v8548_v56 = vld [vmem:[#allocation2 + $0x48] sm:$0xff]  }
0x189c   :  { %v3466_v32 = vmul.f32 1.442695, %v3464_v21  ;;  %v3659_v16 = vpop.xlane.xlu0 %3658 }
0x189d   :  { %7499 = vpow2.f32 %v3468_v41  ;;  %v3663_v28 = vsub.f32 %v3655_v24, %v3659_v16  ;;  %v3662_v54 = vpop.xlane.xlu1 %3661 }
0x189e   :  { %7501 = vpow2.f32 %v3466_v32  ;;  %v3664_v55 = vsub.f32 %v3656_v19, %v3662_v54 }
0x189f   :  { %v3665_v36 = vmul.f32 1.442695, %v3663_v28 }
0x18a0   :  { %v3667_v25 = vmul.f32 1.442695, %v3664_v55 }
0x18a1   :  { %7503 = vpow2.f32 %v3665_v36 }
0x18a2   :  { %7505 = vpow2.f32 %v3667_v25 }
0x18a7   :  { %v7500_v18 = vpop.eup %7499 }
0x18a8   :  { %v7502_v43 = vpop.eup %7501  ;;  %v3473_v46 = vsel %vm547_vm2, %v7500_v18, 0.0 }
0x18a9   :  { %3474 = vadd.xlane.f32.xlu1 %v3473_v46  ;;  %v3470_v31 = vsel %vm547_vm2, %v7502_v43, 0.0 }
0x18aa   :  { %3471 = vadd.xlane.f32.xlu0 %v3470_v31 }
0x18ab   :  { %v7504_v45 = vpop.eup %7503 }
0x18ac   :  { %v7506_v48 = vpop.eup %7505  ;;  %v3669_v4 = vsel %vm547_vm2, %v7504_v45, 0.0 }
0x18ad   :  { %v3672_v5 = vsel %vm547_vm2, %v7506_v48, 0.0 }
0x18ae   :  { %3673 = vadd.xlane.f32.xlu1 %v3672_v5  ;;  %3670 = vadd.xlane.f32.xlu0 %v3669_v4 }
0x18bf   :  { %7186 = vrot.lane.b32.xlu1 %v8440_v0, %s7644_s0 }
0x18c3   :  { %3881 = vrot.lane.b32.xlu1 %v8460_v6, %s7644_s0 }
0x18c4   :  { %7181 = vrot.lane.b32.xlu0 %v8502_v12, %s7648_s30 }
0x18c8   :  { %3883 = vrot.lane.b32.xlu0 %v8455_v30, %s7644_s0 }
0x1936   :  { %v3475_v26 = vpop.xlane.xlu1 %3474 }
0x1937   :  { %7507 = vrcp.f32 %v3475_v26  ;;  %v3472_v37 = vpop.xlane.xlu0 %3471 }
0x1938   :  { %7509 = vrcp.f32 %v3472_v37 }
0x193b   :  { %v3674_v14 = vpop.xlane.xlu1 %3673  ;;  %v3671_v39 = vpop.xlane.xlu0 %3670 }
0x193c   :  { %7511 = vrcp.f32 %v3674_v14 }
0x193d   :  { %7513 = vrcp.f32 %v3671_v39 }
0x193f   :  { %v7187_v53 = vpop.permute.xlu1 %7186  ;;  %v7182_v2 = vpop.permute.xlu0 %7181 }
0x1940   :  { %v7189_v52 = vunpack.i.h.bf16 %v7187_v53  ;;  %v7188_v60 = vunpack.i.l.bf16 %v7187_v53  ;;  %v7184_v3 = vunpack.i.h.bf16 %v7182_v2  ;;  %v7183_v35 = vunpack.i.l.bf16 %v7182_v2 }
0x1941   :  { %v7508_v50 = vpop.eup %7507 }
0x1942   :  { %v7510_v20 = vpop.eup %7509  ;;  %v7046_v58 = vpack.c.bf16 %v7189_v52, %v7188_v60  ;;  %v7042_v44 = vpack.c.bf16 %v7184_v3, %v7183_v35  ;;  %v3479_v24 = vmul.f32 %v7508_v50, %v7500_v18 }
0x1943   :  { %v3478_v22 = vmul.f32 %v7510_v20, %v7502_v43  ;;  %v3882_v54 = vpop.permute.xlu1 %3881  ;;  %v3884_v55 = vpop.permute.xlu0 %3883 }
0x1944   :  { %7043 = vmatprep.subr.bf16.mxu0 %v7042_v44  ;;  %7048 = vmatprep.subr.msk.bf16.mxu1 %vm7906_vm1, %v7046_v58 }
0x1945   :  { %6781 = vmatprep.mubr.msk.f32.mxu0 %vm547_vm2, %v3478_v22 }
0x1946   :  { %v7512_v27 = vpop.eup %7511  ;;  %6782 = vmatmul.mubr.msk.f32.vlgmr.msra.gmra.mrb[56].mxu0 %vm547_vm2, %v3479_v24 }
0x1947   :  { %v7514_v19 = vpop.eup %7513  ;;  %v3678_v10 = vmul.f32 %v7512_v27, %v7506_v48  ;;  %7045 = vmatpush3.bf16.msra.mxu0 %v7042_v44 }
0x1948   :  { %v3677_v57 = vmul.f32 %v7514_v19, %v7504_v45  ;;  %6806 = vmatprep.subr.bf16.mxu0 %v7649_v51 }
0x194a   :  { %6795 = vmatprep.mubr.msk.f32.mxu0 %vm547_vm2, %v3677_v57 }
0x194b   :  { %6796 = vmatmul.mubr.msk.f32.vlgmr.msra.gmra.mrb[58].mxu0 %vm547_vm2, %v3678_v10  ;;  %v8578_v10 = vld [vmem:[#allocation2 + $0x60] sm:$0xff]  }
0x194c   :  { %6807 = vmatpush3.bf16.msra.mxu0 %v8540_v11  ;;  %6810 = vmatprep.mubr.msk.bf16.mxu0 %vm7650_vm3, %v7649_v51 }
0x194d   :  { %6808 = vmatprep.subr.bf16.mxu0 %v7649_v51 }
0x1950   :  { %6809 = vmatpush3.bf16.msra.mxu0 %v8548_v56 }
0x1a19   :  { %v6783_v59 = vpop.f32.mrb[56].mxu0 }
0x1a1a   :  { %v3552_v21 = vpop.f32.mrb[57].mxu0 }
0x1a1b   :  { %v3561_v41 = vpack.c.bf16 %v6783_v59, %v3552_v21 }
0x1a1d   :  { %6811 = vmatmul.mubr.msk.bf16.vlgmr.msra.gmra.mrb[60].mxu0 %vm451_vm0, %v3561_v41 }
0x1a1e   :  { %v6797_v32 = vpop.f32.mrb[58].mxu0 }
0x1a1f   :  { %v3759_v16 = vpop.f32.mrb[59].mxu0 }
0x1a20   :  { %v3768_v28 = vpack.c.bf16 %v6797_v32, %v3759_v16 }
0x1a22   :  { %6803 = vmatmul.mubr.msk.bf16.vlgmr.msra.gmra.mrb[52].mxu1 %vm451_vm0, %v3768_v28 }
0x1a23   :  { %7051 = vmatpush3.bf16.xpose.msk.msra.mxu1 %vm7906_vm1, %v7046_v58  ;;  %6818 = vmatprep.mubr.msk.f32.mxu1 %vm451_vm0, %v3882_v54 }
0x1a24   :  { %6828 = vmatprep.subr.bf16.mxu1 %v7649_v51 }
0x1a2a   :  { %6819 = vmatmul.mubr.msk.f32.vlgmr.msra.gmra.mrb[56].mxu1 %vm451_vm0, %v3884_v55 }
0x1a2b   :  { %6832 = vmatprep.mubr.msk.bf16.mxu1 %vm7650_vm3, %v7649_v51  ;;  %6829 = vmatpush3.bf16.msra.mxu1 %v8578_v10 }
0x1a2c   :  { %6830 = vmatprep.subr.bf16.mxu1 %v7649_v51 }
0x1af0   :  { %v3874_v36 = vpop.f32.mrb[60].mxu0 }
0x1af1   :  { %v6812_v25 = vpop.f32.mrb[61].mxu0 }
0x1af2   :  { %v3877_v18 = vpop.f32.mrb[62].mxu0 }
0x1af3   :  { %v6813_v43 = vpop.f32.mrb[63].mxu0 }
0x1af5   :  { %v3818_v46 = vpop.f32.mrb[52].mxu1 }
0x1af6   :  { %v8560_v31 = vadd.f32 %v3874_v36, %v3818_v46  ;;  %v6804_v45 = vpop.f32.mrb[53].mxu1  ;;  %v8590_v46 = vld [vmem:[#allocation2 + $0x68] sm:$0xff]  }
0x1af7   :  { %v3821_v48 = vpop.f32.mrb[54].mxu1  ;;  %6831 = vmatpush3.bf16.msra.mxu1 %v8590_v46 }
0x1af8   :  { %v8562_v4 = vadd.f32 %v3877_v18, %v3821_v48  ;;  %v6805_v5 = vpop.f32.mrb[55].mxu1  ;;  %6850 = vmatprep.subr.bf16.mxu1 %v7649_v51 }
0x1af9   :  { %v8594_v5 = vld [vmem:[#allocation2 + $0x70] sm:$0xff]  }
0x1afd   :  { %v6820_v26 = vpop.f32.mrb[56].mxu1 }
0x1afe   :  { %v3973_v37 = vmul.f32 0.17677669, %v6820_v26  ;;  %v3963_v14 = vpop.f32.mrb[57].mxu1 }
0x1aff   :  { %v3972_v39 = vmul.f32 0.17677669, %v3963_v14 }
0x1b00   :  { %v3975_v53 = vadd.f32 %v3973_v37, %v7952_v63  ;;  %v8598_v37 = vld [vmem:[#allocation2 + $0x78] sm:$0xff]  }
0x1b01   :  { %v3974_v2 = vadd.f32 %v3972_v39, %v7952_v63 }
0x1b02   :  { %v3979_v52 = vsel %vm547_vm2, %v3975_v53, -inf }
0x1b03   :  { %3980 = vmax.xlane.f32.xlu0 %v3979_v52  ;;  %v3976_v60 = vsel %vm547_vm2, %v3974_v2, -inf }
0x1b04   :  { %3977 = vmax.xlane.f32.xlu1 %v3976_v60 }
0x1b90   :  { %v3981_v3 = vpop.xlane.xlu0 %3980 }
0x1b91   :  { %v3983_v35 = vsub.f32 %v3975_v53, %v3981_v3  ;;  %v3978_v50 = vpop.xlane.xlu1 %3977 }
0x1b92   :  { %v3982_v20 = vsub.f32 %v3974_v2, %v3978_v50 }
0x1b93   :  { %v3986_v58 = vmul.f32 1.442695, %v3983_v35 }
0x1b94   :  { %v3984_v44 = vmul.f32 1.442695, %v3982_v20 }
0x1b95   :  { %7515 = vpow2.f32 %v3986_v58 }
0x1b96   :  { %7517 = vpow2.f32 %v3984_v44 }
0x1b9f   :  { %v7516_v22 = vpop.eup %7515 }
0x1ba0   :  { %v7518_v24 = vpop.eup %7517  ;;  %v3991_v27 = vsel %vm547_vm2, %v7516_v22, 0.0 }
0x1ba1   :  { %3992 = vadd.xlane.f32.xlu1 %v3991_v27  ;;  %v3988_v19 = vsel %vm547_vm2, %v7518_v24, 0.0 }
0x1ba2   :  { %3989 = vadd.xlane.f32.xlu0 %v3988_v19 }
0x1bb2   :  { %7196 = vrot.lane.b32.xlu1 %v8440_v0, %s7651_s1 }
0x1bb6   :  { %4144 = vrot.lane.b32.xlu1 %v8460_v6, %s7651_s1 }
0x1bb8   :  { %7191 = vrot.lane.b32.xlu0 %v8502_v12, %s7644_s0 }
0x1bbc   :  { %4146 = vrot.lane.b32.xlu0 %v8455_v30, %s7651_s1 }
0x1c2e   :  { %v3993_v57 = vpop.xlane.xlu1 %3992 }
0x1c2f   :  { %7519 = vrcp.f32 %v3993_v57  ;;  %v3990_v59 = vpop.xlane.xlu0 %3989 }
0x1c30   :  { %7521 = vrcp.f32 %v3990_v59  ;;  %v8615_v59 = vadd.f32 %v8492_v40, %v8450_v7 }
0x1c32   :  { %v7197_v0 = vpop.permute.xlu1 %7196 }
0x1c33   :  { %v7192_v21 = vpop.permute.xlu0 %7191  ;;  %v7199_v41 = vunpack.i.h.bf16 %v7197_v0  ;;  %v7198_v6 = vunpack.i.l.bf16 %v7197_v0  ;;  %v8623_v0 = vadd.f32 %v8494_v61, %v8450_v7 }
0x1c34   :  { %v7194_v32 = vunpack.i.h.bf16 %v7192_v21  ;;  %v7193_v16 = vunpack.i.l.bf16 %v7192_v21 }
0x1c35   :  { %v7056_v54 = vpack.c.bf16 %v7199_v41, %v7198_v6 }
0x1c36   :  { %v7052_v28 = vpack.c.bf16 %v7194_v32, %v7193_v16  ;;  %v4145_v18 = vpop.permute.xlu1 %4144 }
0x1c37   :  { %v4147_v43 = vpop.permute.xlu0 %4146 }
0x1c38   :  { %7053 = vmatprep.subr.bf16.mxu0 %v7052_v28 }
0x1c39   :  { %v7520_v30 = vpop.eup %7519  ;;  %7055 = vmatpush3.bf16.msra.mxu0 %v7052_v28 }
0x1c3a   :  { %v7522_v55 = vpop.eup %7521  ;;  %7058 = vmatprep.subr.msk.bf16.mxu0 %vm7906_vm1, %v7056_v54  ;;  %v3997_v25 = vmul.f32 %v7520_v30, %v7516_v22 }
0x1c3b   :  { %v3996_v36 = vmul.f32 %v7522_v55, %v7518_v24 }
0x1c3d   :  { %6825 = vmatprep.mubr.msk.f32.mxu0 %vm547_vm2, %v3996_v36 }
0x1c3e   :  { %6826 = vmatmul.mubr.msk.f32.vlgmr.msra.gmra.mrb[64].mxu0 %vm547_vm2, %v3997_v25 }
0x1c3f   :  { %6840 = vmatprep.mubr.msk.f32.mxu0 %vm451_vm0, %v4145_v18 }
0x1c42   :  { %7061 = vmatpush3.bf16.xpose.msk.msra.mxu0 %vm7906_vm1, %v7056_v54 }
0x1c49   :  { %6841 = vmatmul.mubr.msk.f32.vlgmr.msra.gmra.mrb[66].mxu0 %vm451_vm0, %v4147_v43 }
0x1d11   :  { %v6827_v45 = vpop.f32.mrb[64].mxu0 }
0x1d12   :  { %v4076_v48 = vpop.f32.mrb[65].mxu0 }
0x1d13   :  { %v4085_v26 = vpack.c.bf16 %v6827_v45, %v4076_v48 }
0x1d15   :  { %6833 = vmatmul.mubr.msk.bf16.vlgmr.msra.gmra.mrb[60].mxu1 %vm451_vm0, %v4085_v26 }
0x1d16   :  { %6851 = vmatpush3.bf16.msra.mxu1 %v8594_v5  ;;  %6854 = vmatprep.mubr.msk.bf16.mxu1 %vm7650_vm3, %v7649_v51 }
0x1d17   :  { %6852 = vmatprep.subr.bf16.mxu1 %v7649_v51 }
0x1d1a   :  { %6853 = vmatpush3.bf16.msra.mxu1 %v8598_v37 }
0x1d1b   :  { %7073 = vmatprep.subr.bf16.mxu1 %v8498_v8 }
0x1d1c   :  { %v6842_v14 = vpop.f32.mrb[66].mxu0 }
0x1d1d   :  { %v4236_v39 = vmul.f32 0.17677669, %v6842_v14  ;;  %v4226_v53 = vpop.f32.mrb[67].mxu0 }
0x1d1e   :  { %v4235_v2 = vmul.f32 0.17677669, %v4226_v53 }
0x1d1f   :  { %v4238_v52 = vadd.f32 %v4236_v39, %v7952_v63 }
0x1d20   :  { %v4237_v60 = vadd.f32 %v4235_v2, %v7952_v63 }
0x1d21   :  { %v4242_v3 = vsel %vm547_vm2, %v4238_v52, -inf }
0x1d22   :  { %4243 = vmax.xlane.f32.xlu0 %v4242_v3  ;;  %v4239_v35 = vsel %vm547_vm2, %v4237_v60, -inf }
0x1d23   :  { %4240 = vmax.xlane.f32.xlu1 %v4239_v35 }
0x1daf   :  { %v4244_v50 = vpop.xlane.xlu0 %4243 }
0x1db0   :  { %v4246_v20 = vsub.f32 %v4238_v52, %v4244_v50  ;;  %v4241_v58 = vpop.xlane.xlu1 %4240 }
0x1db1   :  { %v4245_v44 = vsub.f32 %v4237_v60, %v4241_v58 }
0x1db2   :  { %v4249_v22 = vmul.f32 1.442695, %v4246_v20 }
0x1db3   :  { %v4247_v24 = vmul.f32 1.442695, %v4245_v44 }
0x1db4   :  { %7523 = vpow2.f32 %v4249_v22 }
0x1db5   :  { %7525 = vpow2.f32 %v4247_v24 }
0x1dbe   :  { %v7524_v27 = vpop.eup %7523 }
0x1dbf   :  { %v7526_v19 = vpop.eup %7525  ;;  %v4254_v57 = vsel %vm547_vm2, %v7524_v27, 0.0 }
0x1dc0   :  { %4255 = vadd.xlane.f32.xlu1 %v4254_v57  ;;  %v4251_v63 = vsel %vm547_vm2, %v7526_v19, 0.0 }
0x1dc1   :  { %4252 = vadd.xlane.f32.xlu0 %v4251_v63 }
0x1dd1   :  { %7206 = vrot.lane.b32.xlu1 %v8504_v13, %s7648_s30 }
0x1dd5   :  { %4602 = vrot.lane.b32.xlu1 %v8615_v59, %s7648_s30 }
0x1dd7   :  { %7201 = vrot.lane.b32.xlu0 %v8502_v12, %s7651_s1 }
0x1ddb   :  { %4604 = vrot.lane.b32.xlu0 %v8623_v0, %s7648_s30 }
0x1de8   :  { %v4135_v21 = vpop.f32.mrb[60].mxu1 }
0x1de9   :  { %v8628_v41 = vadd.f32 %v4135_v21, %v8560_v31  ;;  %v6834_v6 = vpop.f32.mrb[61].mxu1 }
0x1dea   :  { %v4138_v40 = vpop.f32.mrb[62].mxu1 }
0x1deb   :  { %v8631_v32 = vadd.f32 %v4138_v40, %v8562_v4  ;;  %v6835_v16 = vpop.f32.mrb[63].mxu1 }
0x1e4d   :  { %v4256_v28 = vpop.xlane.xlu1 %4255 }
0x1e4e   :  { %7527 = vrcp.f32 %v4256_v28  ;;  %v4253_v12 = vpop.xlane.xlu0 %4252 }
0x1e4f   :  { %7529 = vrcp.f32 %v4253_v12 }
0x1e51   :  { %v7207_v31 = vpop.permute.xlu1 %7206 }
0x1e52   :  { %v7202_v54 = vpop.permute.xlu0 %7201  ;;  %v7209_v18 = vunpack.i.h.bf16 %v7207_v31  ;;  %v7208_v43 = vunpack.i.l.bf16 %v7207_v31 }
0x1e53   :  { %v7204_v7 = vunpack.i.h.bf16 %v7202_v54  ;;  %v7203_v61 = vunpack.i.l.bf16 %v7202_v54 }
0x1e54   :  { %v7076_v45 = vpack.c.bf16 %v7209_v18, %v7208_v43 }
0x1e55   :  { %v7062_v30 = vpack.c.bf16 %v7204_v7, %v7203_v61  ;;  %v4603_v48 = vpop.permute.xlu1 %4602 }
0x1e56   :  { %v4605_v26 = vpop.permute.xlu0 %4604 }
0x1e57   :  { %7063 = vmatprep.subr.bf16.mxu0 %v7062_v30 }
0x1e58   :  { %v7528_v55 = vpop.eup %7527  ;;  %7065 = vmatpush3.bf16.msra.mxu0 %v7062_v30 }
0x1e59   :  { %v7530_v36 = vpop.eup %7529  ;;  %7068 = vmatprep.subr.msk.bf16.mxu0 %vm7906_vm1, %v8506_v49  ;;  %v4260_v25 = vmul.f32 %v7528_v55, %v7524_v27 }
0x1e5a   :  { %v4259_v4 = vmul.f32 %v7530_v36, %v7526_v19 }
0x1e5c   :  { %6847 = vmatprep.mubr.msk.f32.mxu0 %vm547_vm2, %v4259_v4 }
0x1e5d   :  { %6848 = vmatmul.mubr.msk.f32.vlgmr.msra.gmra.mrb[68].mxu0 %vm547_vm2, %v4260_v25 }
0x1e5e   :  { %6862 = vmatprep.mubr.msk.f32.mxu0 %vm451_vm0, %v8615_v59 }
0x1e61   :  { %7071 = vmatpush3.bf16.xpose.msk.msra.mxu0 %vm7906_vm1, %v8506_v49 }
0x1e62   :  { %7078 = vmatprep.subr.msk.bf16.mxu0 %vm7906_vm1, %v7076_v45 }
0x1e68   :  { %6863 = vmatmul.mubr.msk.f32.vlgmr.msra.gmra.mrb[70].mxu0 %vm451_vm0, %v8623_v0 }
0x1e69   :  { %7081 = vmatpush3.bf16.xpose.msk.msra.mxu0 %vm7906_vm1, %v7076_v45  ;;  %6876 = vmatprep.mubr.msk.f32.mxu0 %vm451_vm0, %v4603_v48 }
0x1e6a   :  { %6894 = vmatprep.subr.bf16.mxu0 %v7649_v51 }
0x1e70   :  { %6877 = vmatmul.mubr.msk.f32.vlgmr.msra.gmra.mrb[72].mxu0 %vm451_vm0, %v4605_v26 }
0x1e71   :  { %6895 = vmatpush3.bf16.msra.mxu0 %v8540_v11  ;;  %6898 = vmatprep.mubr.msk.bf16.mxu0 %vm7650_vm3, %v7649_v51 }
0x1e72   :  { %6896 = vmatprep.subr.bf16.mxu0 %v7649_v51 }
0x1e75   :  { %6897 = vmatpush3.bf16.msra.mxu0 %v8548_v56 }
0x1f30   :  { %v6849_v49 = vpop.f32.mrb[68].mxu0 }
0x1f31   :  { %v4339_v14 = vpop.f32.mrb[69].mxu0 }
0x1f32   :  { %v4348_v39 = vpack.c.bf16 %v6849_v49, %v4339_v14 }
0x1f34   :  { %6855 = vmatmul.mubr.msk.bf16.vlgmr.msra.gmra.mrb[64].mxu1 %vm451_vm0, %v4348_v39 }
0x1f35   :  { %7075 = vmatpush3.bf16.msra.mxu1 %v8498_v8 }
0x1f3b   :  { %v6864_v53 = vpop.f32.mrb[70].mxu0 }
0x1f3c   :  { %v4495_v2 = vmul.f32 0.17677669, %v6864_v53  ;;  %v4485_v52 = vpop.f32.mrb[71].mxu0 }
0x1f3d   :  { %v4494_v60 = vmul.f32 0.17677669, %v4485_v52 }
0x1f3e   :  { %v4497_v11 = vadd.f32 %v4495_v2, %v8110_v9 }
0x1f3f   :  { %v4496_v3 = vadd.f32 %v4494_v60, %v8110_v9 }
0x1f40   :  { %v4501_v35 = vsel %vm547_vm2, %v4497_v11, -inf }
0x1f41   :  { %4502 = vmax.xlane.f32.xlu0 %v4501_v35  ;;  %v4498_v56 = vsel %vm547_vm2, %v4496_v3, -inf }
0x1f42   :  { %4499 = vmax.xlane.f32.xlu1 %v4498_v56 }
0x1f43   :  { %v6878_v50 = vpop.f32.mrb[72].mxu0 }
0x1f44   :  { %v4694_v20 = vmul.f32 0.17677669, %v6878_v50  ;;  %v4684_v58 = vpop.f32.mrb[73].mxu0 }
0x1f45   :  { %v4693_v44 = vmul.f32 0.17677669, %v4684_v58 }
0x1f46   :  { %v4696_v8 = vadd.f32 %v4694_v20, %v8110_v9 }
0x1f47   :  { %v4695_v22 = vadd.f32 %v4693_v44, %v8110_v9 }
0x1f48   :  { %v4700_v24 = vsel %vm547_vm2, %v4696_v8, -inf }
0x1f49   :  { %4701 = vmax.xlane.f32.xlu1 %v4700_v24  ;;  %v4697_v27 = vsel %vm547_vm2, %v4695_v22, -inf }
0x1f4a   :  { %4698 = vmax.xlane.f32.xlu0 %v4697_v27 }
0x1fce   :  { %v4503_v19 = vpop.xlane.xlu0 %4502 }
0x1fcf   :  { %v4505_v57 = vsub.f32 %v4497_v11, %v4503_v19  ;;  %v4500_v63 = vpop.xlane.xlu1 %4499 }
0x1fd0   :  { %v4504_v21 = vsub.f32 %v4496_v3, %v4500_v63 }
0x1fd1   :  { %v4508_v6 = vmul.f32 1.442695, %v4505_v57 }
0x1fd2   :  { %v4506_v40 = vmul.f32 1.442695, %v4504_v21 }
0x1fd3   :  { %7531 = vpow2.f32 %v4508_v6 }
0x1fd4   :  { %7533 = vpow2.f32 %v4506_v40 }
0x1fd6   :  { %v4702_v16 = vpop.xlane.xlu1 %4701 }
0x1fd7   :  { %v4704_v28 = vsub.f32 %v4696_v8, %v4702_v16  ;;  %v4699_v12 = vpop.xlane.xlu0 %4698 }
0x1fd8   :  { %v4703_v54 = vsub.f32 %v4695_v22, %v4699_v12 }
0x1fd9   :  { %v4707_v7 = vmul.f32 1.442695, %v4704_v28 }
0x1fda   :  { %v4705_v61 = vmul.f32 1.442695, %v4703_v54 }
0x1fdb   :  { %7535 = vpow2.f32 %v4707_v7 }
0x1fdc   :  { %7537 = vpow2.f32 %v4705_v61 }
0x1fdd   :  { %v7532_v30 = vpop.eup %7531 }
0x1fde   :  { %v7534_v55 = vpop.eup %7533  ;;  %v4513_v36 = vsel %vm547_vm2, %v7532_v30, 0.0 }
0x1fdf   :  { %4514 = vadd.xlane.f32.xlu1 %v4513_v36  ;;  %v4510_v31 = vsel %vm547_vm2, %v7534_v55, 0.0 }
0x1fe0   :  { %4511 = vadd.xlane.f32.xlu0 %v4510_v31 }
0x1fe5   :  { %v7536_v4 = vpop.eup %7535 }
0x1fe6   :  { %v7538_v25 = vpop.eup %7537  ;;  %v4712_v18 = vsel %vm547_vm2, %v7536_v4, 0.0 }
0x1fe7   :  { %4713 = vadd.xlane.f32.xlu1 %v4712_v18  ;;  %v4709_v43 = vsel %vm547_vm2, %v7538_v25, 0.0 }
0x1fe8   :  { %4710 = vadd.xlane.f32.xlu0 %v4709_v43 }
0x1ff8   :  { %7216 = vrot.lane.b32.xlu1 %v8504_v13, %s7644_s0 }
0x1ffc   :  { %4897 = vrot.lane.b32.xlu1 %v8615_v59, %s7644_s0 }
0x1ffe   :  { %7211 = vrot.lane.b32.xlu0 %v8500_v38, %s7648_s30 }
0x2002   :  { %4899 = vrot.lane.b32.xlu0 %v8623_v0, %s7644_s0 }
0x2007   :  { %v4398_v45 = vpop.f32.mrb[64].mxu1 }
0x2008   :  { %v8680_v48 = vadd.f32 %v4398_v45, %v8628_v41  ;;  %v6856_v26 = vpop.f32.mrb[65].mxu1 }
0x2009   :  { %v4401_v49 = vpop.f32.mrb[66].mxu1 }
0x200a   :  { %v8683_v14 = vadd.f32 %v4401_v49, %v8631_v32  ;;  %v6857_v39 = vpop.f32.mrb[67].mxu1 }
0x206c   :  { %v4515_v53 = vpop.xlane.xlu1 %4514 }
0x206d   :  { %7539 = vrcp.f32 %v4515_v53  ;;  %v4512_v2 = vpop.xlane.xlu0 %4511 }
0x206e   :  { %7541 = vrcp.f32 %v4512_v2 }
0x2074   :  { %v4714_v52 = vpop.xlane.xlu1 %4713 }
0x2075   :  { %7543 = vrcp.f32 %v4714_v52  ;;  %v4711_v60 = vpop.xlane.xlu0 %4710 }
0x2076   :  { %7545 = vrcp.f32 %v4711_v60 }
0x2077   :  { %v7540_v11 = vpop.eup %7539 }
0x2078   :  { %v7542_v3 = vpop.eup %7541  ;;  %v4519_v41 = vmul.f32 %v7540_v11, %v7532_v30  ;;  %v7217_v8 = vpop.permute.xlu1 %7216 }
0x2079   :  { %v7212_v35 = vpop.permute.xlu0 %7211  ;;  %v4518_v56 = vmul.f32 %v7542_v3, %v7534_v55  ;;  %v7219_v27 = vunpack.i.h.bf16 %v7217_v8  ;;  %v7218_v19 = vunpack.i.l.bf16 %v7217_v8 }
0x207a   :  { %v7214_v50 = vunpack.i.h.bf16 %v7212_v35  ;;  %v7213_v20 = vunpack.i.l.bf16 %v7212_v35 }
0x207b   :  { %6869 = vmatprep.mubr.msk.f32.mxu1 %vm547_vm2, %v4518_v56  ;;  %v7086_v57 = vpack.c.bf16 %v7219_v27, %v7218_v19 }
0x207c   :  { %v7082_v32 = vpack.c.bf16 %v7214_v50, %v7213_v20  ;;  %6870 = vmatmul.mubr.msk.f32.vlgmr.msra.gmra.mrb[58].mxu1 %vm547_vm2, %v4519_v41 }
0x207e   :  { %7083 = vmatprep.subr.bf16.mxu1 %v7082_v32 }
0x207f   :  { %v7544_v58 = vpop.eup %7543  ;;  %7085 = vmatpush3.bf16.msra.mxu1 %v7082_v32 }
0x2080   :  { %v7546_v44 = vpop.eup %7545  ;;  %6886 = vmatprep.subr.bf16.mxu1 %v7649_v51  ;;  %v4718_v24 = vmul.f32 %v7544_v58, %v7536_v4 }
0x2081   :  { %v4717_v22 = vmul.f32 %v7546_v44, %v7538_v25 }
0x2083   :  { %6883 = vmatprep.mubr.msk.f32.mxu1 %vm547_vm2, %v4717_v22 }
0x2084   :  { %6884 = vmatmul.mubr.msk.f32.vlgmr.msra.gmra.mrb[68].mxu1 %vm547_vm2, %v4718_v24 }
0x2085   :  { %6887 = vmatpush3.bf16.msra.mxu1 %v8520_v33  ;;  %6890 = vmatprep.mubr.msk.bf16.mxu1 %vm7650_vm3, %v7649_v51  ;;  %v4898_v33 = vpop.permute.xlu1 %4897 }
0x2086   :  { %6888 = vmatprep.subr.bf16.mxu1 %v7649_v51 }
0x2089   :  { %6889 = vmatpush3.bf16.msra.mxu1 %v8526_v1  ;;  %v4900_v1 = vpop.permute.xlu0 %4899 }
0x208a   :  { %7088 = vmatprep.subr.msk.bf16.mxu1 %vm7906_vm1, %v7086_v57 }
0x214f   :  { %v6871_v63 = vpop.f32.mrb[58].mxu1 }
0x2150   :  { %v4592_v21 = vpop.f32.mrb[59].mxu1 }
0x2151   :  { %v4601_v6 = vpack.c.bf16 %v6871_v63, %v4592_v21 }
0x2153   :  { %6899 = vmatmul.mubr.msk.bf16.vlgmr.msra.gmra.mrb[76].mxu0 %vm451_vm0, %v4601_v6 }
0x2157   :  { %v6885_v40 = vpop.f32.mrb[68].mxu1 }
0x2158   :  { %v4799_v16 = vpop.f32.mrb[69].mxu1 }
0x2159   :  { %v4808_v28 = vpack.c.bf16 %v6885_v40, %v4799_v16 }
0x215b   :  { %6891 = vmatmul.mubr.msk.bf16.vlgmr.msra.gmra.mrb[72].mxu1 %vm451_vm0, %v4808_v28 }
0x215c   :  { %7091 = vmatpush3.bf16.xpose.msk.msra.mxu1 %vm7906_vm1, %v7086_v57  ;;  %6906 = vmatprep.mubr.msk.f32.mxu1 %vm451_vm0, %v4898_v33 }
0x215d   :  { %6916 = vmatprep.subr.bf16.mxu1 %v7649_v51 }
0x2163   :  { %6907 = vmatmul.mubr.msk.f32.vlgmr.msra.gmra.mrb[70].mxu1 %vm451_vm0, %v4900_v1 }
0x2164   :  { %6917 = vmatpush3.bf16.msra.mxu1 %v8578_v10  ;;  %6920 = vmatprep.mubr.msk.bf16.mxu1 %vm7650_vm3, %v7649_v51 }
0x2165   :  { %6918 = vmatprep.subr.bf16.mxu1 %v7649_v51 }
0x2168   :  { %6919 = vmatpush3.bf16.msra.mxu1 %v8590_v46 }
0x2169   :  { %6938 = vmatprep.subr.bf16.mxu1 %v7649_v51 }
0x2226   :  { %v4890_v12 = vpop.f32.mrb[76].mxu0 }
0x2227   :  { %v6900_v54 = vpop.f32.mrb[77].mxu0 }
0x2228   :  { %v4893_v7 = vpop.f32.mrb[78].mxu0 }
0x2229   :  { %v6901_v61 = vpop.f32.mrb[79].mxu0 }
0x222e   :  { %v4846_v30 = vpop.f32.mrb[72].mxu1 }
0x222f   :  { %v8710_v55 = vadd.f32 %v4890_v12, %v4846_v30  ;;  %v6892_v36 = vpop.f32.mrb[73].mxu1 }
0x2230   :  { %v4849_v31 = vpop.f32.mrb[74].mxu1 }
0x2231   :  { %v8712_v4 = vadd.f32 %v4893_v7, %v4849_v31  ;;  %v6893_v10 = vpop.f32.mrb[75].mxu1 }
0x2236   :  { %v6908_v25 = vpop.f32.mrb[70].mxu1 }
0x2237   :  { %v4989_v18 = vmul.f32 0.17677669, %v6908_v25  ;;  %v4979_v43 = vpop.f32.mrb[71].mxu1  ;;  %v6242_v25 = vld [vmem:[%s8879_s7 + $0x1] ss:$0 sm:$0xff] }
0x2238   :  { %v4988_v45 = vmul.f32 0.17677669, %v4979_v43 }
0x2239   :  { %v4991_v46 = vadd.f32 %v4989_v18, %v8110_v9 }
0x223a   :  { %v4990_v26 = vadd.f32 %v4988_v45, %v8110_v9 }
0x223b   :  { %v4995_v49 = vsel %vm547_vm2, %v4991_v46, -inf }
0x223c   :  { %4996 = vmax.xlane.f32.xlu0 %v4995_v49  ;;  %v4992_v39 = vsel %vm547_vm2, %v4990_v26, -inf }
0x223d   :  { %4993 = vmax.xlane.f32.xlu1 %v4992_v39 }
0x22c9   :  { %v4997_v53 = vpop.xlane.xlu0 %4996 }
0x22ca   :  { %v4999_v2 = vsub.f32 %v4991_v46, %v4997_v53  ;;  %v4994_v52 = vpop.xlane.xlu1 %4993 }
0x22cb   :  { %v4998_v60 = vsub.f32 %v4990_v26, %v4994_v52  ;;  %v5408_v26 = vadd.f32 %v6242_v25, %v8683_v14 }
0x22cc   :  { %v5002_v11 = vmul.f32 1.442695, %v4999_v2 }
0x22cd   :  { %v5000_v3 = vmul.f32 1.442695, %v4998_v60  ;;  %v5412_v39 = vadd.f32 %v5408_v26, %v8414_v34 }
0x22ce   :  { %7547 = vpow2.f32 %v5002_v11 }
0x22cf   :  { %7549 = vpow2.f32 %v5000_v3 }
0x22d8   :  { %v7548_v35 = vpop.eup %7547 }
0x22d9   :  { %v7550_v56 = vpop.eup %7549  ;;  %v5007_v41 = vsel %vm547_vm2, %v7548_v35, 0.0 }
0x22da   :  { %5008 = vadd.xlane.f32.xlu1 %v5007_v41  ;;  %v5004_v50 = vsel %vm547_vm2, %v7550_v56, 0.0 }
0x22db   :  { %5005 = vadd.xlane.f32.xlu0 %v5004_v50 }
0x22eb   :  { %7226 = vrot.lane.b32.xlu1 %v8504_v13, %s7651_s1 }
0x22ef   :  { %5148 = vrot.lane.b32.xlu1 %v8615_v59, %s7651_s1 }
0x22f1   :  { %7221 = vrot.lane.b32.xlu0 %v8500_v38, %s7644_s0 }
0x22f5   :  { %5150 = vrot.lane.b32.xlu0 %v8623_v0, %s7651_s1 }
0x2367   :  { %v5009_v20 = vpop.xlane.xlu1 %5008 }
0x2368   :  { %7551 = vrcp.f32 %v5009_v20  ;;  %v5006_v32 = vpop.xlane.xlu0 %5005 }
0x2369   :  { %7553 = vrcp.f32 %v5006_v32 }
0x236b   :  { %v7227_v58 = vpop.permute.xlu1 %7226 }
0x236c   :  { %v7222_v44 = vpop.permute.xlu0 %7221  ;;  %v7229_v8 = vunpack.i.h.bf16 %v7227_v58  ;;  %v7228_v22 = vunpack.i.l.bf16 %v7227_v58 }
0x236d   :  { %v7224_v24 = vunpack.i.h.bf16 %v7222_v44  ;;  %v7223_v27 = vunpack.i.l.bf16 %v7222_v44 }
0x236e   :  { %v7096_v19 = vpack.c.bf16 %v7229_v8, %v7228_v22 }
0x236f   :  { %v7092_v13 = vpack.c.bf16 %v7224_v24, %v7223_v27  ;;  %v5149_v21 = vpop.permute.xlu1 %5148 }
0x2370   :  { %v5151_v6 = vpop.permute.xlu0 %5150 }
0x2371   :  { %7093 = vmatprep.subr.bf16.mxu0 %v7092_v13 }
0x2372   :  { %v7552_v59 = vpop.eup %7551  ;;  %7095 = vmatpush3.bf16.msra.mxu0 %v7092_v13 }
0x2373   :  { %v7554_v57 = vpop.eup %7553  ;;  %7098 = vmatprep.subr.msk.bf16.mxu0 %vm7906_vm1, %v7096_v19  ;;  %v5013_v63 = vmul.f32 %v7552_v59, %v7548_v35 }
0x2374   :  { %v5012_v0 = vmul.f32 %v7554_v57, %v7550_v56 }
0x2376   :  { %6913 = vmatprep.mubr.msk.f32.mxu0 %vm547_vm2, %v5012_v0 }
0x2377   :  { %6914 = vmatmul.mubr.msk.f32.vlgmr.msra.gmra.mrb[74].mxu0 %vm547_vm2, %v5013_v63 }
0x2378   :  { %6928 = vmatprep.mubr.msk.f32.mxu0 %vm451_vm0, %v5149_v21 }
0x237b   :  { %7101 = vmatpush3.bf16.xpose.msk.msra.mxu0 %vm7906_vm1, %v7096_v19 }
0x2382   :  { %6929 = vmatmul.mubr.msk.f32.vlgmr.msra.gmra.mrb[80].mxu0 %vm451_vm0, %v5151_v6 }
0x244a   :  { %v6915_v40 = vpop.f32.mrb[74].mxu0 }
0x244b   :  { %v5092_v16 = vpop.f32.mrb[75].mxu0 }
0x244c   :  { %v5101_v28 = vpack.c.bf16 %v6915_v40, %v5092_v16 }
0x244e   :  { %6921 = vmatmul.mubr.msk.bf16.vlgmr.msra.gmra.mrb[76].mxu1 %vm451_vm0, %v5101_v28 }
0x244f   :  { %6939 = vmatpush3.bf16.msra.mxu1 %v8594_v5  ;;  %6942 = vmatprep.mubr.msk.bf16.mxu1 %vm7650_vm3, %v7649_v51 }
0x2450   :  { %6940 = vmatprep.subr.bf16.mxu1 %v7649_v51 }
0x2453   :  { %6941 = vmatpush3.bf16.msra.mxu1 %v8598_v37 }
0x2455   :  { %v6930_v33 = vpop.f32.mrb[80].mxu0 }
0x2456   :  { %v5240_v29 = vmul.f32 0.17677669, %v6930_v33  ;;  %v5230_v1 = vpop.f32.mrb[81].mxu0 }
0x2457   :  { %v5239_v12 = vmul.f32 0.17677669, %v5230_v1  ;;  %v7360_v1 = vld [vmem:[%s8882_s10 + $0x94] ss:$8 sps:$4 sm:$0xff]  }
0x2458   :  { %v5242_v54 = vadd.f32 %v5240_v29, %v8110_v9  ;;  %v7355_v29 = vld [vmem:[%s8882_s10 + $0x80] ss:$8 sps:$4 sm:$0xff]  }
0x2459   :  { %v5241_v7 = vadd.f32 %v5239_v12, %v8110_v9  ;;  %v5407_v9 = vadd.f32 %v6242_v25, %v8680_v48  ;;  %v7363_v12 = vld [vmem:[%s8882_s10 + $0xa4] ss:$8 sps:$4 sm:$0xff]  }
0x245a   :  { %v5246_v61 = vsel %vm547_vm2, %v5242_v54, -inf }
0x245b   :  { %5247 = vmax.xlane.f32.xlu0 %v5246_v61  ;;  %v5243_v5 = vsel %vm547_vm2, %v5241_v7, -inf  ;;  %v5411_v49 = vadd.f32 %v5407_v9, %v8411_v47  ;;  %v7364_v61 = vld [vmem:[%s8882_s10 + $0xb0] ss:$8 sps:$4 sm:$0xff]  }
0x245c   :  { %5244 = vmax.xlane.f32.xlu1 %v5243_v5  ;;  %v7369_v5 = vld [vmem:[%s8882_s10 + $0xc4] ss:$8 sps:$4 sm:$0xff]  }
0x24e8   :  { %v5248_v30 = vpop.xlane.xlu0 %5247 }
0x24e9   :  { %v5250_v36 = vsub.f32 %v5242_v54, %v5248_v30  ;;  %v5245_v31 = vpop.xlane.xlu1 %5244  ;;  %v7361_v54 = vld [vmem:[%s8882_s10 + $0xa0] ss:$8 sps:$4 sm:$0xff]  }
0x24ea   :  { %v5249_v51 = vsub.f32 %v5241_v7, %v5245_v31  ;;  %v7366_v7 = vld [vmem:[%s8882_s10 + $0xb4] ss:$8 sps:$4 sm:$0xff]   ;;  %v7367_v30 = vld [vmem:[%s8882_s10 + $0xc0] ss:$8 sps:$4 sm:$0xff]   ;;  %v7370_v31 = vld [vmem:[%s8882_s10 + $0xd0] ss:$8 sps:$4 sm:$0xff]  }
0x24eb   :  { %v5253_v10 = vmul.f32 1.442695, %v5250_v36  ;;  %v7372_v36 = vld [vmem:[%s8882_s10 + $0xd4] ss:$8 sps:$4 sm:$0xff]  }
0x24ec   :  { %v5251_v37 = vmul.f32 1.442695, %v5249_v51  ;;  %v7375_v51 = vld [vmem:[%s8882_s10 + $0xe4] ss:$8 sps:$4 sm:$0xff]  }
0x24ed   :  { %7555 = vpow2.f32 %v5253_v10  ;;  %v7373_v10 = vld [vmem:[%s8882_s10 + $0xe0] ss:$8 sps:$4 sm:$0xff]  }
0x24ee   :  { %7557 = vpow2.f32 %v5251_v37  ;;  %v7378_v37 = vld [vmem:[%s8882_s10 + $0xf4] ss:$8 sps:$4 sm:$0xff]  }
0x24f7   :  { %v7556_v18 = vpop.eup %7555 }
0x24f8   :  { %v7558_v43 = vpop.eup %7557  ;;  %v5258_v45 = vsel %vm547_vm2, %v7556_v18, 0.0 }
0x24f9   :  { %5259 = vadd.xlane.f32.xlu1 %v5258_v45  ;;  %v5255_v46 = vsel %vm547_vm2, %v7558_v43, 0.0 }
0x24fa   :  { %5256 = vadd.xlane.f32.xlu0 %v5255_v46 }
0x24fd   :  { %5419 = vadd.xlane.f32.xlu1 %v5411_v49 }
0x2501   :  { %5421 = vadd.xlane.f32.xlu1 %v5412_v39 }
0x2510   :  { %7231 = vrot.lane.b32.xlu0 %v8500_v38, %s7651_s1 }
0x2521   :  { %v5139_v53 = vpop.f32.mrb[76].mxu1 }
0x2522   :  { %v5146_v48 = vadd.f32 %v5139_v53, %v8710_v55  ;;  %v6922_v2 = vpop.f32.mrb[77].mxu1 }
0x2523   :  { %v5142_v52 = vpop.f32.mrb[78].mxu1 }
0x2524   :  { %v5147_v60 = vadd.f32 %v5142_v52, %v8712_v4  ;;  %v6923_v11 = vpop.f32.mrb[79].mxu1 }
0x2586   :  { %v5260_v3 = vpop.xlane.xlu1 %5259 }
0x2587   :  { %7559 = vrcp.f32 %v5260_v3  ;;  %v5257_v14 = vpop.xlane.xlu0 %5256 }
0x2588   :  { %7561 = vrcp.f32 %v5257_v14 }
0x258a   :  { %v5420_v58 = vpop.xlane.xlu1 %5419 }
0x258b   :  { %v7232_v47 = vpop.permute.xlu0 %7231  ;;  %v5427_v59 = vmul.f32 0.0078125, %v5420_v58  ;;  %v7381_v58 = vld [vmem:[#allocation4 + $0xc8] sm:$0xff]  }
0x258c   :  { %v7234_v35 = vunpack.i.h.bf16 %v7232_v47  ;;  %v7233_v56 = vunpack.i.l.bf16 %v7232_v47  ;;  %v6245_v47 = vld [vmem:[%s8880_s8 + $0x1] ss:$0 sm:$0xff] }
0x258d   :  { %v5431_v21 = vsub.f32 %v5411_v49, %v5427_v59  ;;  %v7390_v59 = vld [vmem:[#allocation4 + $0xa8] sm:$0xff]  }
0x258e   :  { %v7102_v34 = vpack.c.bf16 %v7234_v35, %v7233_v56  ;;  %v5422_v63 = vpop.xlane.xlu1 %5421 }
0x258f   :  { %v5428_v6 = vmul.f32 0.0078125, %v5422_v63  ;;  %v5435_v28 = vmul.f32 %v5431_v21, %v5431_v21 }
0x2590   :  { %7103 = vmatprep.subr.bf16.mxu0 %v7102_v34 }
0x2591   :  { %v7560_v41 = vpop.eup %7559  ;;  %7105 = vmatpush3.bf16.msra.mxu0 %v7102_v34  ;;  %v5432_v16 = vsub.f32 %v5412_v39, %v5428_v6  ;;  %v7393_v6 = vld [vmem:[#allocation4 + $0xf8] sm:$0xff]  }
0x2592   :  { %v7562_v38 = vpop.eup %7561  ;;  %v5264_v20 = vmul.f32 %v7560_v41, %v7556_v18  ;;  %v6246_v41 = vld [vmem:[%s8881_s9 + $0x1] ss:$0 sm:$0xff] }
0x2593   :  { %v5263_v50 = vmul.f32 %v7562_v38, %v7558_v43  ;;  %v5436_v33 = vmul.f32 %v5432_v16, %v5432_v16 }
0x2595   :  { %6935 = vmatprep.mubr.msk.f32.mxu0 %vm547_vm2, %v5263_v50 }
0x2596   :  { %6936 = vmatmul.mubr.msk.f32.vlgmr.msra.gmra.mrb[82].mxu0 %vm547_vm2, %v5264_v20 }
0x2597   :  { %5627 = vmatprep.mubr.bf16.mxu0 %v7647_v23 }
0x2669   :  { %v6937_v55 = vpop.f32.mrb[82].mxu0 }
0x266a   :  { %v5343_v4 = vpop.f32.mrb[83].mxu0 }
0x266b   :  { %v5352_v32 = vpack.c.bf16 %v6937_v55, %v5343_v4  ;;  %v7379_v4 = vld [vmem:[#allocation4 + $0xc0] sm:$0xff]  }
0x266c   :  { %6526 = vmatprep.subr.bf16.mxu1 %v7379_v4 }
0x266d   :  { %6943 = vmatmul.mubr.msk.bf16.vlgmr.msra.gmra.mrb[80].mxu1 %vm451_vm0, %v5352_v32  ;;  %v7380_v32 = vld [vmem:[#allocation4 + $0x80] sm:$0xff]  }
0x266e   :  { %6527 = vmatpush3.bf16.msra.mxu1 %v7380_v32 }
0x266f   :  { %6528 = vmatprep.subr.bf16.mxu1 %v7381_v58 }
0x2740   :  { %v5390_v44 = vpop.f32.mrb[80].mxu1 }
0x2741   :  { %v5397_v8 = vadd.f32 %v5390_v44, %v5146_v48  ;;  %v6944_v22 = vpop.f32.mrb[81].mxu1  ;;  %v7382_v44 = vld [vmem:[#allocation4 + $0x88] sm:$0xff]  }
0x2742   :  { %v5393_v24 = vpop.f32.mrb[82].mxu1  ;;  %6529 = vmatpush3.bf16.msra.mxu1 %v7382_v44  ;;  %v7384_v22 = vld [vmem:[#allocation4 + $0x90] sm:$0xff]  }
0x2743   :  { %v5409_v27 = vadd.f32 %v6242_v25, %v5397_v8  ;;  %v5398_v13 = vadd.f32 %v5393_v24, %v5147_v60  ;;  %v6945_v19 = vpop.f32.mrb[83].mxu1  ;;  %v7383_v8 = vld [vmem:[#allocation4 + $0xd0] sm:$0xff]   ;;  %v7385_v24 = vld [vmem:[#allocation4 + $0xd8] sm:$0xff]  }
0x2744   :  { %6530 = vmatprep.subr.bf16.mxu1 %v7383_v8  ;;  %v7388_v19 = vld [vmem:[#allocation4 + $0xa0] sm:$0xff]  }
0x2745   :  { %v5410_v57 = vadd.f32 %v6242_v25, %v5398_v13  ;;  %v5413_v0 = vadd.f32 %v5409_v27, %v8472_v62  ;;  %v7357_v62 = vld [vmem:[%s8882_s10 + $0x84] ss:$8 sps:$4 sm:$0xff]   ;;  %v7376_v25 = vld [vmem:[%s8882_s10 + $0xf0] ss:$8 sps:$4 sm:$0xff]  }
0x2746   :  { %5595 = vmatprep.subr.bf16.mxu0 %v7357_v62  ;;  %6531 = vmatpush3.bf16.msra.mxu1 %v7384_v22  ;;  %v7386_v27 = vld [vmem:[#allocation4 + $0x98] sm:$0xff]   ;;  %v7387_v13 = vld [vmem:[#allocation4 + $0xe0] sm:$0xff]  }
0x2747   :  { %5423 = vadd.xlane.f32.xlu1 %v5413_v0  ;;  %v5414_v40 = vadd.f32 %v5410_v57, %v8475_v42  ;;  %5596 = vmatpush1.bf16.msra.mxu0 %v7355_v29  ;;  %v7358_v42 = vld [vmem:[%s8882_s10 + $0x90] ss:$8 sps:$4 sm:$0xff]  }
0x2748   :  { %5597 = vmatprep.subr.bf16.mxu0 %v7360_v1  ;;  %6532 = vmatprep.subr.bf16.mxu1 %v7385_v24  ;;  %v7391_v57 = vld [vmem:[#allocation4 + $0xf0] sm:$0xff]  }
0x274a   :  { %6533 = vmatpush3.bf16.msra.mxu1 %v7386_v27 }
0x274b   :  { %5425 = vadd.xlane.f32.xlu1 %v5414_v40  ;;  %5598 = vmatpush1.bf16.msra.mxu0 %v7358_v42 }
0x274c   :  { %5599 = vmatprep.subr.bf16.mxu0 %v7363_v12  ;;  %6534 = vmatprep.subr.bf16.mxu1 %v7387_v13 }
0x274e   :  { %6535 = vmatpush3.bf16.msra.mxu1 %v7388_v19 }
0x274f   :  { %5439 = vadd.xlane.f32.xlu1 %v5435_v28  ;;  %5600 = vmatpush1.bf16.msra.mxu0 %v7361_v54 }
0x2750   :  { %5601 = vmatprep.subr.bf16.mxu0 %v7366_v7 }
0x2753   :  { %5441 = vadd.xlane.f32.xlu1 %v5436_v33  ;;  %5602 = vmatpush1.bf16.msra.mxu0 %v7364_v61 }
0x2754   :  { %5603 = vmatprep.subr.bf16.mxu0 %v7369_v5 }
0x2757   :  { %5604 = vmatpush1.bf16.msra.mxu0 %v7367_v30 }
0x2758   :  { %5605 = vmatprep.subr.bf16.mxu0 %v7372_v36  ;;  %v6263_v36 = vld [vmem:[%s8883_s11 + $0x2] sm:$0x3] }
0x275b   :  { %5606 = vmatpush1.bf16.msra.mxu0 %v7370_v31  ;;  %v5508_v31 = vrot.slane %v6263_v36, %v7882_v15 }
0x275c   :  { %5607 = vmatprep.subr.bf16.mxu0 %v7375_v51  ;;  %v5512_v51 = vrot.slane %v6263_v36, %v7888_v17 }
0x275f   :  { %5608 = vmatpush1.bf16.msra.mxu0 %v7373_v10 }
0x2760   :  { %5609 = vmatprep.subr.bf16.mxu0 %v7378_v37 }
0x2763   :  { %5610 = vmatpush1.bf16.msra.mxu0 %v7376_v25 }
0x27d4   :  { %v5424_v18 = vpop.xlane.xlu1 %5423 }
0x27d5   :  { %v5429_v9 = vmul.f32 0.0078125, %v5424_v18 }
0x27d7   :  { %v8813_v43 = vsub.f32 %v5413_v0, %v5429_v9  ;;  %v7392_v0 = vld [vmem:[#allocation4 + $0xb0] sm:$0xff]  }
0x27d8   :  { %v5426_v45 = vpop.xlane.xlu1 %5425 }
0x27d9   :  { %v5430_v46 = vmul.f32 0.0078125, %v5426_v45  ;;  %v5437_v26 = vmul.f32 %v8813_v43, %v8813_v43 }
0x27db   :  { %v8817_v49 = vsub.f32 %v5414_v40, %v5430_v46  ;;  %5443 = vadd.xlane.f32.xlu0 %v5437_v26  ;;  %v7394_v40 = vld [vmem:[#allocation4 + $0xb8] sm:$0xff]  }
0x27dc   :  { %v5440_v39 = vpop.xlane.xlu1 %5439 }
0x27dd   :  { %v5447_v53 = vmul.f32 0.0078125, %v5440_v39  ;;  %v5438_v48 = vmul.f32 %v8817_v49, %v8817_v49 }
0x27df   :  { %v5451_v2 = vadd.f32 1e-05, %v5447_v53  ;;  %5445 = vadd.xlane.f32.xlu1 %v5438_v48 }
0x27e0   :  { %v5442_v52 = vpop.xlane.xlu1 %5441 }
0x27e1   :  { %7563 = vrsqrt.f32 %v5451_v2  ;;  %v5448_v60 = vmul.f32 0.0078125, %v5442_v52 }
0x27e3   :  { %v5452_v11 = vadd.f32 1e-05, %v5448_v60 }
0x27e5   :  { %7565 = vrsqrt.f32 %v5452_v11 }
0x27eb   :  { %v7564_v3 = vpop.eup %7563 }
0x27ec   :  { %v5459_v14 = vmul.f32 %v7564_v3, %v5431_v21 }
0x27ee   :  { %v5469_v34 = vmul.f32 %v6245_v47, %v5459_v14 }
0x27ef   :  { %v7566_v35 = vpop.eup %7565 }
0x27f0   :  { %v5460_v56 = vmul.f32 %v7566_v35, %v5432_v16  ;;  %v8827_v50 = vadd.f32 %v6246_v41, %v5469_v34 }
0x27f2   :  { %v5470_v38 = vmul.f32 %v6245_v47, %v5460_v56 }
0x27f4   :  { %v8829_v20 = vadd.f32 %v6246_v41, %v5470_v38 }
0x27f6   :  { %v5500_v55 = vpack.c.bf16 %v8829_v20, %v8827_v50 }
0x27f8   :  { %5628 = vmatmul.mubr.bf16.vlgmr.msra.gmra.mrb[84].mxu0 %v5500_v55 }
0x27f9   :  { %5637 = vmatprep.mubr.bf16.mxu0 %v7647_v23  ;;  %v7389_v23 = vld [vmem:[#allocation4 + $0xe8] sm:$0xff]  }
0x27fa   :  { %6536 = vmatprep.subr.bf16.mxu1 %v7389_v23 }
0x27fb   :  { %6537 = vmatpush3.bf16.msra.mxu1 %v7390_v59 }
0x27fc   :  { %6538 = vmatprep.subr.bf16.mxu1 %v7391_v57 }
0x27ff   :  { %6539 = vmatpush3.bf16.msra.mxu1 %v7392_v0 }
0x2800   :  { %6540 = vmatprep.subr.bf16.mxu1 %v7393_v6 }
0x2803   :  { %6541 = vmatpush3.bf16.msra.mxu1 %v7394_v40 }
0x2868   :  { %v5444_v63 = vpop.xlane.xlu0 %5443 }
0x2869   :  { %v5449_v21 = vmul.f32 0.0078125, %v5444_v63 }
0x286b   :  { %v5453_v16 = vadd.f32 1e-05, %v5449_v21 }
0x286c   :  { %v5446_v28 = vpop.xlane.xlu1 %5445 }
0x286d   :  { %7567 = vrsqrt.f32 %v5453_v16  ;;  %v5450_v33 = vmul.f32 0.0078125, %v5446_v28 }
0x286f   :  { %v5454_v29 = vadd.f32 1e-05, %v5450_v33 }
0x2871   :  { %7569 = vrsqrt.f32 %v5454_v29 }
0x2877   :  { %v7568_v62 = vpop.eup %7567 }
0x2878   :  { %v5461_v42 = vmul.f32 %v7568_v62, %v8813_v43 }
0x287a   :  { %v5471_v54 = vmul.f32 %v6245_v47, %v5461_v42 }
0x287b   :  { %v7570_v1 = vpop.eup %7569 }
0x287c   :  { %v5462_v12 = vmul.f32 %v7570_v1, %v8817_v49  ;;  %v8836_v61 = vadd.f32 %v6246_v41, %v5471_v54 }
0x287e   :  { %v5472_v7 = vmul.f32 %v6245_v47, %v5462_v12 }
0x2880   :  { %v8838_v5 = vadd.f32 %v6246_v41, %v5472_v7 }
0x2882   :  { %v5501_v30 = vpack.c.bf16 %v8838_v5, %v8836_v61 }
0x2884   :  { %5638 = vmatmul.mubr.bf16.gmra.mrb[88].mxu0 %v5501_v30 }
0x28cb   :  { %v5629_v10 = vpop.f32.mrb[84].mxu0 }
0x28cc   :  { %v5630_v37 = vadd.f32 %v5629_v10, %v5508_v31  ;;  %v5631_v25 = vpop.f32.mrb[85].mxu0 }
0x28cd   :  { %v5632_v18 = vadd.f32 %v5631_v25, %v5512_v51  ;;  %v5633_v9 = vpop.f32.mrb[86].mxu0 }
0x28ce   :  { %v5648_v43 = vmul.f32 %v5630_v37, %v5630_v37  ;;  %v5634_v45 = vadd.f32 %v5633_v9, %v5508_v31  ;;  %v5635_v46 = vpop.f32.mrb[87].mxu0 }
0x28cf   :  { %v5649_v26 = vmul.f32 %v5632_v18, %v5632_v18  ;;  %v5636_v49 = vadd.f32 %v5635_v46, %v5512_v51 }
0x28d0   :  { %v5656_v39 = vmul.f32 %v5648_v43, %v5630_v37  ;;  %v5650_v53 = vmul.f32 %v5634_v45, %v5634_v45 }
0x28d1   :  { %v5657_v48 = vmul.f32 %v5649_v26, %v5632_v18  ;;  %v5651_v2 = vmul.f32 %v5636_v49, %v5636_v49 }
0x28d2   :  { %v5664_v52 = vmul.f32 0.044715, %v5656_v39  ;;  %v5658_v60 = vmul.f32 %v5650_v53, %v5634_v45 }
0x28d3   :  { %v5665_v11 = vmul.f32 0.044715, %v5657_v48  ;;  %v5659_v15 = vmul.f32 %v5651_v2, %v5636_v49 }
0x28d4   :  { %v5672_v3 = vadd.f32 %v5664_v52, %v5630_v37  ;;  %v5666_v17 = vmul.f32 0.044715, %v5658_v60 }
0x28d5   :  { %v5673_v14 = vadd.f32 %v5665_v11, %v5632_v18  ;;  %v5667_v47 = vmul.f32 0.044715, %v5659_v15 }
0x28d6   :  { %v5680_v35 = vmul.f32 0.7978846, %v5672_v3  ;;  %v5674_v56 = vadd.f32 %v5666_v17, %v5634_v45 }
0x28d7   :  { %v5681_v34 = vmul.f32 0.7978846, %v5673_v14  ;;  %v5675_v41 = vadd.f32 %v5667_v47, %v5636_v49 }
0x28d8   :  { %7571 = vtanh.f32 %v5680_v35  ;;  %v5682_v38 = vmul.f32 0.7978846, %v5674_v56 }
0x28d9   :  { %7573 = vtanh.f32 %v5681_v34  ;;  %v5683_v55 = vmul.f32 0.7978846, %v5675_v41 }
0x28da   :  { %7575 = vtanh.f32 %v5682_v38 }
0x28db   :  { %7577 = vtanh.f32 %v5683_v55 }
0x28e2   :  { %v7572_v4 = vpop.eup %7571 }
0x28e3   :  { %v7574_v32 = vpop.eup %7573  ;;  %v5696_v58 = vadd.f32 1.0, %v7572_v4 }
0x28e4   :  { %v7576_v44 = vpop.eup %7575  ;;  %v5697_v8 = vadd.f32 1.0, %v7574_v32 }
0x28e5   :  { %v7578_v22 = vpop.eup %7577  ;;  %v5704_v24 = vmul.f32 0.5, %v5696_v58  ;;  %v5698_v27 = vadd.f32 1.0, %v7576_v44 }
0x28e6   :  { %v5699_v13 = vadd.f32 1.0, %v7578_v22  ;;  %v5705_v19 = vmul.f32 0.5, %v5697_v8  ;;  %v6281_v22 = vld [vmem:[%s8885_s13 + $0x1] ss:$0 sm:$0xff] }
0x28e7   :  { %v5706_v23 = vmul.f32 0.5, %v5698_v27  ;;  %v5712_v57 = vmul.f32 %v5704_v24, %v5630_v37 }
0x28e8   :  { %v5707_v59 = vmul.f32 0.5, %v5699_v13  ;;  %v5713_v63 = vmul.f32 %v5705_v19, %v5632_v18 }
0x28e9   :  { %v5714_v0 = vmul.f32 %v5706_v23, %v5634_v45 }
0x28ea   :  { %v5715_v21 = vmul.f32 %v5707_v59, %v5636_v49 }
0x28eb   :  { %v5753_v6 = vpack.c.bf16 %v5714_v0, %v5712_v57 }
0x28ec   :  { %v5754_v40 = vpack.c.bf16 %v5715_v21, %v5713_v63 }
0x28ee   :  { %5893 = vmatprep.mubr.bf16.mxu1 %v5754_v40 }
0x28ef   :  { %5894 = vmatmul.mubr.bf16.vlgmr.msra.gmra.mrb[84].mxu1 %v5753_v6 }
0x2957   :  { %v5639_v16 = vpop.f32.mrb[88].mxu0 }
0x2958   :  { %v5640_v28 = vadd.f32 %v5639_v16, %v5508_v31  ;;  %v5641_v33 = vpop.f32.mrb[89].mxu0 }
0x2959   :  { %v5642_v29 = vadd.f32 %v5641_v33, %v5512_v51  ;;  %v5643_v62 = vpop.f32.mrb[90].mxu0 }
0x295a   :  { %v5652_v42 = vmul.f32 %v5640_v28, %v5640_v28  ;;  %v5644_v1 = vadd.f32 %v5643_v62, %v5508_v31  ;;  %v5645_v12 = vpop.f32.mrb[91].mxu0 }
0x295b   :  { %v5653_v54 = vmul.f32 %v5642_v29, %v5642_v29  ;;  %v5646_v7 = vadd.f32 %v5645_v12, %v5512_v51 }
0x295c   :  { %v5660_v30 = vmul.f32 %v5652_v42, %v5640_v28  ;;  %v5654_v36 = vmul.f32 %v5644_v1, %v5644_v1 }
0x295d   :  { %v5661_v10 = vmul.f32 %v5653_v54, %v5642_v29  ;;  %v5655_v37 = vmul.f32 %v5646_v7, %v5646_v7 }
0x295e   :  { %v5668_v25 = vmul.f32 0.044715, %v5660_v30  ;;  %v5662_v18 = vmul.f32 %v5654_v36, %v5644_v1 }
0x295f   :  { %v5669_v9 = vmul.f32 0.044715, %v5661_v10  ;;  %v5663_v43 = vmul.f32 %v5655_v37, %v5646_v7 }
0x2960   :  { %v5676_v45 = vadd.f32 %v5668_v25, %v5640_v28  ;;  %v5670_v46 = vmul.f32 0.044715, %v5662_v18 }
0x2961   :  { %v5677_v26 = vadd.f32 %v5669_v9, %v5642_v29  ;;  %v5671_v49 = vmul.f32 0.044715, %v5663_v43 }
0x2962   :  { %v5684_v39 = vmul.f32 0.7978846, %v5676_v45  ;;  %v5678_v53 = vadd.f32 %v5670_v46, %v5644_v1 }
0x2963   :  { %v5685_v48 = vmul.f32 0.7978846, %v5677_v26  ;;  %v5679_v2 = vadd.f32 %v5671_v49, %v5646_v7 }
0x2964   :  { %7579 = vtanh.f32 %v5684_v39  ;;  %v5686_v31 = vmul.f32 0.7978846, %v5678_v53 }
0x2965   :  { %7581 = vtanh.f32 %v5685_v48  ;;  %v5687_v51 = vmul.f32 0.7978846, %v5679_v2 }
0x2966   :  { %7583 = vtanh.f32 %v5686_v31  ;;  %v6300_v31 = vld [vmem:[%s8886_s14 + $0x1] ss:$0 sm:$0xff] }
0x2967   :  { %7585 = vtanh.f32 %v5687_v51 }
0x296e   :  { %v7580_v52 = vpop.eup %7579 }
0x296f   :  { %v7582_v60 = vpop.eup %7581  ;;  %v5700_v11 = vadd.f32 1.0, %v7580_v52  ;;  %v6301_v52 = vld [vmem:[%s8887_s15 + $0x1] ss:$0 sm:$0xff] }
0x2970   :  { %v7584_v15 = vpop.eup %7583  ;;  %v5701_v3 = vadd.f32 1.0, %v7582_v60 }
0x2971   :  { %v7586_v17 = vpop.eup %7585  ;;  %v5702_v14 = vadd.f32 1.0, %v7584_v15  ;;  %v5708_v47 = vmul.f32 0.5, %v5700_v11 }
0x2972   :  { %v5703_v35 = vadd.f32 1.0, %v7586_v17  ;;  %v5709_v56 = vmul.f32 0.5, %v5701_v3 }
0x2973   :  { %v5710_v34 = vmul.f32 0.5, %v5702_v14  ;;  %v5716_v38 = vmul.f32 %v5708_v47, %v5640_v28 }
0x2974   :  { %v5711_v41 = vmul.f32 0.5, %v5703_v35  ;;  %v5717_v4 = vmul.f32 %v5709_v56, %v5642_v29 }
0x2975   :  { %v5718_v55 = vmul.f32 %v5710_v34, %v5644_v1 }
0x2976   :  { %v5719_v32 = vmul.f32 %v5711_v41, %v5646_v7 }
0x2977   :  { %v5755_v58 = vpack.c.bf16 %v5718_v55, %v5716_v38 }
0x2978   :  { %v5756_v44 = vpack.c.bf16 %v5719_v32, %v5717_v4 }
0x297a   :  { %5901 = vmatprep.mubr.bf16.mxu1 %v5756_v44 }
0x297b   :  { %5902 = vmatmul.mubr.bf16.gmra.mrb[88].mxu1 %v5755_v58 }
0x29c2   :  { %v6542_v8 = vpop.f32.mrb[84].mxu1 }
0x29c3   :  { %v6543_v24 = vpop.f32.mrb[85].mxu1 }
0x29c4   :  { %v6544_v27 = vadd.f32 %v6543_v24, %v6542_v8  ;;  %v6545_v13 = vpop.f32.mrb[86].mxu1 }
0x29c5   :  { %v6546_v19 = vpop.f32.mrb[87].mxu1 }
0x29c6   :  { %v5896_v23 = vadd.f32 %v6544_v27, %v6281_v22  ;;  %v6547_v59 = vadd.f32 %v6546_v19, %v6545_v13 }
0x29c8   :  { %v5899_v57 = vadd.f32 %v6547_v59, %v6281_v22  ;;  %v5910_v0 = vadd.f32 %v5896_v23, %v8827_v50 }
0x29ca   :  { %5918 = vadd.xlane.f32.xlu1 %v5910_v0  ;;  %v5911_v63 = vadd.f32 %v5899_v57, %v8829_v20 }
0x29ce   :  { %5920 = vadd.xlane.f32.xlu1 %v5911_v63 }
0x2a4e   :  { %v6548_v21 = vpop.f32.mrb[88].mxu1 }
0x2a4f   :  { %v6549_v6 = vpop.f32.mrb[89].mxu1 }
0x2a50   :  { %v6550_v40 = vadd.f32 %v6549_v6, %v6548_v21  ;;  %v6551_v16 = vpop.f32.mrb[90].mxu1 }
0x2a51   :  { %v6552_v28 = vpop.f32.mrb[91].mxu1 }
0x2a52   :  { %v5904_v33 = vadd.f32 %v6550_v40, %v6281_v22  ;;  %v6553_v29 = vadd.f32 %v6552_v28, %v6551_v16 }
0x2a54   :  { %v5907_v62 = vadd.f32 %v6553_v29, %v6281_v22  ;;  %v5912_v42 = vadd.f32 %v5904_v33, %v8836_v61 }
0x2a56   :  { %5922 = vadd.xlane.f32.xlu1 %v5912_v42  ;;  %v5913_v54 = vadd.f32 %v5907_v62, %v8838_v5 }
0x2a57   :  { %v5919_v1 = vpop.xlane.xlu1 %5918 }
0x2a58   :  { %v5926_v12 = vmul.f32 0.0078125, %v5919_v1 }
0x2a5a   :  { %v5930_v50 = vsub.f32 %v5910_v0, %v5926_v12  ;;  %5924 = vadd.xlane.f32.xlu1 %v5913_v54 }
0x2a5b   :  { %v5921_v7 = vpop.xlane.xlu1 %5920 }
0x2a5c   :  { %v5927_v20 = vmul.f32 0.0078125, %v5921_v7  ;;  %v5934_v30 = vmul.f32 %v5930_v50, %v5930_v50 }
0x2a5e   :  { %v5931_v36 = vsub.f32 %v5911_v63, %v5927_v20  ;;  %5938 = vadd.xlane.f32.xlu1 %v5934_v30 }
0x2a60   :  { %v5935_v10 = vmul.f32 %v5931_v36, %v5931_v36 }
0x2a62   :  { %5940 = vadd.xlane.f32.xlu1 %v5935_v10 }
0x2ae3   :  { %v5923_v37 = vpop.xlane.xlu1 %5922 }
0x2ae4   :  { %v5928_v25 = vmul.f32 0.0078125, %v5923_v37 }
0x2ae6   :  { %v5932_v18 = vsub.f32 %v5912_v42, %v5928_v25 }
0x2ae7   :  { %v5925_v9 = vpop.xlane.xlu1 %5924 }
0x2ae8   :  { %v5929_v43 = vmul.f32 0.0078125, %v5925_v9  ;;  %v5936_v61 = vmul.f32 %v5932_v18, %v5932_v18 }
0x2aea   :  { %v5933_v45 = vsub.f32 %v5913_v54, %v5929_v43  ;;  %5942 = vadd.xlane.f32.xlu0 %v5936_v61 }
0x2aeb   :  { %v5939_v46 = vpop.xlane.xlu1 %5938 }
0x2aec   :  { %v5946_v26 = vmul.f32 0.0078125, %v5939_v46  ;;  %v5937_v5 = vmul.f32 %v5933_v45, %v5933_v45 }
0x2aee   :  { %v5950_v49 = vadd.f32 1e-05, %v5946_v26  ;;  %5944 = vadd.xlane.f32.xlu1 %v5937_v5 }
0x2aef   :  { %v5941_v39 = vpop.xlane.xlu1 %5940 }
0x2af0   :  { %7587 = vrsqrt.f32 %v5950_v49  ;;  %v5947_v53 = vmul.f32 0.0078125, %v5941_v39 }
0x2af2   :  { %v5951_v48 = vadd.f32 1e-05, %v5947_v53 }
0x2af4   :  { %7589 = vrsqrt.f32 %v5951_v48 }
0x2afa   :  { %v7588_v2 = vpop.eup %7587 }
0x2afb   :  { %v5958_v51 = vmul.f32 %v7588_v2, %v5930_v50 }
0x2afd   :  { %v5968_v60 = vmul.f32 %v6300_v31, %v5958_v51 }
0x2afe   :  { %v7590_v11 = vpop.eup %7589 }
0x2aff   :  { %v5978_v15 = vadd.f32 %v6301_v52, %v5968_v60  ;;  %v5959_v3 = vmul.f32 %v7590_v11, %v5931_v36 }
0x2b01   :  { %5982 = vst [vmem:[%s8888_s16] sm:$0xff] %v5978_v15  ;;  %v5969_v17 = vmul.f32 %v6300_v31, %v5959_v3 }
0x2b03   :  { %v5979_v14 = vadd.f32 %v6301_v52, %v5969_v17 }
0x2b05   :  { %5983 = vst [vmem:[%s8888_s16 + $0x8] sm:$0xff] %v5979_v14 }
0x2b77   :  { %v5943_v47 = vpop.xlane.xlu0 %5942 }
0x2b78   :  { %v5948_v35 = vmul.f32 0.0078125, %v5943_v47 }
0x2b7a   :  { %v5952_v56 = vadd.f32 1e-05, %v5948_v35 }
0x2b7b   :  { %v5945_v34 = vpop.xlane.xlu1 %5944 }
0x2b7c   :  { %7591 = vrsqrt.f32 %v5952_v56  ;;  %v5949_v41 = vmul.f32 0.0078125, %v5945_v34 }
0x2b7e   :  { %v5953_v38 = vadd.f32 1e-05, %v5949_v41 }
0x2b80   :  { %7593 = vrsqrt.f32 %v5953_v38 }
0x2b86   :  { %v7592_v55 = vpop.eup %7591 }
0x2b87   :  { %v5960_v4 = vmul.f32 %v7592_v55, %v5932_v18 }
0x2b89   :  { %v5970_v32 = vmul.f32 %v6300_v31, %v5960_v4 }
0x2b8a   :  { %v7594_v58 = vpop.eup %7593 }
0x2b8b   :  { %v5980_v44 = vadd.f32 %v6301_v52, %v5970_v32  ;;  %v5961_v8 = vmul.f32 %v7594_v58, %v5933_v45 }
0x2b8d   :  { %5984 = vst [vmem:[%s8888_s16 + $0x10] sm:$0xff] %v5980_v44  ;;  %v5971_v22 = vmul.f32 %v6300_v31, %v5961_v8 }
0x2b8f   :  { %v5981_v24 = vadd.f32 %v6301_v52, %v5971_v22 }
0x2b91   :  { %5985 = vst [vmem:[%s8888_s16 + $0x18] sm:$0xff] %v5981_v24 }
0x2b92   :  { %5990 = vsyncpa [#allocation3], 1 }
0x2b93   :  { %5991 = vsyncpa [#allocation5], 1 }

</bundles_post_ra>
